<compile_context>
chip_gen: v7x
topology: tpu7x:2x2x1
jax: 0.10.0
libtpu: 0.0.40
codegen_flags: <defaults>
</compile_context>

<pallas_src>
import functools
import math

import jax
import jax.numpy as jnp
from jax.experimental import pallas as pl

# ----- scaled-down BERT-base config (same structure, small dims) -----
VOCAB = 128           # bert: 30522
MAX_POS = 32          # bert: 512
HIDDEN = 128          # bert: 768
NUM_HEADS = 4         # bert: 12
HEAD_DIM = HIDDEN // NUM_HEADS
INTERMEDIATE = 256    # bert: 3072
NUM_LAYERS = 2        # bert: 12
SEMANTIC_DIM = 128    # as in the PyTorch module
LN_EPS = 1e-12        # BERT LayerNorm eps


# ------------------------------ in-kernel helpers ----------------------------

def _mm(x, w):
    """bf16 x bf16 -> f32 accumulate matmul (MXU)."""
    return jnp.dot(x.astype(w.dtype), w, preferred_element_type=jnp.float32)


def _ln(x, g, b):
    """LayerNorm over last dim, f32 math."""
    mu = jnp.mean(x, axis=-1, keepdims=True)
    xc = x - mu
    var = jnp.mean(xc * xc, axis=-1, keepdims=True)
    return xc * jax.lax.rsqrt(var + LN_EPS) * g + b


def _gelu(x):
    # TODO(synk): HF BERT uses exact erf-GELU; tanh approximation used here (EUP tanh).
    c = jnp.float32(math.sqrt(2.0 / math.pi))
    return 0.5 * x * (1.0 + jnp.tanh(c * (x + 0.044715 * x * x * x)))


# --------------------------- fused decoder kernel ----------------------------

def _decoder_kernel(
    ids_ref, mask_ref, sem_ref,
    word_emb_ref, pos_emb_ref, type_emb_ref, emb_g_ref, emb_b_ref,
    wqkv_ref, bqkv_ref, wo_ref, bo_ref, g1_ref, b1_ref,
    wff1_ref, bff1_ref, wff2_ref, bff2_ref, g2_ref, b2_ref,
    dec_w_ref, dec_b_ref, voc_w_ref, voc_b_ref,
    out_ref, *, batch, seq):
  n = batch * seq

  # ---------------- BERT embeddings (word gather via one-hot MXU matmul) -----
  ids = ids_ref[...]                                               # (n, 1) int32
  iota = jax.lax.broadcasted_iota(jnp.int32, (n, VOCAB), 1)
  onehot = jnp.where(iota == ids, 1.0, 0.0)                        # (n, VOCAB) f32
  x = jnp.dot(onehot, word_emb_ref[...], preferred_element_type=jnp.float32)
  pos = pos_emb_ref[...]                                           # (seq, HIDDEN)
  x = x + jnp.concatenate([pos] * batch, axis=0) + type_emb_ref[...]
  h = _ln(x, emb_g_ref[...], emb_b_ref[...])                       # (n, HIDDEN)

  add_mask = mask_ref[...]                                         # (batch, seq) additive

  scale = 1.0 / math.sqrt(HEAD_DIM)
  for l in range(NUM_LAYERS):
    wqkv, bqkv = wqkv_ref[l], bqkv_ref[l]
    wo, bo = wo_ref[l], bo_ref[l]
    g1, b1 = g1_ref[l], b1_ref[l]
    wff1, bff1 = wff1_ref[l], bff1_ref[l]
    wff2, bff2 = wff2_ref[l], bff2_ref[l]
    g2, b2 = g2_ref[l], b2_ref[l]

    # fused Q/K/V projection: one (HIDDEN, 3*HIDDEN) GEMM
    qkv = _mm(h, wqkv) + bqkv                                      # (n, 3H) f32
    q = qkv[:, 0:HIDDEN]
    k = qkv[:, HIDDEN:2 * HIDDEN]
    v = qkv[:, 2 * HIDDEN:3 * HIDDEN]

    # multi-head self-attention, all inside this single kernel invocation
    ctx_batches = []
    for bi in range(batch):
      r0 = bi * seq
      q_b = q[r0:r0 + seq, :]
      k_b = k[r0:r0 + seq, :]
      v_b = v[r0:r0 + seq, :]
      m_b = add_mask[bi:bi + 1, :]                                 # (1, seq)
      heads = []
      for hi in range(NUM_HEADS):
        c0 = hi * HEAD_DIM
        qh = q_b[:, c0:c0 + HEAD_DIM].astype(jnp.bfloat16)
        kh = k_b[:, c0:c0 + HEAD_DIM].astype(jnp.bfloat16)
        vh = v_b[:, c0:c0 + HEAD_DIM].astype(jnp.bfloat16)
        s = jax.lax.dot_general(qh, kh, (((1,), (1,)), ((), ())),
                                preferred_element_type=jnp.float32)  # (seq, seq)
        s = s * scale + m_b
        s = s - jnp.max(s, axis=-1, keepdims=True)
        p = jnp.exp(s)
        p = p * pl.reciprocal(jnp.sum(p, axis=-1, keepdims=True), approx=True)
        heads.append(jnp.dot(p.astype(jnp.bfloat16), vh,
                             preferred_element_type=jnp.float32))    # (seq, HEAD_DIM)
      ctx_batches.append(jnp.concatenate(heads, axis=-1))             # (seq, HIDDEN)
    ctx = jnp.concatenate(ctx_batches, axis=0)                        # (n, HIDDEN)

    attn_out = _mm(ctx, wo) + bo
    h1 = _ln(h + attn_out, g1, b1)                                    # add & norm (fused residual)

    ffn = _gelu(_mm(h1, wff1) + bff1)
    ffn_out = _mm(ffn, wff2) + bff2
    h = _ln(h1 + ffn_out, g2, b2)                                     # add & norm (fused residual)

  # ---------------- decoder head: expand semantic features, add, project -----
  sem = sem_ref[...]                                                  # (batch, SEMANTIC_DIM)
  expanded = _mm(sem, dec_w_ref[...]) + dec_b_ref[...]                # (batch, HIDDEN)
  exp_rows = jnp.concatenate(
      [jnp.broadcast_to(expanded[bi:bi + 1, :], (seq, HIDDEN)) for bi in range(batch)],
      axis=0)                                                         # (n, HIDDEN)
  enhanced = h + exp_rows
  logits = _mm(enhanced, voc_w_ref[...]) + voc_b_ref[...]             # (n, VOCAB) lane-dense
  out_ref[...] = logits.astype(out_ref.dtype)


# ------------------------- tiny dense kernel (no-target branch) ---------------

def _dense_kernel(x_ref, w_ref, b_ref, o_ref):
  y = jnp.dot(x_ref[...].astype(w_ref.dtype), w_ref[...],
              preferred_element_type=jnp.float32) + b_ref[...]
  o_ref[...] = y.astype(o_ref.dtype)


def _dense(x, w, b):
  m, n = x.shape[0], w.shape[1]
  return pl.pallas_call(
      _dense_kernel,
      out_shape=jax.ShapeDtypeStruct((m, n), jnp.float32),
  )(x, w, b)


# --------------------------- parameters (synthetic) ---------------------------

def init_params(key):
  def nrm(k, shape, std=0.02, dtype=jnp.float32):
    return (std * jax.random.normal(k, shape, jnp.float32)).astype(dtype)

  ks = jax.random.split(key, 16)
  L = NUM_LAYERS
  return {
      "word_emb": nrm(ks[0], (VOCAB, HIDDEN)),
      "pos_emb": nrm(ks[1], (MAX_POS, HIDDEN)),
      "type_emb": nrm(ks[2], (1, HIDDEN)),
      "emb_ln_g": jnp.ones((1, HIDDEN), jnp.float32),
      "emb_ln_b": jnp.zeros((1, HIDDEN), jnp.float32),
      # per-layer weights stacked with a leading layer axis (all matmul weights bf16)
      "wqkv": nrm(ks[3], (L, HIDDEN, 3 * HIDDEN), dtype=jnp.bfloat16),
      "bqkv": nrm(ks[4], (L, 1, 3 * HIDDEN), std=0.01),
      "wo": nrm(ks[5], (L, HIDDEN, HIDDEN), dtype=jnp.bfloat16),
      "bo": nrm(ks[6], (L, 1, HIDDEN), std=0.01),
      "ln1_g": jnp.ones((L, 1, HIDDEN), jnp.float32),
      "ln1_b": jnp.zeros((L, 1, HIDDEN), jnp.float32),
      "wff1": nrm(ks[7], (L, HIDDEN, INTERMEDIATE), dtype=jnp.bfloat16),
      "bff1": nrm(ks[8], (L, 1, INTERMEDIATE), std=0.01),
      "wff2": nrm(ks[9], (L, INTERMEDIATE, HIDDEN), dtype=jnp.bfloat16),
      "bff2": nrm(ks[10], (L, 1, HIDDEN), std=0.01),
      "ln2_g": jnp.ones((L, 1, HIDDEN), jnp.float32),
      "ln2_b": jnp.zeros((L, 1, HIDDEN), jnp.float32),
      # decoder_embedding: nn.Linear(SEMANTIC_DIM, HIDDEN)
      "dec_w": nrm(ks[11], (SEMANTIC_DIM, HIDDEN), dtype=jnp.bfloat16),
      "dec_b": nrm(ks[12], (1, HIDDEN), std=0.01),
      # vocab_projection: nn.Linear(HIDDEN, VOCAB)
      "vocab_w": nrm(ks[13], (HIDDEN, VOCAB), dtype=jnp.bfloat16),
      "vocab_b": nrm(ks[14], (1, VOCAB), std=0.01),
  }


# ------------------------------- forward pass ---------------------------------

def semantic_decoder(params, semantic_features, tgt_input_ids=None, tgt_attention_mask=None):
  """Mirrors SemanticDecoder.forward."""
  if tgt_input_ids is None:
    # forward returns expanded_features = decoder_embedding(semantic_features)
    return _dense(semantic_features.astype(jnp.float32), params["dec_w"], params["dec_b"])

  b, s = tgt_input_ids.shape
  ids = tgt_input_ids.reshape(b * s, 1).astype(jnp.int32)
  if tgt_attention_mask is None:
    tgt_attention_mask = jnp.ones((b, s), jnp.int32)
  add_mask = (1.0 - tgt_attention_mask.astype(jnp.float32)) * jnp.float32(-1e9)
  pos = params["pos_emb"][:s]                                       # (s, HIDDEN)

  logits = pl.pallas_call(
      functools.partial(_decoder_kernel, batch=b, seq=s),
      out_shape=jax.ShapeDtypeStruct((b * s, VOCAB), jnp.float32),
  )(ids, add_mask, semantic_features.astype(jnp.float32),
    params["word_emb"], pos, params["type_emb"], params["emb_ln_g"], params["emb_ln_b"],
    params["wqkv"], params["bqkv"], params["wo"], params["bo"],
    params["ln1_g"], params["ln1_b"],
    params["wff1"], params["bff1"], params["wff2"], params["bff2"],
    params["ln2_g"], params["ln2_b"],
    params["dec_w"], params["dec_b"], params["vocab_w"], params["vocab_b"])
  return logits.reshape(b, s, VOCAB)


# ------------------------- pure-JAX reference (for checking) ------------------

def reference_forward(params, semantic_features, ids, attention_mask):
  f32 = lambda a: a.astype(jnp.float32)
  b, s = ids.shape

  def ln(x, g, bb):
    mu = x.mean(-1, keepdims=True)
    xc = x - mu
    var = (xc * xc).mean(-1, keepdims=True)
    return xc * jax.lax.rsqrt(var + LN_EPS) * g + bb

  def gelu(x):
    c = math.sqrt(2.0 / math.pi)
    return 0.5 * x * (1.0 + jnp.tanh(c * (x + 0.044715 * x ** 3)))

  x = (params["word_emb"][ids] + params["pos_emb"][:s][None]
       + params["type_emb"][0][None, None])
  h = ln(x, params["emb_ln_g"][0], params["emb_ln_b"][0])
  add_mask = (1.0 - attention_mask.astype(jnp.float32)) * (-1e9)

  for l in range(NUM_LAYERS):
    qkv = h @ f32(params["wqkv"][l]) + params["bqkv"][l]
    q, k, v = jnp.split(qkv, 3, axis=-1)
    sh = lambda t: t.reshape(b, s, NUM_HEADS, HEAD_DIM).transpose(0, 2, 1, 3)
    qh, kh, vh = sh(q), sh(k), sh(v)
    scores = jnp.einsum("bhqd,bhkd->bhqk", qh, kh) / math.sqrt(HEAD_DIM)
    scores = scores + add_mask[:, None, None, :]
    p = jax.nn.softmax(scores, axis=-1)
    ctx = jnp.einsum("bhqk,bhkd->bhqd", p, vh).transpose(0, 2, 1, 3).reshape(b, s, HIDDEN)
    attn_out = ctx @ f32(params["wo"][l]) + params["bo"][l]
    h1 = ln(h + attn_out, params["ln1_g"][l][0], params["ln1_b"][l][0])
    ffn = gelu(h1 @ f32(params["wff1"][l]) + params["bff1"][l])
    ffn_out = ffn @ f32(params["wff2"][l]) + params["bff2"][l]
    h = ln(h1 + ffn_out, params["ln2_g"][l][0], params["ln2_b"][l][0])

  expanded = semantic_features @ f32(params["dec_w"]) + params["dec_b"]
  enhanced = h + expanded[:, None, :]
  return enhanced @ f32(params["vocab_w"]) + params["vocab_b"]


# ------------------------------------ main -------------------------------------

if __name__ == "__main__":
  key = jax.random.PRNGKey(0)
  kp, ksem, kid = jax.random.split(key, 3)

  B, S = 2, 16
  params = init_params(kp)
  semantic_features = jax.random.normal(ksem, (B, SEMANTIC_DIM), jnp.float32)
  tgt_input_ids = jax.random.randint(kid, (B, S), 0, VOCAB, dtype=jnp.int32)
  # first sequence fully attended; second has last 4 positions padded
  tgt_attention_mask = jnp.concatenate(
      [jnp.ones((1, S), jnp.int32),
       jnp.concatenate([jnp.ones((1, S - 4), jnp.int32),
                        jnp.zeros((1, 4), jnp.int32)], axis=1)], axis=0)

  fwd = jax.jit(functools.partial(semantic_decoder, params))
  logits = jax.block_until_ready(fwd(semantic_features, tgt_input_ids, tgt_attention_mask))

  assert logits.shape == (B, S, VOCAB), logits.shape
  assert logits.dtype == jnp.float32
  assert bool(jnp.all(jnp.isfinite(logits)))

  ref = reference_forward(params, semantic_features, tgt_input_ids, tgt_attention_mask)
  max_err = float(jnp.max(jnp.abs(logits - ref)))
  assert max_err < 0.1, max_err

  # no-target branch: forward returns expanded_features = decoder_embedding(sem)
  expanded = jax.block_until_ready(semantic_decoder(params, semantic_features))
  assert expanded.shape == (B, HIDDEN), expanded.shape

  print("KERNEL_OK")
</pallas_src>

<mosaic_0001>
module attributes {stable_mosaic.version = 11 : i64} {
  func.func @_decoder_kernel(%arg0: memref<32x1xi32, #tpu.memory_space<vmem>>, %arg1: memref<2x16xf32, #tpu.memory_space<vmem>>, %arg2: memref<2x128xf32, #tpu.memory_space<vmem>>, %arg3: memref<128x128xf32, #tpu.memory_space<vmem>>, %arg4: memref<16x128xf32, #tpu.memory_space<vmem>>, %arg5: memref<1x128xf32, #tpu.memory_space<vmem>>, %arg6: memref<1x128xf32, #tpu.memory_space<vmem>>, %arg7: memref<1x128xf32, #tpu.memory_space<vmem>>, %arg8: memref<2x128x384xbf16, #tpu.memory_space<vmem>>, %arg9: memref<2x1x384xf32, #tpu.memory_space<vmem>>, %arg10: memref<2x128x128xbf16, #tpu.memory_space<vmem>>, %arg11: memref<2x1x128xf32, #tpu.memory_space<vmem>>, %arg12: memref<2x1x128xf32, #tpu.memory_space<vmem>>, %arg13: memref<2x1x128xf32, #tpu.memory_space<vmem>>, %arg14: memref<2x128x256xbf16, #tpu.memory_space<vmem>>, %arg15: memref<2x1x256xf32, #tpu.memory_space<vmem>>, %arg16: memref<2x256x128xbf16, #tpu.memory_space<vmem>>, %arg17: memref<2x1x128xf32, #tpu.memory_space<vmem>>, %arg18: memref<2x1x128xf32, #tpu.memory_space<vmem>>, %arg19: memref<2x1x128xf32, #tpu.memory_space<vmem>>, %arg20: memref<128x128xbf16, #tpu.memory_space<vmem>>, %arg21: memref<1x128xf32, #tpu.memory_space<vmem>>, %arg22: memref<128x128xbf16, #tpu.memory_space<vmem>>, %arg23: memref<1x128xf32, #tpu.memory_space<vmem>>, %arg24: memref<32x128xf32, #tpu.memory_space<vmem>>) attributes {dimension_semantics = [], scalar_prefetch = 0 : i64, scratch_operands = 0 : i64, tpu.core_type = #tpu.core_type<tc>} {
    %c0 = arith.constant 0 : index
    %c0_0 = arith.constant 0 : index
    %0 = vector.load %arg0[%c0, %c0_0] : memref<32x1xi32, #tpu.memory_space<vmem>>, vector<32x1xi32>
    %1 = tpu.iota {dimensions = array<i32: 1>} : vector<32x128xi32>
    %2 = vector.broadcast %0 : vector<32x1xi32> to vector<32x128xi32>
    %3 = arith.cmpi eq, %1, %2 : vector<32x128xi32>
    %cst = arith.constant 1.000000e+00 : f32
    %cst_1 = arith.constant 0.000000e+00 : f32
    %4 = vector.broadcast %cst : f32 to vector<32x128xf32>
    %5 = vector.broadcast %cst_1 : f32 to vector<32x128xf32>
    %6 = arith.select %3, %4, %5 : vector<32x128xi1>, vector<32x128xf32>
    %c0_2 = arith.constant 0 : index
    %c0_3 = arith.constant 0 : index
    %7 = vector.load %arg3[%c0_2, %c0_3] : memref<128x128xf32, #tpu.memory_space<vmem>>, vector<128x128xf32>
    %cst_4 = arith.constant dense<0.000000e+00> : vector<32x128xf32>
    %8 = tpu.matmul %6, %7, %cst_4 {dimension_numbers = #tpu.dot_dimension_numbers<[1], [0], [0], [1], [0, 0, 1, 1], [], []>} : vector<32x128xf32>, vector<128x128xf32>, vector<32x128xf32> -> vector<32x128xf32>
    %c0_5 = arith.constant 0 : index
    %c0_6 = arith.constant 0 : index
    %9 = vector.load %arg4[%c0_5, %c0_6] : memref<16x128xf32, #tpu.memory_space<vmem>>, vector<16x128xf32>
    %10 = tpu.concatenate %9, %9 in 0 : vector<16x128xf32>, vector<16x128xf32> -> vector<32x128xf32>
    %11 = arith.addf %8, %10 : vector<32x128xf32>
    %c0_7 = arith.constant 0 : index
    %c0_8 = arith.constant 0 : index
    %12 = vector.load %arg5[%c0_7, %c0_8] : memref<1x128xf32, #tpu.memory_space<vmem>>, vector<1x128xf32>
    %13 = vector.broadcast %12 : vector<1x128xf32> to vector<32x128xf32>
    %14 = arith.addf %11, %13 : vector<32x128xf32>
    %c0_9 = arith.constant 0 : index
    %c0_10 = arith.constant 0 : index
    %15 = vector.load %arg6[%c0_9, %c0_10] : memref<1x128xf32, #tpu.memory_space<vmem>>, vector<1x128xf32>
    %c0_11 = arith.constant 0 : index
    %c0_12 = arith.constant 0 : index
    %16 = vector.load %arg7[%c0_11, %c0_12] : memref<1x128xf32, #tpu.memory_space<vmem>>, vector<1x128xf32>
    %cst_13 = arith.constant dense<0.000000e+00> : vector<32xf32>
    %17 = vector.multi_reduction <add>, %14, %cst_13 [1] : vector<32x128xf32> to vector<32xf32>
    %18 = vector.shape_cast %17 : vector<32xf32> to vector<32x1xf32>
    %cst_14 = arith.constant 1.280000e+02 : f32
    %19 = vector.broadcast %cst_14 : f32 to vector<32x1xf32>
    %20 = arith.divf %18, %19 : vector<32x1xf32>
    %21 = vector.broadcast %20 : vector<32x1xf32> to vector<32x128xf32>
    %22 = arith.subf %14, %21 : vector<32x128xf32>
    %23 = arith.mulf %22, %22 : vector<32x128xf32>
    %cst_15 = arith.constant dense<0.000000e+00> : vector<32xf32>
    %24 = vector.multi_reduction <add>, %23, %cst_15 [1] : vector<32x128xf32> to vector<32xf32>
    %25 = vector.shape_cast %24 : vector<32xf32> to vector<32x1xf32>
    %cst_16 = arith.constant 1.280000e+02 : f32
    %26 = vector.broadcast %cst_16 : f32 to vector<32x1xf32>
    %27 = arith.divf %25, %26 : vector<32x1xf32>
    %cst_17 = arith.constant 9.99999996E-13 : f32
    %28 = vector.broadcast %cst_17 : f32 to vector<32x1xf32>
    %29 = arith.addf %27, %28 : vector<32x1xf32>
    %30 = math.rsqrt %29 : vector<32x1xf32>
    %31 = vector.broadcast %30 : vector<32x1xf32> to vector<32x128xf32>
    %32 = arith.mulf %22, %31 : vector<32x128xf32>
    %33 = vector.broadcast %15 : vector<1x128xf32> to vector<32x128xf32>
    %34 = arith.mulf %32, %33 : vector<32x128xf32>
    %35 = vector.broadcast %16 : vector<1x128xf32> to vector<32x128xf32>
    %36 = arith.addf %34, %35 : vector<32x128xf32>
    %c0_18 = arith.constant 0 : index
    %c0_19 = arith.constant 0 : index
    %37 = vector.load %arg1[%c0_18, %c0_19] : memref<2x16xf32, #tpu.memory_space<vmem>>, vector<2x16xf32>
    %c0_20 = arith.constant 0 : index
    %c0_21 = arith.constant 0 : index
    %c0_22 = arith.constant 0 : index
    %38 = vector.load %arg8[%c0_20, %c0_21, %c0_22] : memref<2x128x384xbf16, #tpu.memory_space<vmem>>, vector<1x128x384xbf16>
    %39 = vector.shape_cast %38 : vector<1x128x384xbf16> to vector<128x384xbf16>
    %c0_23 = arith.constant 0 : index
    %c0_24 = arith.constant 0 : index
    %c0_25 = arith.constant 0 : index
    %40 = vector.load %arg9[%c0_23, %c0_24, %c0_25] : memref<2x1x384xf32, #tpu.memory_space<vmem>>, vector<1x1x384xf32>
    %41 = vector.shape_cast %40 : vector<1x1x384xf32> to vector<1x384xf32>
    %c0_26 = arith.constant 0 : index
    %c0_27 = arith.constant 0 : index
    %c0_28 = arith.constant 0 : index
    %42 = vector.load %arg10[%c0_26, %c0_27, %c0_28] : memref<2x128x128xbf16, #tpu.memory_space<vmem>>, vector<1x128x128xbf16>
    %43 = vector.shape_cast %42 : vector<1x128x128xbf16> to vector<128x128xbf16>
    %c0_29 = arith.constant 0 : index
    %c0_30 = arith.constant 0 : index
    %c0_31 = arith.constant 0 : index
    %44 = vector.load %arg11[%c0_29, %c0_30, %c0_31] : memref<2x1x128xf32, #tpu.memory_space<vmem>>, vector<1x1x128xf32>
    %45 = vector.shape_cast %44 : vector<1x1x128xf32> to vector<1x128xf32>
    %c0_32 = arith.constant 0 : index
    %c0_33 = arith.constant 0 : index
    %c0_34 = arith.constant 0 : index
    %46 = vector.load %arg12[%c0_32, %c0_33, %c0_34] : memref<2x1x128xf32, #tpu.memory_space<vmem>>, vector<1x1x128xf32>
    %47 = vector.shape_cast %46 : vector<1x1x128xf32> to vector<1x128xf32>
    %c0_35 = arith.constant 0 : index
    %c0_36 = arith.constant 0 : index
    %c0_37 = arith.constant 0 : index
    %48 = vector.load %arg13[%c0_35, %c0_36, %c0_37] : memref<2x1x128xf32, #tpu.memory_space<vmem>>, vector<1x1x128xf32>
    %49 = vector.shape_cast %48 : vector<1x1x128xf32> to vector<1x128xf32>
    %c0_38 = arith.constant 0 : index
    %c0_39 = arith.constant 0 : index
    %c0_40 = arith.constant 0 : index
    %50 = vector.load %arg14[%c0_38, %c0_39, %c0_40] : memref<2x128x256xbf16, #tpu.memory_space<vmem>>, vector<1x128x256xbf16>
    %51 = vector.shape_cast %50 : vector<1x128x256xbf16> to vector<128x256xbf16>
    %c0_41 = arith.constant 0 : index
    %c0_42 = arith.constant 0 : index
    %c0_43 = arith.constant 0 : index
    %52 = vector.load %arg15[%c0_41, %c0_42, %c0_43] : memref<2x1x256xf32, #tpu.memory_space<vmem>>, vector<1x1x256xf32>
    %53 = vector.shape_cast %52 : vector<1x1x256xf32> to vector<1x256xf32>
    %c0_44 = arith.constant 0 : index
    %c0_45 = arith.constant 0 : index
    %c0_46 = arith.constant 0 : index
    %54 = vector.load %arg16[%c0_44, %c0_45, %c0_46] : memref<2x256x128xbf16, #tpu.memory_space<vmem>>, vector<1x256x128xbf16>
    %55 = vector.shape_cast %54 : vector<1x256x128xbf16> to vector<256x128xbf16>
    %c0_47 = arith.constant 0 : index
    %c0_48 = arith.constant 0 : index
    %c0_49 = arith.constant 0 : index
    %56 = vector.load %arg17[%c0_47, %c0_48, %c0_49] : memref<2x1x128xf32, #tpu.memory_space<vmem>>, vector<1x1x128xf32>
    %57 = vector.shape_cast %56 : vector<1x1x128xf32> to vector<1x128xf32>
    %c0_50 = arith.constant 0 : index
    %c0_51 = arith.constant 0 : index
    %c0_52 = arith.constant 0 : index
    %58 = vector.load %arg18[%c0_50, %c0_51, %c0_52] : memref<2x1x128xf32, #tpu.memory_space<vmem>>, vector<1x1x128xf32>
    %59 = vector.shape_cast %58 : vector<1x1x128xf32> to vector<1x128xf32>
    %c0_53 = arith.constant 0 : index
    %c0_54 = arith.constant 0 : index
    %c0_55 = arith.constant 0 : index
    %60 = vector.load %arg19[%c0_53, %c0_54, %c0_55] : memref<2x1x128xf32, #tpu.memory_space<vmem>>, vector<1x1x128xf32>
    %61 = vector.shape_cast %60 : vector<1x1x128xf32> to vector<1x128xf32>
    %62 = arith.truncf %36 : vector<32x128xf32> to vector<32x128xbf16>
    %cst_56 = arith.constant dense<0.000000e+00> : vector<32x384xf32>
    %63 = tpu.matmul %62, %39, %cst_56 {dimension_numbers = #tpu.dot_dimension_numbers<[1], [0], [0], [1], [0, 0, 1, 1], [], []>} : vector<32x128xbf16>, vector<128x384xbf16>, vector<32x384xf32> -> vector<32x384xf32>
    %64 = vector.broadcast %41 : vector<1x384xf32> to vector<32x384xf32>
    %65 = arith.addf %63, %64 : vector<32x384xf32>
    %66 = vector.extract_strided_slice %65 {offsets = [0, 0], sizes = [32, 128], strides = [1, 1]} : vector<32x384xf32> to vector<32x128xf32>
    %67 = vector.extract_strided_slice %65 {offsets = [0, 128], sizes = [32, 128], strides = [1, 1]} : vector<32x384xf32> to vector<32x128xf32>
    %68 = vector.extract_strided_slice %65 {offsets = [0, 256], sizes = [32, 128], strides = [1, 1]} : vector<32x384xf32> to vector<32x128xf32>
    %69 = vector.extract_strided_slice %66 {offsets = [0, 0], sizes = [16, 128], strides = [1, 1]} : vector<32x128xf32> to vector<16x128xf32>
    %70 = vector.extract_strided_slice %67 {offsets = [0, 0], sizes = [16, 128], strides = [1, 1]} : vector<32x128xf32> to vector<16x128xf32>
    %71 = vector.extract_strided_slice %68 {offsets = [0, 0], sizes = [16, 128], strides = [1, 1]} : vector<32x128xf32> to vector<16x128xf32>
    %72 = vector.extract_strided_slice %37 {offsets = [0, 0], sizes = [1, 16], strides = [1, 1]} : vector<2x16xf32> to vector<1x16xf32>
    %73 = vector.extract_strided_slice %69 {offsets = [0, 0], sizes = [16, 32], strides = [1, 1]} : vector<16x128xf32> to vector<16x32xf32>
    %74 = arith.truncf %73 : vector<16x32xf32> to vector<16x32xbf16>
    %75 = vector.extract_strided_slice %70 {offsets = [0, 0], sizes = [16, 32], strides = [1, 1]} : vector<16x128xf32> to vector<16x32xf32>
    %76 = arith.truncf %75 : vector<16x32xf32> to vector<16x32xbf16>
    %77 = vector.extract_strided_slice %71 {offsets = [0, 0], sizes = [16, 32], strides = [1, 1]} : vector<16x128xf32> to vector<16x32xf32>
    %78 = arith.truncf %77 : vector<16x32xf32> to vector<16x32xbf16>
    %cst_57 = arith.constant dense<0.000000e+00> : vector<16x16xf32>
    %79 = tpu.matmul %74, %76, %cst_57 {dimension_numbers = #tpu.dot_dimension_numbers<[1], [1], [0], [0], [0, 0, 1, 0], [], []>} : vector<16x32xbf16>, vector<16x32xbf16>, vector<16x16xf32> -> vector<16x16xf32>
    %cst_58 = arith.constant 0.176776692 : f32
    %80 = vector.broadcast %cst_58 : f32 to vector<16x16xf32>
    %81 = arith.mulf %79, %80 : vector<16x16xf32>
    %82 = vector.broadcast %72 : vector<1x16xf32> to vector<16x16xf32>
    %83 = arith.addf %81, %82 : vector<16x16xf32>
    %cst_59 = arith.constant dense<0xFF800000> : vector<16xf32>
    %84 = vector.multi_reduction <maximumf>, %83, %cst_59 [1] : vector<16x16xf32> to vector<16xf32>
    %85 = vector.shape_cast %84 : vector<16xf32> to vector<16x1xf32>
    %86 = vector.broadcast %85 : vector<16x1xf32> to vector<16x16xf32>
    %87 = arith.subf %83, %86 : vector<16x16xf32>
    %88 = math.exp %87 : vector<16x16xf32>
    %cst_60 = arith.constant dense<0.000000e+00> : vector<16xf32>
    %89 = vector.multi_reduction <add>, %88, %cst_60 [1] : vector<16x16xf32> to vector<16xf32>
    %90 = vector.shape_cast %89 : vector<16xf32> to vector<16x1xf32>
    %91 = tpu.reciprocal %90 {approx = true} : vector<16x1xf32> -> vector<16x1xf32>
    %92 = vector.broadcast %91 : vector<16x1xf32> to vector<16x16xf32>
    %93 = arith.mulf %88, %92 : vector<16x16xf32>
    %94 = arith.truncf %93 : vector<16x16xf32> to vector<16x16xbf16>
    %cst_61 = arith.constant dense<0.000000e+00> : vector<16x32xf32>
    %95 = tpu.matmul %94, %78, %cst_61 {dimension_numbers = #tpu.dot_dimension_numbers<[1], [0], [0], [1], [0, 0, 1, 1], [], []>} : vector<16x16xbf16>, vector<16x32xbf16>, vector<16x32xf32> -> vector<16x32xf32>
    %96 = vector.extract_strided_slice %69 {offsets = [0, 32], sizes = [16, 32], strides = [1, 1]} : vector<16x128xf32> to vector<16x32xf32>
    %97 = arith.truncf %96 : vector<16x32xf32> to vector<16x32xbf16>
    %98 = vector.extract_strided_slice %70 {offsets = [0, 32], sizes = [16, 32], strides = [1, 1]} : vector<16x128xf32> to vector<16x32xf32>
    %99 = arith.truncf %98 : vector<16x32xf32> to vector<16x32xbf16>
    %100 = vector.extract_strided_slice %71 {offsets = [0, 32], sizes = [16, 32], strides = [1, 1]} : vector<16x128xf32> to vector<16x32xf32>
    %101 = arith.truncf %100 : vector<16x32xf32> to vector<16x32xbf16>
    %cst_62 = arith.constant dense<0.000000e+00> : vector<16x16xf32>
    %102 = tpu.matmul %97, %99, %cst_62 {dimension_numbers = #tpu.dot_dimension_numbers<[1], [1], [0], [0], [0, 0, 1, 0], [], []>} : vector<16x32xbf16>, vector<16x32xbf16>, vector<16x16xf32> -> vector<16x16xf32>
    %cst_63 = arith.constant 0.176776692 : f32
    %103 = vector.broadcast %cst_63 : f32 to vector<16x16xf32>
    %104 = arith.mulf %102, %103 : vector<16x16xf32>
    %105 = vector.broadcast %72 : vector<1x16xf32> to vector<16x16xf32>
    %106 = arith.addf %104, %105 : vector<16x16xf32>
    %cst_64 = arith.constant dense<0xFF800000> : vector<16xf32>
    %107 = vector.multi_reduction <maximumf>, %106, %cst_64 [1] : vector<16x16xf32> to vector<16xf32>
    %108 = vector.shape_cast %107 : vector<16xf32> to vector<16x1xf32>
    %109 = vector.broadcast %108 : vector<16x1xf32> to vector<16x16xf32>
    %110 = arith.subf %106, %109 : vector<16x16xf32>
    %111 = math.exp %110 : vector<16x16xf32>
    %cst_65 = arith.constant dense<0.000000e+00> : vector<16xf32>
    %112 = vector.multi_reduction <add>, %111, %cst_65 [1] : vector<16x16xf32> to vector<16xf32>
    %113 = vector.shape_cast %112 : vector<16xf32> to vector<16x1xf32>
    %114 = tpu.reciprocal %113 {approx = true} : vector<16x1xf32> -> vector<16x1xf32>
    %115 = vector.broadcast %114 : vector<16x1xf32> to vector<16x16xf32>
    %116 = arith.mulf %111, %115 : vector<16x16xf32>
    %117 = arith.truncf %116 : vector<16x16xf32> to vector<16x16xbf16>
    %cst_66 = arith.constant dense<0.000000e+00> : vector<16x32xf32>
    %118 = tpu.matmul %117, %101, %cst_66 {dimension_numbers = #tpu.dot_dimension_numbers<[1], [0], [0], [1], [0, 0, 1, 1], [], []>} : vector<16x16xbf16>, vector<16x32xbf16>, vector<16x32xf32> -> vector<16x32xf32>
    %119 = vector.extract_strided_slice %69 {offsets = [0, 64], sizes = [16, 32], strides = [1, 1]} : vector<16x128xf32> to vector<16x32xf32>
    %120 = arith.truncf %119 : vector<16x32xf32> to vector<16x32xbf16>
    %121 = vector.extract_strided_slice %70 {offsets = [0, 64], sizes = [16, 32], strides = [1, 1]} : vector<16x128xf32> to vector<16x32xf32>
    %122 = arith.truncf %121 : vector<16x32xf32> to vector<16x32xbf16>
    %123 = vector.extract_strided_slice %71 {offsets = [0, 64], sizes = [16, 32], strides = [1, 1]} : vector<16x128xf32> to vector<16x32xf32>
    %124 = arith.truncf %123 : vector<16x32xf32> to vector<16x32xbf16>
    %cst_67 = arith.constant dense<0.000000e+00> : vector<16x16xf32>
    %125 = tpu.matmul %120, %122, %cst_67 {dimension_numbers = #tpu.dot_dimension_numbers<[1], [1], [0], [0], [0, 0, 1, 0], [], []>} : vector<16x32xbf16>, vector<16x32xbf16>, vector<16x16xf32> -> vector<16x16xf32>
    %cst_68 = arith.constant 0.176776692 : f32
    %126 = vector.broadcast %cst_68 : f32 to vector<16x16xf32>
    %127 = arith.mulf %125, %126 : vector<16x16xf32>
    %128 = vector.broadcast %72 : vector<1x16xf32> to vector<16x16xf32>
    %129 = arith.addf %127, %128 : vector<16x16xf32>
    %cst_69 = arith.constant dense<0xFF800000> : vector<16xf32>
    %130 = vector.multi_reduction <maximumf>, %129, %cst_69 [1] : vector<16x16xf32> to vector<16xf32>
    %131 = vector.shape_cast %130 : vector<16xf32> to vector<16x1xf32>
    %132 = vector.broadcast %131 : vector<16x1xf32> to vector<16x16xf32>
    %133 = arith.subf %129, %132 : vector<16x16xf32>
    %134 = math.exp %133 : vector<16x16xf32>
    %cst_70 = arith.constant dense<0.000000e+00> : vector<16xf32>
    %135 = vector.multi_reduction <add>, %134, %cst_70 [1] : vector<16x16xf32> to vector<16xf32>
    %136 = vector.shape_cast %135 : vector<16xf32> to vector<16x1xf32>
    %137 = tpu.reciprocal %136 {approx = true} : vector<16x1xf32> -> vector<16x1xf32>
    %138 = vector.broadcast %137 : vector<16x1xf32> to vector<16x16xf32>
    %139 = arith.mulf %134, %138 : vector<16x16xf32>
    %140 = arith.truncf %139 : vector<16x16xf32> to vector<16x16xbf16>
    %cst_71 = arith.constant dense<0.000000e+00> : vector<16x32xf32>
    %141 = tpu.matmul %140, %124, %cst_71 {dimension_numbers = #tpu.dot_dimension_numbers<[1], [0], [0], [1], [0, 0, 1, 1], [], []>} : vector<16x16xbf16>, vector<16x32xbf16>, vector<16x32xf32> -> vector<16x32xf32>
    %142 = vector.extract_strided_slice %69 {offsets = [0, 96], sizes = [16, 32], strides = [1, 1]} : vector<16x128xf32> to vector<16x32xf32>
    %143 = arith.truncf %142 : vector<16x32xf32> to vector<16x32xbf16>
    %144 = vector.extract_strided_slice %70 {offsets = [0, 96], sizes = [16, 32], strides = [1, 1]} : vector<16x128xf32> to vector<16x32xf32>
    %145 = arith.truncf %144 : vector<16x32xf32> to vector<16x32xbf16>
    %146 = vector.extract_strided_slice %71 {offsets = [0, 96], sizes = [16, 32], strides = [1, 1]} : vector<16x128xf32> to vector<16x32xf32>
    %147 = arith.truncf %146 : vector<16x32xf32> to vector<16x32xbf16>
    %cst_72 = arith.constant dense<0.000000e+00> : vector<16x16xf32>
    %148 = tpu.matmul %143, %145, %cst_72 {dimension_numbers = #tpu.dot_dimension_numbers<[1], [1], [0], [0], [0, 0, 1, 0], [], []>} : vector<16x32xbf16>, vector<16x32xbf16>, vector<16x16xf32> -> vector<16x16xf32>
    %cst_73 = arith.constant 0.176776692 : f32
    %149 = vector.broadcast %cst_73 : f32 to vector<16x16xf32>
    %150 = arith.mulf %148, %149 : vector<16x16xf32>
    %151 = vector.broadcast %72 : vector<1x16xf32> to vector<16x16xf32>
    %152 = arith.addf %150, %151 : vector<16x16xf32>
    %cst_74 = arith.constant dense<0xFF800000> : vector<16xf32>
    %153 = vector.multi_reduction <maximumf>, %152, %cst_74 [1] : vector<16x16xf32> to vector<16xf32>
    %154 = vector.shape_cast %153 : vector<16xf32> to vector<16x1xf32>
    %155 = vector.broadcast %154 : vector<16x1xf32> to vector<16x16xf32>
    %156 = arith.subf %152, %155 : vector<16x16xf32>
    %157 = math.exp %156 : vector<16x16xf32>
    %cst_75 = arith.constant dense<0.000000e+00> : vector<16xf32>
    %158 = vector.multi_reduction <add>, %157, %cst_75 [1] : vector<16x16xf32> to vector<16xf32>
    %159 = vector.shape_cast %158 : vector<16xf32> to vector<16x1xf32>
    %160 = tpu.reciprocal %159 {approx = true} : vector<16x1xf32> -> vector<16x1xf32>
    %161 = vector.broadcast %160 : vector<16x1xf32> to vector<16x16xf32>
    %162 = arith.mulf %157, %161 : vector<16x16xf32>
    %163 = arith.truncf %162 : vector<16x16xf32> to vector<16x16xbf16>
    %cst_76 = arith.constant dense<0.000000e+00> : vector<16x32xf32>
    %164 = tpu.matmul %163, %147, %cst_76 {dimension_numbers = #tpu.dot_dimension_numbers<[1], [0], [0], [1], [0, 0, 1, 1], [], []>} : vector<16x16xbf16>, vector<16x32xbf16>, vector<16x32xf32> -> vector<16x32xf32>
    %165 = tpu.concatenate %95, %118, %141, %164 in 1 : vector<16x32xf32>, vector<16x32xf32>, vector<16x32xf32>, vector<16x32xf32> -> vector<16x128xf32>
    %166 = vector.extract_strided_slice %66 {offsets = [16, 0], sizes = [16, 128], strides = [1, 1]} : vector<32x128xf32> to vector<16x128xf32>
    %167 = vector.extract_strided_slice %67 {offsets = [16, 0], sizes = [16, 128], strides = [1, 1]} : vector<32x128xf32> to vector<16x128xf32>
    %168 = vector.extract_strided_slice %68 {offsets = [16, 0], sizes = [16, 128], strides = [1, 1]} : vector<32x128xf32> to vector<16x128xf32>
    %169 = vector.extract_strided_slice %37 {offsets = [1, 0], sizes = [1, 16], strides = [1, 1]} : vector<2x16xf32> to vector<1x16xf32>
    %170 = vector.extract_strided_slice %166 {offsets = [0, 0], sizes = [16, 32], strides = [1, 1]} : vector<16x128xf32> to vector<16x32xf32>
    %171 = arith.truncf %170 : vector<16x32xf32> to vector<16x32xbf16>
    %172 = vector.extract_strided_slice %167 {offsets = [0, 0], sizes = [16, 32], strides = [1, 1]} : vector<16x128xf32> to vector<16x32xf32>
    %173 = arith.truncf %172 : vector<16x32xf32> to vector<16x32xbf16>
    %174 = vector.extract_strided_slice %168 {offsets = [0, 0], sizes = [16, 32], strides = [1, 1]} : vector<16x128xf32> to vector<16x32xf32>
    %175 = arith.truncf %174 : vector<16x32xf32> to vector<16x32xbf16>
    %cst_77 = arith.constant dense<0.000000e+00> : vector<16x16xf32>
    %176 = tpu.matmul %171, %173, %cst_77 {dimension_numbers = #tpu.dot_dimension_numbers<[1], [1], [0], [0], [0, 0, 1, 0], [], []>} : vector<16x32xbf16>, vector<16x32xbf16>, vector<16x16xf32> -> vector<16x16xf32>
    %cst_78 = arith.constant 0.176776692 : f32
    %177 = vector.broadcast %cst_78 : f32 to vector<16x16xf32>
    %178 = arith.mulf %176, %177 : vector<16x16xf32>
    %179 = vector.broadcast %169 : vector<1x16xf32> to vector<16x16xf32>
    %180 = arith.addf %178, %179 : vector<16x16xf32>
    %cst_79 = arith.constant dense<0xFF800000> : vector<16xf32>
    %181 = vector.multi_reduction <maximumf>, %180, %cst_79 [1] : vector<16x16xf32> to vector<16xf32>
    %182 = vector.shape_cast %181 : vector<16xf32> to vector<16x1xf32>
    %183 = vector.broadcast %182 : vector<16x1xf32> to vector<16x16xf32>
    %184 = arith.subf %180, %183 : vector<16x16xf32>
    %185 = math.exp %184 : vector<16x16xf32>
    %cst_80 = arith.constant dense<0.000000e+00> : vector<16xf32>
    %186 = vector.multi_reduction <add>, %185, %cst_80 [1] : vector<16x16xf32> to vector<16xf32>
    %187 = vector.shape_cast %186 : vector<16xf32> to vector<16x1xf32>
    %188 = tpu.reciprocal %187 {approx = true} : vector<16x1xf32> -> vector<16x1xf32>
    %189 = vector.broadcast %188 : vector<16x1xf32> to vector<16x16xf32>
    %190 = arith.mulf %185, %189 : vector<16x16xf32>
    %191 = arith.truncf %190 : vector<16x16xf32> to vector<16x16xbf16>
    %cst_81 = arith.constant dense<0.000000e+00> : vector<16x32xf32>
    %192 = tpu.matmul %191, %175, %cst_81 {dimension_numbers = #tpu.dot_dimension_numbers<[1], [0], [0], [1], [0, 0, 1, 1], [], []>} : vector<16x16xbf16>, vector<16x32xbf16>, vector<16x32xf32> -> vector<16x32xf32>
    %193 = vector.extract_strided_slice %166 {offsets = [0, 32], sizes = [16, 32], strides = [1, 1]} : vector<16x128xf32> to vector<16x32xf32>
    %194 = arith.truncf %193 : vector<16x32xf32> to vector<16x32xbf16>
    %195 = vector.extract_strided_slice %167 {offsets = [0, 32], sizes = [16, 32], strides = [1, 1]} : vector<16x128xf32> to vector<16x32xf32>
    %196 = arith.truncf %195 : vector<16x32xf32> to vector<16x32xbf16>
    %197 = vector.extract_strided_slice %168 {offsets = [0, 32], sizes = [16, 32], strides = [1, 1]} : vector<16x128xf32> to vector<16x32xf32>
    %198 = arith.truncf %197 : vector<16x32xf32> to vector<16x32xbf16>
    %cst_82 = arith.constant dense<0.000000e+00> : vector<16x16xf32>
    %199 = tpu.matmul %194, %196, %cst_82 {dimension_numbers = #tpu.dot_dimension_numbers<[1], [1], [0], [0], [0, 0, 1, 0], [], []>} : vector<16x32xbf16>, vector<16x32xbf16>, vector<16x16xf32> -> vector<16x16xf32>
    %cst_83 = arith.constant 0.176776692 : f32
    %200 = vector.broadcast %cst_83 : f32 to vector<16x16xf32>
    %201 = arith.mulf %199, %200 : vector<16x16xf32>
    %202 = vector.broadcast %169 : vector<1x16xf32> to vector<16x16xf32>
    %203 = arith.addf %201, %202 : vector<16x16xf32>
    %cst_84 = arith.constant dense<0xFF800000> : vector<16xf32>
    %204 = vector.multi_reduction <maximumf>, %203, %cst_84 [1] : vector<16x16xf32> to vector<16xf32>
    %205 = vector.shape_cast %204 : vector<16xf32> to vector<16x1xf32>
    %206 = vector.broadcast %205 : vector<16x1xf32> to vector<16x16xf32>
    %207 = arith.subf %203, %206 : vector<16x16xf32>
    %208 = math.exp %207 : vector<16x16xf32>
    %cst_85 = arith.constant dense<0.000000e+00> : vector<16xf32>
    %209 = vector.multi_reduction <add>, %208, %cst_85 [1] : vector<16x16xf32> to vector<16xf32>
    %210 = vector.shape_cast %209 : vector<16xf32> to vector<16x1xf32>
    %211 = tpu.reciprocal %210 {approx = true} : vector<16x1xf32> -> vector<16x1xf32>
    %212 = vector.broadcast %211 : vector<16x1xf32> to vector<16x16xf32>
    %213 = arith.mulf %208, %212 : vector<16x16xf32>
    %214 = arith.truncf %213 : vector<16x16xf32> to vector<16x16xbf16>
    %cst_86 = arith.constant dense<0.000000e+00> : vector<16x32xf32>
    %215 = tpu.matmul %214, %198, %cst_86 {dimension_numbers = #tpu.dot_dimension_numbers<[1], [0], [0], [1], [0, 0, 1, 1], [], []>} : vector<16x16xbf16>, vector<16x32xbf16>, vector<16x32xf32> -> vector<16x32xf32>
    %216 = vector.extract_strided_slice %166 {offsets = [0, 64], sizes = [16, 32], strides = [1, 1]} : vector<16x128xf32> to vector<16x32xf32>
    %217 = arith.truncf %216 : vector<16x32xf32> to vector<16x32xbf16>
    %218 = vector.extract_strided_slice %167 {offsets = [0, 64], sizes = [16, 32], strides = [1, 1]} : vector<16x128xf32> to vector<16x32xf32>
    %219 = arith.truncf %218 : vector<16x32xf32> to vector<16x32xbf16>
    %220 = vector.extract_strided_slice %168 {offsets = [0, 64], sizes = [16, 32], strides = [1, 1]} : vector<16x128xf32> to vector<16x32xf32>
    %221 = arith.truncf %220 : vector<16x32xf32> to vector<16x32xbf16>
    %cst_87 = arith.constant dense<0.000000e+00> : vector<16x16xf32>
    %222 = tpu.matmul %217, %219, %cst_87 {dimension_numbers = #tpu.dot_dimension_numbers<[1], [1], [0], [0], [0, 0, 1, 0], [], []>} : vector<16x32xbf16>, vector<16x32xbf16>, vector<16x16xf32> -> vector<16x16xf32>
    %cst_88 = arith.constant 0.176776692 : f32
    %223 = vector.broadcast %cst_88 : f32 to vector<16x16xf32>
    %224 = arith.mulf %222, %223 : vector<16x16xf32>
    %225 = vector.broadcast %169 : vector<1x16xf32> to vector<16x16xf32>
    %226 = arith.addf %224, %225 : vector<16x16xf32>
    %cst_89 = arith.constant dense<0xFF800000> : vector<16xf32>
    %227 = vector.multi_reduction <maximumf>, %226, %cst_89 [1] : vector<16x16xf32> to vector<16xf32>
    %228 = vector.shape_cast %227 : vector<16xf32> to vector<16x1xf32>
    %229 = vector.broadcast %228 : vector<16x1xf32> to vector<16x16xf32>
    %230 = arith.subf %226, %229 : vector<16x16xf32>
    %231 = math.exp %230 : vector<16x16xf32>
    %cst_90 = arith.constant dense<0.000000e+00> : vector<16xf32>
    %232 = vector.multi_reduction <add>, %231, %cst_90 [1] : vector<16x16xf32> to vector<16xf32>
    %233 = vector.shape_cast %232 : vector<16xf32> to vector<16x1xf32>
    %234 = tpu.reciprocal %233 {approx = true} : vector<16x1xf32> -> vector<16x1xf32>
    %235 = vector.broadcast %234 : vector<16x1xf32> to vector<16x16xf32>
    %236 = arith.mulf %231, %235 : vector<16x16xf32>
    %237 = arith.truncf %236 : vector<16x16xf32> to vector<16x16xbf16>
    %cst_91 = arith.constant dense<0.000000e+00> : vector<16x32xf32>
    %238 = tpu.matmul %237, %221, %cst_91 {dimension_numbers = #tpu.dot_dimension_numbers<[1], [0], [0], [1], [0, 0, 1, 1], [], []>} : vector<16x16xbf16>, vector<16x32xbf16>, vector<16x32xf32> -> vector<16x32xf32>
    %239 = vector.extract_strided_slice %166 {offsets = [0, 96], sizes = [16, 32], strides = [1, 1]} : vector<16x128xf32> to vector<16x32xf32>
    %240 = arith.truncf %239 : vector<16x32xf32> to vector<16x32xbf16>
    %241 = vector.extract_strided_slice %167 {offsets = [0, 96], sizes = [16, 32], strides = [1, 1]} : vector<16x128xf32> to vector<16x32xf32>
    %242 = arith.truncf %241 : vector<16x32xf32> to vector<16x32xbf16>
    %243 = vector.extract_strided_slice %168 {offsets = [0, 96], sizes = [16, 32], strides = [1, 1]} : vector<16x128xf32> to vector<16x32xf32>
    %244 = arith.truncf %243 : vector<16x32xf32> to vector<16x32xbf16>
    %cst_92 = arith.constant dense<0.000000e+00> : vector<16x16xf32>
    %245 = tpu.matmul %240, %242, %cst_92 {dimension_numbers = #tpu.dot_dimension_numbers<[1], [1], [0], [0], [0, 0, 1, 0], [], []>} : vector<16x32xbf16>, vector<16x32xbf16>, vector<16x16xf32> -> vector<16x16xf32>
    %cst_93 = arith.constant 0.176776692 : f32
    %246 = vector.broadcast %cst_93 : f32 to vector<16x16xf32>
    %247 = arith.mulf %245, %246 : vector<16x16xf32>
    %248 = vector.broadcast %169 : vector<1x16xf32> to vector<16x16xf32>
    %249 = arith.addf %247, %248 : vector<16x16xf32>
    %cst_94 = arith.constant dense<0xFF800000> : vector<16xf32>
    %250 = vector.multi_reduction <maximumf>, %249, %cst_94 [1] : vector<16x16xf32> to vector<16xf32>
    %251 = vector.shape_cast %250 : vector<16xf32> to vector<16x1xf32>
    %252 = vector.broadcast %251 : vector<16x1xf32> to vector<16x16xf32>
    %253 = arith.subf %249, %252 : vector<16x16xf32>
    %254 = math.exp %253 : vector<16x16xf32>
    %cst_95 = arith.constant dense<0.000000e+00> : vector<16xf32>
    %255 = vector.multi_reduction <add>, %254, %cst_95 [1] : vector<16x16xf32> to vector<16xf32>
    %256 = vector.shape_cast %255 : vector<16xf32> to vector<16x1xf32>
    %257 = tpu.reciprocal %256 {approx = true} : vector<16x1xf32> -> vector<16x1xf32>
    %258 = vector.broadcast %257 : vector<16x1xf32> to vector<16x16xf32>
    %259 = arith.mulf %254, %258 : vector<16x16xf32>
    %260 = arith.truncf %259 : vector<16x16xf32> to vector<16x16xbf16>
    %cst_96 = arith.constant dense<0.000000e+00> : vector<16x32xf32>
    %261 = tpu.matmul %260, %244, %cst_96 {dimension_numbers = #tpu.dot_dimension_numbers<[1], [0], [0], [1], [0, 0, 1, 1], [], []>} : vector<16x16xbf16>, vector<16x32xbf16>, vector<16x32xf32> -> vector<16x32xf32>
    %262 = tpu.concatenate %192, %215, %238, %261 in 1 : vector<16x32xf32>, vector<16x32xf32>, vector<16x32xf32>, vector<16x32xf32> -> vector<16x128xf32>
    %263 = tpu.concatenate %165, %262 in 0 : vector<16x128xf32>, vector<16x128xf32> -> vector<32x128xf32>
    %264 = arith.truncf %263 : vector<32x128xf32> to vector<32x128xbf16>
    %cst_97 = arith.constant dense<0.000000e+00> : vector<32x128xf32>
    %265 = tpu.matmul %264, %43, %cst_97 {dimension_numbers = #tpu.dot_dimension_numbers<[1], [0], [0], [1], [0, 0, 1, 1], [], []>} : vector<32x128xbf16>, vector<128x128xbf16>, vector<32x128xf32> -> vector<32x128xf32>
    %266 = vector.broadcast %45 : vector<1x128xf32> to vector<32x128xf32>
    %267 = arith.addf %265, %266 : vector<32x128xf32>
    %268 = arith.addf %36, %267 : vector<32x128xf32>
    %cst_98 = arith.constant dense<0.000000e+00> : vector<32xf32>
    %269 = vector.multi_reduction <add>, %268, %cst_98 [1] : vector<32x128xf32> to vector<32xf32>
    %270 = vector.shape_cast %269 : vector<32xf32> to vector<32x1xf32>
    %cst_99 = arith.constant 1.280000e+02 : f32
    %271 = vector.broadcast %cst_99 : f32 to vector<32x1xf32>
    %272 = arith.divf %270, %271 : vector<32x1xf32>
    %273 = vector.broadcast %272 : vector<32x1xf32> to vector<32x128xf32>
    %274 = arith.subf %268, %273 : vector<32x128xf32>
    %275 = arith.mulf %274, %274 : vector<32x128xf32>
    %cst_100 = arith.constant dense<0.000000e+00> : vector<32xf32>
    %276 = vector.multi_reduction <add>, %275, %cst_100 [1] : vector<32x128xf32> to vector<32xf32>
    %277 = vector.shape_cast %276 : vector<32xf32> to vector<32x1xf32>
    %cst_101 = arith.constant 1.280000e+02 : f32
    %278 = vector.broadcast %cst_101 : f32 to vector<32x1xf32>
    %279 = arith.divf %277, %278 : vector<32x1xf32>
    %cst_102 = arith.constant 9.99999996E-13 : f32
    %280 = vector.broadcast %cst_102 : f32 to vector<32x1xf32>
    %281 = arith.addf %279, %280 : vector<32x1xf32>
    %282 = math.rsqrt %281 : vector<32x1xf32>
    %283 = vector.broadcast %282 : vector<32x1xf32> to vector<32x128xf32>
    %284 = arith.mulf %274, %283 : vector<32x128xf32>
    %285 = vector.broadcast %47 : vector<1x128xf32> to vector<32x128xf32>
    %286 = arith.mulf %284, %285 : vector<32x128xf32>
    %287 = vector.broadcast %49 : vector<1x128xf32> to vector<32x128xf32>
    %288 = arith.addf %286, %287 : vector<32x128xf32>
    %289 = arith.truncf %288 : vector<32x128xf32> to vector<32x128xbf16>
    %cst_103 = arith.constant dense<0.000000e+00> : vector<32x256xf32>
    %290 = tpu.matmul %289, %51, %cst_103 {dimension_numbers = #tpu.dot_dimension_numbers<[1], [0], [0], [1], [0, 0, 1, 1], [], []>} : vector<32x128xbf16>, vector<128x256xbf16>, vector<32x256xf32> -> vector<32x256xf32>
    %291 = vector.broadcast %53 : vector<1x256xf32> to vector<32x256xf32>
    %292 = arith.addf %290, %291 : vector<32x256xf32>
    %cst_104 = arith.constant 5.000000e-01 : f32
    %293 = vector.broadcast %cst_104 : f32 to vector<32x256xf32>
    %294 = arith.mulf %293, %292 : vector<32x256xf32>
    %cst_105 = arith.constant 4.471500e-02 : f32
    %295 = vector.broadcast %cst_105 : f32 to vector<32x256xf32>
    %296 = arith.mulf %295, %292 : vector<32x256xf32>
    %297 = arith.mulf %296, %292 : vector<32x256xf32>
    %298 = arith.mulf %297, %292 : vector<32x256xf32>
    %299 = arith.addf %292, %298 : vector<32x256xf32>
    %cst_106 = arith.constant 0.797884583 : f32
    %300 = vector.broadcast %cst_106 : f32 to vector<32x256xf32>
    %301 = arith.mulf %300, %299 : vector<32x256xf32>
    %302 = math.tanh %301 : vector<32x256xf32>
    %cst_107 = arith.constant 1.000000e+00 : f32
    %303 = vector.broadcast %cst_107 : f32 to vector<32x256xf32>
    %304 = arith.addf %303, %302 : vector<32x256xf32>
    %305 = arith.mulf %294, %304 : vector<32x256xf32>
    %306 = arith.truncf %305 : vector<32x256xf32> to vector<32x256xbf16>
    %cst_108 = arith.constant dense<0.000000e+00> : vector<32x128xf32>
    %307 = tpu.matmul %306, %55, %cst_108 {dimension_numbers = #tpu.dot_dimension_numbers<[1], [0], [0], [1], [0, 0, 1, 1], [], []>} : vector<32x256xbf16>, vector<256x128xbf16>, vector<32x128xf32> -> vector<32x128xf32>
    %308 = vector.broadcast %57 : vector<1x128xf32> to vector<32x128xf32>
    %309 = arith.addf %307, %308 : vector<32x128xf32>
    %310 = arith.addf %288, %309 : vector<32x128xf32>
    %cst_109 = arith.constant dense<0.000000e+00> : vector<32xf32>
    %311 = vector.multi_reduction <add>, %310, %cst_109 [1] : vector<32x128xf32> to vector<32xf32>
    %312 = vector.shape_cast %311 : vector<32xf32> to vector<32x1xf32>
    %cst_110 = arith.constant 1.280000e+02 : f32
    %313 = vector.broadcast %cst_110 : f32 to vector<32x1xf32>
    %314 = arith.divf %312, %313 : vector<32x1xf32>
    %315 = vector.broadcast %314 : vector<32x1xf32> to vector<32x128xf32>
    %316 = arith.subf %310, %315 : vector<32x128xf32>
    %317 = arith.mulf %316, %316 : vector<32x128xf32>
    %cst_111 = arith.constant dense<0.000000e+00> : vector<32xf32>
    %318 = vector.multi_reduction <add>, %317, %cst_111 [1] : vector<32x128xf32> to vector<32xf32>
    %319 = vector.shape_cast %318 : vector<32xf32> to vector<32x1xf32>
    %cst_112 = arith.constant 1.280000e+02 : f32
    %320 = vector.broadcast %cst_112 : f32 to vector<32x1xf32>
    %321 = arith.divf %319, %320 : vector<32x1xf32>
    %cst_113 = arith.constant 9.99999996E-13 : f32
    %322 = vector.broadcast %cst_113 : f32 to vector<32x1xf32>
    %323 = arith.addf %321, %322 : vector<32x1xf32>
    %324 = math.rsqrt %323 : vector<32x1xf32>
    %325 = vector.broadcast %324 : vector<32x1xf32> to vector<32x128xf32>
    %326 = arith.mulf %316, %325 : vector<32x128xf32>
    %327 = vector.broadcast %59 : vector<1x128xf32> to vector<32x128xf32>
    %328 = arith.mulf %326, %327 : vector<32x128xf32>
    %329 = vector.broadcast %61 : vector<1x128xf32> to vector<32x128xf32>
    %330 = arith.addf %328, %329 : vector<32x128xf32>
    %c1 = arith.constant 1 : index
    %c0_114 = arith.constant 0 : index
    %c0_115 = arith.constant 0 : index
    %331 = vector.load %arg8[%c1, %c0_114, %c0_115] : memref<2x128x384xbf16, #tpu.memory_space<vmem>>, vector<1x128x384xbf16>
    %332 = vector.shape_cast %331 : vector<1x128x384xbf16> to vector<128x384xbf16>
    %c1_116 = arith.constant 1 : index
    %c0_117 = arith.constant 0 : index
    %c0_118 = arith.constant 0 : index
    %333 = vector.load %arg9[%c1_116, %c0_117, %c0_118] : memref<2x1x384xf32, #tpu.memory_space<vmem>>, vector<1x1x384xf32>
    %334 = vector.shape_cast %333 : vector<1x1x384xf32> to vector<1x384xf32>
    %c1_119 = arith.constant 1 : index
    %c0_120 = arith.constant 0 : index
    %c0_121 = arith.constant 0 : index
    %335 = vector.load %arg10[%c1_119, %c0_120, %c0_121] : memref<2x128x128xbf16, #tpu.memory_space<vmem>>, vector<1x128x128xbf16>
    %336 = vector.shape_cast %335 : vector<1x128x128xbf16> to vector<128x128xbf16>
    %c1_122 = arith.constant 1 : index
    %c0_123 = arith.constant 0 : index
    %c0_124 = arith.constant 0 : index
    %337 = vector.load %arg11[%c1_122, %c0_123, %c0_124] : memref<2x1x128xf32, #tpu.memory_space<vmem>>, vector<1x1x128xf32>
    %338 = vector.shape_cast %337 : vector<1x1x128xf32> to vector<1x128xf32>
    %c1_125 = arith.constant 1 : index
    %c0_126 = arith.constant 0 : index
    %c0_127 = arith.constant 0 : index
    %339 = vector.load %arg12[%c1_125, %c0_126, %c0_127] : memref<2x1x128xf32, #tpu.memory_space<vmem>>, vector<1x1x128xf32>
    %340 = vector.shape_cast %339 : vector<1x1x128xf32> to vector<1x128xf32>
    %c1_128 = arith.constant 1 : index
    %c0_129 = arith.constant 0 : index
    %c0_130 = arith.constant 0 : index
    %341 = vector.load %arg13[%c1_128, %c0_129, %c0_130] : memref<2x1x128xf32, #tpu.memory_space<vmem>>, vector<1x1x128xf32>
    %342 = vector.shape_cast %341 : vector<1x1x128xf32> to vector<1x128xf32>
    %c1_131 = arith.constant 1 : index
    %c0_132 = arith.constant 0 : index
    %c0_133 = arith.constant 0 : index
    %343 = vector.load %arg14[%c1_131, %c0_132, %c0_133] : memref<2x128x256xbf16, #tpu.memory_space<vmem>>, vector<1x128x256xbf16>
    %344 = vector.shape_cast %343 : vector<1x128x256xbf16> to vector<128x256xbf16>
    %c1_134 = arith.constant 1 : index
    %c0_135 = arith.constant 0 : index
    %c0_136 = arith.constant 0 : index
    %345 = vector.load %arg15[%c1_134, %c0_135, %c0_136] : memref<2x1x256xf32, #tpu.memory_space<vmem>>, vector<1x1x256xf32>
    %346 = vector.shape_cast %345 : vector<1x1x256xf32> to vector<1x256xf32>
    %c1_137 = arith.constant 1 : index
    %c0_138 = arith.constant 0 : index
    %c0_139 = arith.constant 0 : index
    %347 = vector.load %arg16[%c1_137, %c0_138, %c0_139] : memref<2x256x128xbf16, #tpu.memory_space<vmem>>, vector<1x256x128xbf16>
    %348 = vector.shape_cast %347 : vector<1x256x128xbf16> to vector<256x128xbf16>
    %c1_140 = arith.constant 1 : index
    %c0_141 = arith.constant 0 : index
    %c0_142 = arith.constant 0 : index
    %349 = vector.load %arg17[%c1_140, %c0_141, %c0_142] : memref<2x1x128xf32, #tpu.memory_space<vmem>>, vector<1x1x128xf32>
    %350 = vector.shape_cast %349 : vector<1x1x128xf32> to vector<1x128xf32>
    %c1_143 = arith.constant 1 : index
    %c0_144 = arith.constant 0 : index
    %c0_145 = arith.constant 0 : index
    %351 = vector.load %arg18[%c1_143, %c0_144, %c0_145] : memref<2x1x128xf32, #tpu.memory_space<vmem>>, vector<1x1x128xf32>
    %352 = vector.shape_cast %351 : vector<1x1x128xf32> to vector<1x128xf32>
    %c1_146 = arith.constant 1 : index
    %c0_147 = arith.constant 0 : index
    %c0_148 = arith.constant 0 : index
    %353 = vector.load %arg19[%c1_146, %c0_147, %c0_148] : memref<2x1x128xf32, #tpu.memory_space<vmem>>, vector<1x1x128xf32>
    %354 = vector.shape_cast %353 : vector<1x1x128xf32> to vector<1x128xf32>
    %355 = arith.truncf %330 : vector<32x128xf32> to vector<32x128xbf16>
    %cst_149 = arith.constant dense<0.000000e+00> : vector<32x384xf32>
    %356 = tpu.matmul %355, %332, %cst_149 {dimension_numbers = #tpu.dot_dimension_numbers<[1], [0], [0], [1], [0, 0, 1, 1], [], []>} : vector<32x128xbf16>, vector<128x384xbf16>, vector<32x384xf32> -> vector<32x384xf32>
    %357 = vector.broadcast %334 : vector<1x384xf32> to vector<32x384xf32>
    %358 = arith.addf %356, %357 : vector<32x384xf32>
    %359 = vector.extract_strided_slice %358 {offsets = [0, 0], sizes = [32, 128], strides = [1, 1]} : vector<32x384xf32> to vector<32x128xf32>
    %360 = vector.extract_strided_slice %358 {offsets = [0, 128], sizes = [32, 128], strides = [1, 1]} : vector<32x384xf32> to vector<32x128xf32>
    %361 = vector.extract_strided_slice %358 {offsets = [0, 256], sizes = [32, 128], strides = [1, 1]} : vector<32x384xf32> to vector<32x128xf32>
    %362 = vector.extract_strided_slice %359 {offsets = [0, 0], sizes = [16, 128], strides = [1, 1]} : vector<32x128xf32> to vector<16x128xf32>
    %363 = vector.extract_strided_slice %360 {offsets = [0, 0], sizes = [16, 128], strides = [1, 1]} : vector<32x128xf32> to vector<16x128xf32>
    %364 = vector.extract_strided_slice %361 {offsets = [0, 0], sizes = [16, 128], strides = [1, 1]} : vector<32x128xf32> to vector<16x128xf32>
    %365 = vector.extract_strided_slice %37 {offsets = [0, 0], sizes = [1, 16], strides = [1, 1]} : vector<2x16xf32> to vector<1x16xf32>
    %366 = vector.extract_strided_slice %362 {offsets = [0, 0], sizes = [16, 32], strides = [1, 1]} : vector<16x128xf32> to vector<16x32xf32>
    %367 = arith.truncf %366 : vector<16x32xf32> to vector<16x32xbf16>
    %368 = vector.extract_strided_slice %363 {offsets = [0, 0], sizes = [16, 32], strides = [1, 1]} : vector<16x128xf32> to vector<16x32xf32>
    %369 = arith.truncf %368 : vector<16x32xf32> to vector<16x32xbf16>
    %370 = vector.extract_strided_slice %364 {offsets = [0, 0], sizes = [16, 32], strides = [1, 1]} : vector<16x128xf32> to vector<16x32xf32>
    %371 = arith.truncf %370 : vector<16x32xf32> to vector<16x32xbf16>
    %cst_150 = arith.constant dense<0.000000e+00> : vector<16x16xf32>
    %372 = tpu.matmul %367, %369, %cst_150 {dimension_numbers = #tpu.dot_dimension_numbers<[1], [1], [0], [0], [0, 0, 1, 0], [], []>} : vector<16x32xbf16>, vector<16x32xbf16>, vector<16x16xf32> -> vector<16x16xf32>
    %cst_151 = arith.constant 0.176776692 : f32
    %373 = vector.broadcast %cst_151 : f32 to vector<16x16xf32>
    %374 = arith.mulf %372, %373 : vector<16x16xf32>
    %375 = vector.broadcast %365 : vector<1x16xf32> to vector<16x16xf32>
    %376 = arith.addf %374, %375 : vector<16x16xf32>
    %cst_152 = arith.constant dense<0xFF800000> : vector<16xf32>
    %377 = vector.multi_reduction <maximumf>, %376, %cst_152 [1] : vector<16x16xf32> to vector<16xf32>
    %378 = vector.shape_cast %377 : vector<16xf32> to vector<16x1xf32>
    %379 = vector.broadcast %378 : vector<16x1xf32> to vector<16x16xf32>
    %380 = arith.subf %376, %379 : vector<16x16xf32>
    %381 = math.exp %380 : vector<16x16xf32>
    %cst_153 = arith.constant dense<0.000000e+00> : vector<16xf32>
    %382 = vector.multi_reduction <add>, %381, %cst_153 [1] : vector<16x16xf32> to vector<16xf32>
    %383 = vector.shape_cast %382 : vector<16xf32> to vector<16x1xf32>
    %384 = tpu.reciprocal %383 {approx = true} : vector<16x1xf32> -> vector<16x1xf32>
    %385 = vector.broadcast %384 : vector<16x1xf32> to vector<16x16xf32>
    %386 = arith.mulf %381, %385 : vector<16x16xf32>
    %387 = arith.truncf %386 : vector<16x16xf32> to vector<16x16xbf16>
    %cst_154 = arith.constant dense<0.000000e+00> : vector<16x32xf32>
    %388 = tpu.matmul %387, %371, %cst_154 {dimension_numbers = #tpu.dot_dimension_numbers<[1], [0], [0], [1], [0, 0, 1, 1], [], []>} : vector<16x16xbf16>, vector<16x32xbf16>, vector<16x32xf32> -> vector<16x32xf32>
    %389 = vector.extract_strided_slice %362 {offsets = [0, 32], sizes = [16, 32], strides = [1, 1]} : vector<16x128xf32> to vector<16x32xf32>
    %390 = arith.truncf %389 : vector<16x32xf32> to vector<16x32xbf16>
    %391 = vector.extract_strided_slice %363 {offsets = [0, 32], sizes = [16, 32], strides = [1, 1]} : vector<16x128xf32> to vector<16x32xf32>
    %392 = arith.truncf %391 : vector<16x32xf32> to vector<16x32xbf16>
    %393 = vector.extract_strided_slice %364 {offsets = [0, 32], sizes = [16, 32], strides = [1, 1]} : vector<16x128xf32> to vector<16x32xf32>
    %394 = arith.truncf %393 : vector<16x32xf32> to vector<16x32xbf16>
    %cst_155 = arith.constant dense<0.000000e+00> : vector<16x16xf32>
    %395 = tpu.matmul %390, %392, %cst_155 {dimension_numbers = #tpu.dot_dimension_numbers<[1], [1], [0], [0], [0, 0, 1, 0], [], []>} : vector<16x32xbf16>, vector<16x32xbf16>, vector<16x16xf32> -> vector<16x16xf32>
    %cst_156 = arith.constant 0.176776692 : f32
    %396 = vector.broadcast %cst_156 : f32 to vector<16x16xf32>
    %397 = arith.mulf %395, %396 : vector<16x16xf32>
    %398 = vector.broadcast %365 : vector<1x16xf32> to vector<16x16xf32>
    %399 = arith.addf %397, %398 : vector<16x16xf32>
    %cst_157 = arith.constant dense<0xFF800000> : vector<16xf32>
    %400 = vector.multi_reduction <maximumf>, %399, %cst_157 [1] : vector<16x16xf32> to vector<16xf32>
    %401 = vector.shape_cast %400 : vector<16xf32> to vector<16x1xf32>
    %402 = vector.broadcast %401 : vector<16x1xf32> to vector<16x16xf32>
    %403 = arith.subf %399, %402 : vector<16x16xf32>
    %404 = math.exp %403 : vector<16x16xf32>
    %cst_158 = arith.constant dense<0.000000e+00> : vector<16xf32>
    %405 = vector.multi_reduction <add>, %404, %cst_158 [1] : vector<16x16xf32> to vector<16xf32>
    %406 = vector.shape_cast %405 : vector<16xf32> to vector<16x1xf32>
    %407 = tpu.reciprocal %406 {approx = true} : vector<16x1xf32> -> vector<16x1xf32>
    %408 = vector.broadcast %407 : vector<16x1xf32> to vector<16x16xf32>
    %409 = arith.mulf %404, %408 : vector<16x16xf32>
    %410 = arith.truncf %409 : vector<16x16xf32> to vector<16x16xbf16>
    %cst_159 = arith.constant dense<0.000000e+00> : vector<16x32xf32>
    %411 = tpu.matmul %410, %394, %cst_159 {dimension_numbers = #tpu.dot_dimension_numbers<[1], [0], [0], [1], [0, 0, 1, 1], [], []>} : vector<16x16xbf16>, vector<16x32xbf16>, vector<16x32xf32> -> vector<16x32xf32>
    %412 = vector.extract_strided_slice %362 {offsets = [0, 64], sizes = [16, 32], strides = [1, 1]} : vector<16x128xf32> to vector<16x32xf32>
    %413 = arith.truncf %412 : vector<16x32xf32> to vector<16x32xbf16>
    %414 = vector.extract_strided_slice %363 {offsets = [0, 64], sizes = [16, 32], strides = [1, 1]} : vector<16x128xf32> to vector<16x32xf32>
    %415 = arith.truncf %414 : vector<16x32xf32> to vector<16x32xbf16>
    %416 = vector.extract_strided_slice %364 {offsets = [0, 64], sizes = [16, 32], strides = [1, 1]} : vector<16x128xf32> to vector<16x32xf32>
    %417 = arith.truncf %416 : vector<16x32xf32> to vector<16x32xbf16>
    %cst_160 = arith.constant dense<0.000000e+00> : vector<16x16xf32>
    %418 = tpu.matmul %413, %415, %cst_160 {dimension_numbers = #tpu.dot_dimension_numbers<[1], [1], [0], [0], [0, 0, 1, 0], [], []>} : vector<16x32xbf16>, vector<16x32xbf16>, vector<16x16xf32> -> vector<16x16xf32>
    %cst_161 = arith.constant 0.176776692 : f32
    %419 = vector.broadcast %cst_161 : f32 to vector<16x16xf32>
    %420 = arith.mulf %418, %419 : vector<16x16xf32>
    %421 = vector.broadcast %365 : vector<1x16xf32> to vector<16x16xf32>
    %422 = arith.addf %420, %421 : vector<16x16xf32>
    %cst_162 = arith.constant dense<0xFF800000> : vector<16xf32>
    %423 = vector.multi_reduction <maximumf>, %422, %cst_162 [1] : vector<16x16xf32> to vector<16xf32>
    %424 = vector.shape_cast %423 : vector<16xf32> to vector<16x1xf32>
    %425 = vector.broadcast %424 : vector<16x1xf32> to vector<16x16xf32>
    %426 = arith.subf %422, %425 : vector<16x16xf32>
    %427 = math.exp %426 : vector<16x16xf32>
    %cst_163 = arith.constant dense<0.000000e+00> : vector<16xf32>
    %428 = vector.multi_reduction <add>, %427, %cst_163 [1] : vector<16x16xf32> to vector<16xf32>
    %429 = vector.shape_cast %428 : vector<16xf32> to vector<16x1xf32>
    %430 = tpu.reciprocal %429 {approx = true} : vector<16x1xf32> -> vector<16x1xf32>
    %431 = vector.broadcast %430 : vector<16x1xf32> to vector<16x16xf32>
    %432 = arith.mulf %427, %431 : vector<16x16xf32>
    %433 = arith.truncf %432 : vector<16x16xf32> to vector<16x16xbf16>
    %cst_164 = arith.constant dense<0.000000e+00> : vector<16x32xf32>
    %434 = tpu.matmul %433, %417, %cst_164 {dimension_numbers = #tpu.dot_dimension_numbers<[1], [0], [0], [1], [0, 0, 1, 1], [], []>} : vector<16x16xbf16>, vector<16x32xbf16>, vector<16x32xf32> -> vector<16x32xf32>
    %435 = vector.extract_strided_slice %362 {offsets = [0, 96], sizes = [16, 32], strides = [1, 1]} : vector<16x128xf32> to vector<16x32xf32>
    %436 = arith.truncf %435 : vector<16x32xf32> to vector<16x32xbf16>
    %437 = vector.extract_strided_slice %363 {offsets = [0, 96], sizes = [16, 32], strides = [1, 1]} : vector<16x128xf32> to vector<16x32xf32>
    %438 = arith.truncf %437 : vector<16x32xf32> to vector<16x32xbf16>
    %439 = vector.extract_strided_slice %364 {offsets = [0, 96], sizes = [16, 32], strides = [1, 1]} : vector<16x128xf32> to vector<16x32xf32>
    %440 = arith.truncf %439 : vector<16x32xf32> to vector<16x32xbf16>
    %cst_165 = arith.constant dense<0.000000e+00> : vector<16x16xf32>
    %441 = tpu.matmul %436, %438, %cst_165 {dimension_numbers = #tpu.dot_dimension_numbers<[1], [1], [0], [0], [0, 0, 1, 0], [], []>} : vector<16x32xbf16>, vector<16x32xbf16>, vector<16x16xf32> -> vector<16x16xf32>
    %cst_166 = arith.constant 0.176776692 : f32
    %442 = vector.broadcast %cst_166 : f32 to vector<16x16xf32>
    %443 = arith.mulf %441, %442 : vector<16x16xf32>
    %444 = vector.broadcast %365 : vector<1x16xf32> to vector<16x16xf32>
    %445 = arith.addf %443, %444 : vector<16x16xf32>
    %cst_167 = arith.constant dense<0xFF800000> : vector<16xf32>
    %446 = vector.multi_reduction <maximumf>, %445, %cst_167 [1] : vector<16x16xf32> to vector<16xf32>
    %447 = vector.shape_cast %446 : vector<16xf32> to vector<16x1xf32>
    %448 = vector.broadcast %447 : vector<16x1xf32> to vector<16x16xf32>
    %449 = arith.subf %445, %448 : vector<16x16xf32>
    %450 = math.exp %449 : vector<16x16xf32>
    %cst_168 = arith.constant dense<0.000000e+00> : vector<16xf32>
    %451 = vector.multi_reduction <add>, %450, %cst_168 [1] : vector<16x16xf32> to vector<16xf32>
    %452 = vector.shape_cast %451 : vector<16xf32> to vector<16x1xf32>
    %453 = tpu.reciprocal %452 {approx = true} : vector<16x1xf32> -> vector<16x1xf32>
    %454 = vector.broadcast %453 : vector<16x1xf32> to vector<16x16xf32>
    %455 = arith.mulf %450, %454 : vector<16x16xf32>
    %456 = arith.truncf %455 : vector<16x16xf32> to vector<16x16xbf16>
    %cst_169 = arith.constant dense<0.000000e+00> : vector<16x32xf32>
    %457 = tpu.matmul %456, %440, %cst_169 {dimension_numbers = #tpu.dot_dimension_numbers<[1], [0], [0], [1], [0, 0, 1, 1], [], []>} : vector<16x16xbf16>, vector<16x32xbf16>, vector<16x32xf32> -> vector<16x32xf32>
    %458 = tpu.concatenate %388, %411, %434, %457 in 1 : vector<16x32xf32>, vector<16x32xf32>, vector<16x32xf32>, vector<16x32xf32> -> vector<16x128xf32>
    %459 = vector.extract_strided_slice %359 {offsets = [16, 0], sizes = [16, 128], strides = [1, 1]} : vector<32x128xf32> to vector<16x128xf32>
    %460 = vector.extract_strided_slice %360 {offsets = [16, 0], sizes = [16, 128], strides = [1, 1]} : vector<32x128xf32> to vector<16x128xf32>
    %461 = vector.extract_strided_slice %361 {offsets = [16, 0], sizes = [16, 128], strides = [1, 1]} : vector<32x128xf32> to vector<16x128xf32>
    %462 = vector.extract_strided_slice %37 {offsets = [1, 0], sizes = [1, 16], strides = [1, 1]} : vector<2x16xf32> to vector<1x16xf32>
    %463 = vector.extract_strided_slice %459 {offsets = [0, 0], sizes = [16, 32], strides = [1, 1]} : vector<16x128xf32> to vector<16x32xf32>
    %464 = arith.truncf %463 : vector<16x32xf32> to vector<16x32xbf16>
    %465 = vector.extract_strided_slice %460 {offsets = [0, 0], sizes = [16, 32], strides = [1, 1]} : vector<16x128xf32> to vector<16x32xf32>
    %466 = arith.truncf %465 : vector<16x32xf32> to vector<16x32xbf16>
    %467 = vector.extract_strided_slice %461 {offsets = [0, 0], sizes = [16, 32], strides = [1, 1]} : vector<16x128xf32> to vector<16x32xf32>
    %468 = arith.truncf %467 : vector<16x32xf32> to vector<16x32xbf16>
    %cst_170 = arith.constant dense<0.000000e+00> : vector<16x16xf32>
    %469 = tpu.matmul %464, %466, %cst_170 {dimension_numbers = #tpu.dot_dimension_numbers<[1], [1], [0], [0], [0, 0, 1, 0], [], []>} : vector<16x32xbf16>, vector<16x32xbf16>, vector<16x16xf32> -> vector<16x16xf32>
    %cst_171 = arith.constant 0.176776692 : f32
    %470 = vector.broadcast %cst_171 : f32 to vector<16x16xf32>
    %471 = arith.mulf %469, %470 : vector<16x16xf32>
    %472 = vector.broadcast %462 : vector<1x16xf32> to vector<16x16xf32>
    %473 = arith.addf %471, %472 : vector<16x16xf32>
    %cst_172 = arith.constant dense<0xFF800000> : vector<16xf32>
    %474 = vector.multi_reduction <maximumf>, %473, %cst_172 [1] : vector<16x16xf32> to vector<16xf32>
    %475 = vector.shape_cast %474 : vector<16xf32> to vector<16x1xf32>
    %476 = vector.broadcast %475 : vector<16x1xf32> to vector<16x16xf32>
    %477 = arith.subf %473, %476 : vector<16x16xf32>
    %478 = math.exp %477 : vector<16x16xf32>
    %cst_173 = arith.constant dense<0.000000e+00> : vector<16xf32>
    %479 = vector.multi_reduction <add>, %478, %cst_173 [1] : vector<16x16xf32> to vector<16xf32>
    %480 = vector.shape_cast %479 : vector<16xf32> to vector<16x1xf32>
    %481 = tpu.reciprocal %480 {approx = true} : vector<16x1xf32> -> vector<16x1xf32>
    %482 = vector.broadcast %481 : vector<16x1xf32> to vector<16x16xf32>
    %483 = arith.mulf %478, %482 : vector<16x16xf32>
    %484 = arith.truncf %483 : vector<16x16xf32> to vector<16x16xbf16>
    %cst_174 = arith.constant dense<0.000000e+00> : vector<16x32xf32>
    %485 = tpu.matmul %484, %468, %cst_174 {dimension_numbers = #tpu.dot_dimension_numbers<[1], [0], [0], [1], [0, 0, 1, 1], [], []>} : vector<16x16xbf16>, vector<16x32xbf16>, vector<16x32xf32> -> vector<16x32xf32>
    %486 = vector.extract_strided_slice %459 {offsets = [0, 32], sizes = [16, 32], strides = [1, 1]} : vector<16x128xf32> to vector<16x32xf32>
    %487 = arith.truncf %486 : vector<16x32xf32> to vector<16x32xbf16>
    %488 = vector.extract_strided_slice %460 {offsets = [0, 32], sizes = [16, 32], strides = [1, 1]} : vector<16x128xf32> to vector<16x32xf32>
    %489 = arith.truncf %488 : vector<16x32xf32> to vector<16x32xbf16>
    %490 = vector.extract_strided_slice %461 {offsets = [0, 32], sizes = [16, 32], strides = [1, 1]} : vector<16x128xf32> to vector<16x32xf32>
    %491 = arith.truncf %490 : vector<16x32xf32> to vector<16x32xbf16>
    %cst_175 = arith.constant dense<0.000000e+00> : vector<16x16xf32>
    %492 = tpu.matmul %487, %489, %cst_175 {dimension_numbers = #tpu.dot_dimension_numbers<[1], [1], [0], [0], [0, 0, 1, 0], [], []>} : vector<16x32xbf16>, vector<16x32xbf16>, vector<16x16xf32> -> vector<16x16xf32>
    %cst_176 = arith.constant 0.176776692 : f32
    %493 = vector.broadcast %cst_176 : f32 to vector<16x16xf32>
    %494 = arith.mulf %492, %493 : vector<16x16xf32>
    %495 = vector.broadcast %462 : vector<1x16xf32> to vector<16x16xf32>
    %496 = arith.addf %494, %495 : vector<16x16xf32>
    %cst_177 = arith.constant dense<0xFF800000> : vector<16xf32>
    %497 = vector.multi_reduction <maximumf>, %496, %cst_177 [1] : vector<16x16xf32> to vector<16xf32>
    %498 = vector.shape_cast %497 : vector<16xf32> to vector<16x1xf32>
    %499 = vector.broadcast %498 : vector<16x1xf32> to vector<16x16xf32>
    %500 = arith.subf %496, %499 : vector<16x16xf32>
    %501 = math.exp %500 : vector<16x16xf32>
    %cst_178 = arith.constant dense<0.000000e+00> : vector<16xf32>
    %502 = vector.multi_reduction <add>, %501, %cst_178 [1] : vector<16x16xf32> to vector<16xf32>
    %503 = vector.shape_cast %502 : vector<16xf32> to vector<16x1xf32>
    %504 = tpu.reciprocal %503 {approx = true} : vector<16x1xf32> -> vector<16x1xf32>
    %505 = vector.broadcast %504 : vector<16x1xf32> to vector<16x16xf32>
    %506 = arith.mulf %501, %505 : vector<16x16xf32>
    %507 = arith.truncf %506 : vector<16x16xf32> to vector<16x16xbf16>
    %cst_179 = arith.constant dense<0.000000e+00> : vector<16x32xf32>
    %508 = tpu.matmul %507, %491, %cst_179 {dimension_numbers = #tpu.dot_dimension_numbers<[1], [0], [0], [1], [0, 0, 1, 1], [], []>} : vector<16x16xbf16>, vector<16x32xbf16>, vector<16x32xf32> -> vector<16x32xf32>
    %509 = vector.extract_strided_slice %459 {offsets = [0, 64], sizes = [16, 32], strides = [1, 1]} : vector<16x128xf32> to vector<16x32xf32>
    %510 = arith.truncf %509 : vector<16x32xf32> to vector<16x32xbf16>
    %511 = vector.extract_strided_slice %460 {offsets = [0, 64], sizes = [16, 32], strides = [1, 1]} : vector<16x128xf32> to vector<16x32xf32>
    %512 = arith.truncf %511 : vector<16x32xf32> to vector<16x32xbf16>
    %513 = vector.extract_strided_slice %461 {offsets = [0, 64], sizes = [16, 32], strides = [1, 1]} : vector<16x128xf32> to vector<16x32xf32>
    %514 = arith.truncf %513 : vector<16x32xf32> to vector<16x32xbf16>
    %cst_180 = arith.constant dense<0.000000e+00> : vector<16x16xf32>
    %515 = tpu.matmul %510, %512, %cst_180 {dimension_numbers = #tpu.dot_dimension_numbers<[1], [1], [0], [0], [0, 0, 1, 0], [], []>} : vector<16x32xbf16>, vector<16x32xbf16>, vector<16x16xf32> -> vector<16x16xf32>
    %cst_181 = arith.constant 0.176776692 : f32
    %516 = vector.broadcast %cst_181 : f32 to vector<16x16xf32>
    %517 = arith.mulf %515, %516 : vector<16x16xf32>
    %518 = vector.broadcast %462 : vector<1x16xf32> to vector<16x16xf32>
    %519 = arith.addf %517, %518 : vector<16x16xf32>
    %cst_182 = arith.constant dense<0xFF800000> : vector<16xf32>
    %520 = vector.multi_reduction <maximumf>, %519, %cst_182 [1] : vector<16x16xf32> to vector<16xf32>
    %521 = vector.shape_cast %520 : vector<16xf32> to vector<16x1xf32>
    %522 = vector.broadcast %521 : vector<16x1xf32> to vector<16x16xf32>
    %523 = arith.subf %519, %522 : vector<16x16xf32>
    %524 = math.exp %523 : vector<16x16xf32>
    %cst_183 = arith.constant dense<0.000000e+00> : vector<16xf32>
    %525 = vector.multi_reduction <add>, %524, %cst_183 [1] : vector<16x16xf32> to vector<16xf32>
    %526 = vector.shape_cast %525 : vector<16xf32> to vector<16x1xf32>
    %527 = tpu.reciprocal %526 {approx = true} : vector<16x1xf32> -> vector<16x1xf32>
    %528 = vector.broadcast %527 : vector<16x1xf32> to vector<16x16xf32>
    %529 = arith.mulf %524, %528 : vector<16x16xf32>
    %530 = arith.truncf %529 : vector<16x16xf32> to vector<16x16xbf16>
    %cst_184 = arith.constant dense<0.000000e+00> : vector<16x32xf32>
    %531 = tpu.matmul %530, %514, %cst_184 {dimension_numbers = #tpu.dot_dimension_numbers<[1], [0], [0], [1], [0, 0, 1, 1], [], []>} : vector<16x16xbf16>, vector<16x32xbf16>, vector<16x32xf32> -> vector<16x32xf32>
    %532 = vector.extract_strided_slice %459 {offsets = [0, 96], sizes = [16, 32], strides = [1, 1]} : vector<16x128xf32> to vector<16x32xf32>
    %533 = arith.truncf %532 : vector<16x32xf32> to vector<16x32xbf16>
    %534 = vector.extract_strided_slice %460 {offsets = [0, 96], sizes = [16, 32], strides = [1, 1]} : vector<16x128xf32> to vector<16x32xf32>
    %535 = arith.truncf %534 : vector<16x32xf32> to vector<16x32xbf16>
    %536 = vector.extract_strided_slice %461 {offsets = [0, 96], sizes = [16, 32], strides = [1, 1]} : vector<16x128xf32> to vector<16x32xf32>
    %537 = arith.truncf %536 : vector<16x32xf32> to vector<16x32xbf16>
    %cst_185 = arith.constant dense<0.000000e+00> : vector<16x16xf32>
    %538 = tpu.matmul %533, %535, %cst_185 {dimension_numbers = #tpu.dot_dimension_numbers<[1], [1], [0], [0], [0, 0, 1, 0], [], []>} : vector<16x32xbf16>, vector<16x32xbf16>, vector<16x16xf32> -> vector<16x16xf32>
    %cst_186 = arith.constant 0.176776692 : f32
    %539 = vector.broadcast %cst_186 : f32 to vector<16x16xf32>
    %540 = arith.mulf %538, %539 : vector<16x16xf32>
    %541 = vector.broadcast %462 : vector<1x16xf32> to vector<16x16xf32>
    %542 = arith.addf %540, %541 : vector<16x16xf32>
    %cst_187 = arith.constant dense<0xFF800000> : vector<16xf32>
    %543 = vector.multi_reduction <maximumf>, %542, %cst_187 [1] : vector<16x16xf32> to vector<16xf32>
    %544 = vector.shape_cast %543 : vector<16xf32> to vector<16x1xf32>
    %545 = vector.broadcast %544 : vector<16x1xf32> to vector<16x16xf32>
    %546 = arith.subf %542, %545 : vector<16x16xf32>
    %547 = math.exp %546 : vector<16x16xf32>
    %cst_188 = arith.constant dense<0.000000e+00> : vector<16xf32>
    %548 = vector.multi_reduction <add>, %547, %cst_188 [1] : vector<16x16xf32> to vector<16xf32>
    %549 = vector.shape_cast %548 : vector<16xf32> to vector<16x1xf32>
    %550 = tpu.reciprocal %549 {approx = true} : vector<16x1xf32> -> vector<16x1xf32>
    %551 = vector.broadcast %550 : vector<16x1xf32> to vector<16x16xf32>
    %552 = arith.mulf %547, %551 : vector<16x16xf32>
    %553 = arith.truncf %552 : vector<16x16xf32> to vector<16x16xbf16>
    %cst_189 = arith.constant dense<0.000000e+00> : vector<16x32xf32>
    %554 = tpu.matmul %553, %537, %cst_189 {dimension_numbers = #tpu.dot_dimension_numbers<[1], [0], [0], [1], [0, 0, 1, 1], [], []>} : vector<16x16xbf16>, vector<16x32xbf16>, vector<16x32xf32> -> vector<16x32xf32>
    %555 = tpu.concatenate %485, %508, %531, %554 in 1 : vector<16x32xf32>, vector<16x32xf32>, vector<16x32xf32>, vector<16x32xf32> -> vector<16x128xf32>
    %556 = tpu.concatenate %458, %555 in 0 : vector<16x128xf32>, vector<16x128xf32> -> vector<32x128xf32>
    %557 = arith.truncf %556 : vector<32x128xf32> to vector<32x128xbf16>
    %cst_190 = arith.constant dense<0.000000e+00> : vector<32x128xf32>
    %558 = tpu.matmul %557, %336, %cst_190 {dimension_numbers = #tpu.dot_dimension_numbers<[1], [0], [0], [1], [0, 0, 1, 1], [], []>} : vector<32x128xbf16>, vector<128x128xbf16>, vector<32x128xf32> -> vector<32x128xf32>
    %559 = vector.broadcast %338 : vector<1x128xf32> to vector<32x128xf32>
    %560 = arith.addf %558, %559 : vector<32x128xf32>
    %561 = arith.addf %330, %560 : vector<32x128xf32>
    %cst_191 = arith.constant dense<0.000000e+00> : vector<32xf32>
    %562 = vector.multi_reduction <add>, %561, %cst_191 [1] : vector<32x128xf32> to vector<32xf32>
    %563 = vector.shape_cast %562 : vector<32xf32> to vector<32x1xf32>
    %cst_192 = arith.constant 1.280000e+02 : f32
    %564 = vector.broadcast %cst_192 : f32 to vector<32x1xf32>
    %565 = arith.divf %563, %564 : vector<32x1xf32>
    %566 = vector.broadcast %565 : vector<32x1xf32> to vector<32x128xf32>
    %567 = arith.subf %561, %566 : vector<32x128xf32>
    %568 = arith.mulf %567, %567 : vector<32x128xf32>
    %cst_193 = arith.constant dense<0.000000e+00> : vector<32xf32>
    %569 = vector.multi_reduction <add>, %568, %cst_193 [1] : vector<32x128xf32> to vector<32xf32>
    %570 = vector.shape_cast %569 : vector<32xf32> to vector<32x1xf32>
    %cst_194 = arith.constant 1.280000e+02 : f32
    %571 = vector.broadcast %cst_194 : f32 to vector<32x1xf32>
    %572 = arith.divf %570, %571 : vector<32x1xf32>
    %cst_195 = arith.constant 9.99999996E-13 : f32
    %573 = vector.broadcast %cst_195 : f32 to vector<32x1xf32>
    %574 = arith.addf %572, %573 : vector<32x1xf32>
    %575 = math.rsqrt %574 : vector<32x1xf32>
    %576 = vector.broadcast %575 : vector<32x1xf32> to vector<32x128xf32>
    %577 = arith.mulf %567, %576 : vector<32x128xf32>
    %578 = vector.broadcast %340 : vector<1x128xf32> to vector<32x128xf32>
    %579 = arith.mulf %577, %578 : vector<32x128xf32>
    %580 = vector.broadcast %342 : vector<1x128xf32> to vector<32x128xf32>
    %581 = arith.addf %579, %580 : vector<32x128xf32>
    %582 = arith.truncf %581 : vector<32x128xf32> to vector<32x128xbf16>
    %cst_196 = arith.constant dense<0.000000e+00> : vector<32x256xf32>
    %583 = tpu.matmul %582, %344, %cst_196 {dimension_numbers = #tpu.dot_dimension_numbers<[1], [0], [0], [1], [0, 0, 1, 1], [], []>} : vector<32x128xbf16>, vector<128x256xbf16>, vector<32x256xf32> -> vector<32x256xf32>
    %584 = vector.broadcast %346 : vector<1x256xf32> to vector<32x256xf32>
    %585 = arith.addf %583, %584 : vector<32x256xf32>
    %cst_197 = arith.constant 5.000000e-01 : f32
    %586 = vector.broadcast %cst_197 : f32 to vector<32x256xf32>
    %587 = arith.mulf %586, %585 : vector<32x256xf32>
    %cst_198 = arith.constant 4.471500e-02 : f32
    %588 = vector.broadcast %cst_198 : f32 to vector<32x256xf32>
    %589 = arith.mulf %588, %585 : vector<32x256xf32>
    %590 = arith.mulf %589, %585 : vector<32x256xf32>
    %591 = arith.mulf %590, %585 : vector<32x256xf32>
    %592 = arith.addf %585, %591 : vector<32x256xf32>
    %cst_199 = arith.constant 0.797884583 : f32
    %593 = vector.broadcast %cst_199 : f32 to vector<32x256xf32>
    %594 = arith.mulf %593, %592 : vector<32x256xf32>
    %595 = math.tanh %594 : vector<32x256xf32>
    %cst_200 = arith.constant 1.000000e+00 : f32
    %596 = vector.broadcast %cst_200 : f32 to vector<32x256xf32>
    %597 = arith.addf %596, %595 : vector<32x256xf32>
    %598 = arith.mulf %587, %597 : vector<32x256xf32>
    %599 = arith.truncf %598 : vector<32x256xf32> to vector<32x256xbf16>
    %cst_201 = arith.constant dense<0.000000e+00> : vector<32x128xf32>
    %600 = tpu.matmul %599, %348, %cst_201 {dimension_numbers = #tpu.dot_dimension_numbers<[1], [0], [0], [1], [0, 0, 1, 1], [], []>} : vector<32x256xbf16>, vector<256x128xbf16>, vector<32x128xf32> -> vector<32x128xf32>
    %601 = vector.broadcast %350 : vector<1x128xf32> to vector<32x128xf32>
    %602 = arith.addf %600, %601 : vector<32x128xf32>
    %603 = arith.addf %581, %602 : vector<32x128xf32>
    %cst_202 = arith.constant dense<0.000000e+00> : vector<32xf32>
    %604 = vector.multi_reduction <add>, %603, %cst_202 [1] : vector<32x128xf32> to vector<32xf32>
    %605 = vector.shape_cast %604 : vector<32xf32> to vector<32x1xf32>
    %cst_203 = arith.constant 1.280000e+02 : f32
    %606 = vector.broadcast %cst_203 : f32 to vector<32x1xf32>
    %607 = arith.divf %605, %606 : vector<32x1xf32>
    %608 = vector.broadcast %607 : vector<32x1xf32> to vector<32x128xf32>
    %609 = arith.subf %603, %608 : vector<32x128xf32>
    %610 = arith.mulf %609, %609 : vector<32x128xf32>
    %cst_204 = arith.constant dense<0.000000e+00> : vector<32xf32>
    %611 = vector.multi_reduction <add>, %610, %cst_204 [1] : vector<32x128xf32> to vector<32xf32>
    %612 = vector.shape_cast %611 : vector<32xf32> to vector<32x1xf32>
    %cst_205 = arith.constant 1.280000e+02 : f32
    %613 = vector.broadcast %cst_205 : f32 to vector<32x1xf32>
    %614 = arith.divf %612, %613 : vector<32x1xf32>
    %cst_206 = arith.constant 9.99999996E-13 : f32
    %615 = vector.broadcast %cst_206 : f32 to vector<32x1xf32>
    %616 = arith.addf %614, %615 : vector<32x1xf32>
    %617 = math.rsqrt %616 : vector<32x1xf32>
    %618 = vector.broadcast %617 : vector<32x1xf32> to vector<32x128xf32>
    %619 = arith.mulf %609, %618 : vector<32x128xf32>
    %620 = vector.broadcast %352 : vector<1x128xf32> to vector<32x128xf32>
    %621 = arith.mulf %619, %620 : vector<32x128xf32>
    %622 = vector.broadcast %354 : vector<1x128xf32> to vector<32x128xf32>
    %623 = arith.addf %621, %622 : vector<32x128xf32>
    %c0_207 = arith.constant 0 : index
    %c0_208 = arith.constant 0 : index
    %624 = vector.load %arg2[%c0_207, %c0_208] : memref<2x128xf32, #tpu.memory_space<vmem>>, vector<2x128xf32>
    %c0_209 = arith.constant 0 : index
    %c0_210 = arith.constant 0 : index
    %625 = vector.load %arg20[%c0_209, %c0_210] : memref<128x128xbf16, #tpu.memory_space<vmem>>, vector<128x128xbf16>
    %626 = arith.truncf %624 : vector<2x128xf32> to vector<2x128xbf16>
    %cst_211 = arith.constant dense<0.000000e+00> : vector<2x128xf32>
    %627 = tpu.matmul %626, %625, %cst_211 {dimension_numbers = #tpu.dot_dimension_numbers<[1], [0], [0], [1], [0, 0, 1, 1], [], []>} : vector<2x128xbf16>, vector<128x128xbf16>, vector<2x128xf32> -> vector<2x128xf32>
    %c0_212 = arith.constant 0 : index
    %c0_213 = arith.constant 0 : index
    %628 = vector.load %arg21[%c0_212, %c0_213] : memref<1x128xf32, #tpu.memory_space<vmem>>, vector<1x128xf32>
    %629 = vector.broadcast %628 : vector<1x128xf32> to vector<2x128xf32>
    %630 = arith.addf %627, %629 : vector<2x128xf32>
    %631 = vector.extract_strided_slice %630 {offsets = [0, 0], sizes = [1, 128], strides = [1, 1]} : vector<2x128xf32> to vector<1x128xf32>
    %632 = vector.shape_cast %631 : vector<1x128xf32> to vector<1x128xf32>
    %633 = vector.broadcast %632 : vector<1x128xf32> to vector<16x128xf32>
    %634 = vector.extract_strided_slice %630 {offsets = [1, 0], sizes = [1, 128], strides = [1, 1]} : vector<2x128xf32> to vector<1x128xf32>
    %635 = vector.shape_cast %634 : vector<1x128xf32> to vector<1x128xf32>
    %636 = vector.broadcast %635 : vector<1x128xf32> to vector<16x128xf32>
    %637 = tpu.concatenate %633, %636 in 0 : vector<16x128xf32>, vector<16x128xf32> -> vector<32x128xf32>
    %638 = arith.addf %623, %637 : vector<32x128xf32>
    %c0_214 = arith.constant 0 : index
    %c0_215 = arith.constant 0 : index
    %639 = vector.load %arg22[%c0_214, %c0_215] : memref<128x128xbf16, #tpu.memory_space<vmem>>, vector<128x128xbf16>
    %640 = arith.truncf %638 : vector<32x128xf32> to vector<32x128xbf16>
    %cst_216 = arith.constant dense<0.000000e+00> : vector<32x128xf32>
    %641 = tpu.matmul %640, %639, %cst_216 {dimension_numbers = #tpu.dot_dimension_numbers<[1], [0], [0], [1], [0, 0, 1, 1], [], []>} : vector<32x128xbf16>, vector<128x128xbf16>, vector<32x128xf32> -> vector<32x128xf32>
    %c0_217 = arith.constant 0 : index
    %c0_218 = arith.constant 0 : index
    %642 = vector.load %arg23[%c0_217, %c0_218] : memref<1x128xf32, #tpu.memory_space<vmem>>, vector<1x128xf32>
    %643 = vector.broadcast %642 : vector<1x128xf32> to vector<32x128xf32>
    %644 = arith.addf %641, %643 : vector<32x128xf32>
    %c0_219 = arith.constant 0 : index
    %c0_220 = arith.constant 0 : index
    %645 = vector.load %arg24[%c0_219, %c0_220] : memref<32x128xf32, #tpu.memory_space<vmem>>, vector<32x128xf32>
    tpu.vector_store %arg24[%c0_219, %c0_220], %644 {strides = array<i32>} : memref<32x128xf32, #tpu.memory_space<vmem>>, vector<32x128xf32>,
    return
  }
}

</mosaic_0001>

<bundles_post_ra>
// kernel: semantic_decoder.1
= control target key start
LH: loop header
LB: loop body
LE: loop exit
PB: predicated region body
PF: predicated region fallthrough
CT: control target
= control target key end

     0   :  { %s7552_s0 = inlined_call_operand.vmem [shape: s32[32,1], index: 0, kind: input, shape index: {}]   ;;  %s7553_s1 = inlined_call_operand.vmem [shape: f32[2,16], index: 1, kind: input, shape index: {}]   ;;  %s7554_s2 = inlined_call_operand.vmem [shape: f32[2,128], index: 2, kind: input, shape index: {}]   ;;  %s7555_s3 = inlined_call_operand.vmem [shape: f32[128,128], index: 3, kind: input, shape index: {}]   ;;  %s7556_s4 = inlined_call_operand.vmem [shape: f32[16,128], index: 4, kind: input, shape index: {}]   ;;  %s7557_s5 = inlined_call_operand.vmem [shape: f32[1,128], index: 5, kind: input, shape index: {}]   ;;  %s7558_s6 = inlined_call_operand.vmem [shape: f32[1,128], index: 6, kind: input, shape index: {}]   ;;  %s7559_s7 = inlined_call_operand.vmem [shape: f32[1,128], index: 7, kind: input, shape index: {}]   ;;  %s7560_s8 = inlined_call_operand.vmem [shape: bf16[2,128,384], index: 8, kind: input, shape index: {}]   ;;  %s7561_s9 = inlined_call_operand.vmem [shape: f32[2,1,384], index: 9, kind: input, shape index: {}]   ;;  %s7562_s10 = inlined_call_operand.vmem [shape: bf16[2,128,128], index: 10, kind: input, shape index: {}]   ;;  %s7563_s11 = inlined_call_operand.vmem [shape: f32[2,1,128], index: 11, kind: input, shape index: {}]   ;;  %s7564_s12 = inlined_call_operand.vmem [shape: f32[2,1,128], index: 12, kind: input, shape index: {}, may-alias: {12,18}]   ;;  %s7565_s13 = inlined_call_operand.vmem [shape: f32[2,1,128], index: 13, kind: input, shape index: {}, may-alias: {13,19}]   ;;  %s7566_s14 = inlined_call_operand.vmem [shape: bf16[2,128,256], index: 14, kind: input, shape index: {}]   ;;  %s7567_s15 = inlined_call_operand.vmem [shape: f32[2,1,256], index: 15, kind: input, shape index: {}]   ;;  %s7568_s16 = inlined_call_operand.vmem [shape: bf16[2,256,128], index: 16, kind: input, shape index: {}]   ;;  %s7569_s17 = inlined_call_operand.vmem [shape: f32[2,1,128], index: 17, kind: input, shape index: {}]   ;;  %s7570_s18 = inlined_call_operand.vmem [shape: f32[2,1,128], index: 18, kind: input, shape index: {}, may-alias: {12,18}]   ;;  %s7571_s19 = inlined_call_operand.vmem [shape: f32[2,1,128], index: 19, kind: input, shape index: {}, may-alias: {13,19}]   ;;  %s7572_s20 = inlined_call_operand.vmem [shape: bf16[128,128], index: 20, kind: input, shape index: {}]   ;;  %s7573_s21 = inlined_call_operand.vmem [shape: f32[1,128], index: 21, kind: input, shape index: {}]   ;;  %s7574_s22 = inlined_call_operand.vmem [shape: bf16[128,128], index: 22, kind: input, shape index: {}]   ;;  %s7575_s23 = inlined_call_operand.vmem [shape: f32[1,128], index: 23, kind: input, shape index: {}]   ;;  %s7576_s24 = inlined_call_operand.hbm [shape: f32[32,128], index: 24, kind: output, shape index: {}]  }
   0x1   :  { %7582 = sst [smem:[#allocation5_spill]] %s7552_s0 }
   0x2   :  { %7583 = sst [smem:[#allocation6_spill]] %s7553_s1 }
   0x3   :  { %7584 = sst [smem:[#allocation7_spill]] %s7554_s2 }
   0x4   :  { %7585 = sst [smem:[#allocation8_spill]] %s7555_s3 }
   0x5   :  { %7586 = sst [smem:[#allocation9_spill]] %s7556_s4 }
   0x6   :  { %7587 = sst [smem:[#allocation10_spill]] %s7557_s5 }
   0x7   :  { %7588 = sst [smem:[#allocation11_spill]] %s7558_s6 }
   0x8   :  { %7589 = sst [smem:[#allocation12_spill]] %s7559_s7 }
   0x9   :  { %7590 = sst [smem:[#allocation13_spill]] %s7560_s8 }
   0xa   :  { %7591 = sst [smem:[#allocation14_spill]] %s7571_s19 }
   0xb   :  { %s7592_s27 = sld [smem:[#allocation5_spill]]  ;;  %s7593_s19 = sld [smem:[#allocation8_spill]]  ;;  %v5980_v2 = vmov 0  }
   0xc   :  { %5518 = vset.pattern.permute.xlu0 %v5980_v2  ;;  %5519 = vset.pattern.permute.xlu1 %v5980_v2 }
   0xd   :  { %569 = vmatprep.mubr.bf16.mxu1 %v5980_v2 }
  0x11   :  { %v79_v0 = vld [vmem:[%s7592_s27] sm:$0xff]  ;;  %v106_v3 = vld [vmem:[%s7593_s19 + $0x8] sm:$0xff]  ;;  %v107_v4 = vld [vmem:[%s7593_s19 + $0x10] sm:$0xff] }
  0x12   :  { %v105_v1 = vld [vmem:[%s7593_s19] sm:$0xff]  ;;  %v108_v5 = vld [vmem:[%s7593_s19 + $0x18] sm:$0xff]  ;;  %86 = vperm.xlu0 %5518, %v79_v0   ;;  %v80_v8 = vld [vmem:[%s7592_s27 + $0x8] sm:$0xff] }
  0x13   :  { %v5476_v6 = vpack.c.bf16 %v106_v3, %v105_v1  ;;  %v5480_v7 = vpack.c.bf16 %v108_v5, %v107_v4  ;;  %v109_v9 = vld [vmem:[%s7593_s19 + $0x20] sm:$0xff]  ;;  %v110_v10 = vld [vmem:[%s7593_s19 + $0x28] sm:$0xff]  ;;  %v111_v12 = vld [vmem:[%s7593_s19 + $0x30] sm:$0xff] }
  0x14   :  { %v5484_v11 = vpack.c.bf16 %v110_v10, %v109_v9  ;;  %v112_v13 = vld [vmem:[%s7593_s19 + $0x38] sm:$0xff]  ;;  %v113_v14 = vld [vmem:[%s7593_s19 + $0x40] sm:$0xff]  ;;  %v114_v15 = vld [vmem:[%s7593_s19 + $0x48] sm:$0xff] }
  0x15   :  { %5477 = vmatprep.subr.bf16.mxu0 %v5476_v6  ;;  %v5488_v16 = vpack.c.bf16 %v112_v13, %v111_v12  ;;  %v115_v17 = vld [vmem:[%s7593_s19 + $0x50] sm:$0xff]  ;;  %v116_v18 = vld [vmem:[%s7593_s19 + $0x58] sm:$0xff]  ;;  %v5492_v19 = vpack.c.bf16 %v114_v15, %v113_v14  ;;  %v117_v20 = vld [vmem:[%s7593_s19 + $0x60] sm:$0xff] }
  0x16   :  { %5479 = vmatpush3.bf16.msra.mxu0 %v5476_v6  ;;  %89 = vperm.xlu0 %5518, %v80_v8   ;;  %v118_v21 = vld [vmem:[%s7593_s19 + $0x68] sm:$0xff]  ;;  %v5496_v22 = vpack.c.bf16 %v116_v18, %v115_v17  ;;  %v119_v23 = vld [vmem:[%s7593_s19 + $0x70] sm:$0xff]  ;;  %v120_v24 = vld [vmem:[%s7593_s19 + $0x78] sm:$0xff] }
  0x17   :  { %5481 = vmatprep.subr.bf16.mxu0 %v5480_v7  ;;  %v5500_v25 = vpack.c.bf16 %v118_v21, %v117_v20  ;;  %v5504_v26 = vpack.c.bf16 %v120_v24, %v119_v23 }
  0x1a   :  { %5483 = vmatpush3.bf16.msra.mxu0 %v5480_v7 }
  0x1b   :  { %5485 = vmatprep.subr.bf16.mxu0 %v5484_v11 }
  0x1e   :  { %5487 = vmatpush3.bf16.msra.mxu0 %v5484_v11 }
  0x1f   :  { %5489 = vmatprep.subr.bf16.mxu0 %v5488_v16 }
  0x22   :  { %5491 = vmatpush3.bf16.msra.mxu0 %v5488_v16 }
  0x23   :  { %5493 = vmatprep.subr.bf16.mxu0 %v5492_v19 }
  0x26   :  { %5495 = vmatpush3.bf16.msra.mxu0 %v5492_v19 }
  0x27   :  { %5497 = vmatprep.subr.bf16.mxu0 %v5496_v22 }
  0x2a   :  { %5499 = vmatpush3.bf16.msra.mxu0 %v5496_v22 }
  0x2b   :  { %5501 = vmatprep.subr.bf16.mxu0 %v5500_v25 }
  0x2e   :  { %5503 = vmatpush3.bf16.msra.mxu0 %v5500_v25 }
  0x2f   :  { %5505 = vmatprep.subr.bf16.mxu0 %v5504_v26 }
  0x32   :  { %5507 = vmatpush3.bf16.msra.mxu0 %v5504_v26 }
  0x33   :  { %29 = vsyncpa [#allocation3], 0  ;;  %v83_v27 = vlaneseq  ;;  %v5981_v30 = vmov 1.0   ;;  %s7594_s3 = sld [smem:[#allocation9_spill]]  ;;  %s7595_s5 = sld [smem:[#allocation10_spill]]  ;;  %v81_v55 = vld [vmem:[%s7592_s27 + $0x10] sm:$0xff] }
  0x34   :  { %s7596_s6 = sld [smem:[#allocation13_spill]]  ;;  %v82_v58 = vld [vmem:[%s7592_s27 + $0x18] sm:$0xff]  ;;  %s7597_s25 = sld [smem:[#allocation11_spill]]  ;;  %v5982_v23 = vmov 0.0   ;;  %vm5983_vm4 = vmmov 0   ;;  %vm642_vm5 = vcmask 261120  }
  0x35   :  { %v6173_v28 = vand.u32 127, %v83_v27  ;;  %s7598_s1 = sld [smem:[#allocation12_spill]]  ;;  %5184 = vmatprep.subr.bf16.mxu0 %v5982_v23  ;;  %s5984_s26 = smov 96   ;;  %vm698_vm6 = vcmask 130048   ;;  %vm1170_vm7 = vcmask 523264   ;;  %vm1173_vm8 = vcmask 785408  }
  0x36   :  { %s5985_s28 = smov 64   ;;  %s5986_s2 = smov 32  }
  0x37   :  { %s7601_s29 = sld [smem:[#allocation7_spill]] }
  0x39   :  { %v6182_v32 = vld [vmem:[%s7594_s3] sm:$0xff]  ;;  %v6187_v34 = vld [vmem:[%s7594_s3 + $0x8] sm:$0xff]  ;;  %s7600_s3 = sld [smem:[#allocation14_spill]] }
  0x3a   :  { %v6192_v36 = vld [vmem:[%s7595_s5] ss:$0 sm:$0xff]  ;;  %v5580_v41 = vld [vmem:[%s7596_s6 + $0x4] ss:$12 sps:$4 sm:$0xff]   ;;  %v5583_v43 = vld [vmem:[%s7596_s6 + $0x1c] ss:$12 sps:$4 sm:$0xff]  }
  0x3b   :  { %v5582_v42 = vld [vmem:[%s7596_s6] ss:$12 sps:$4 sm:$0xff]   ;;  %537 = vmatprep.subr.bf16.mxu1 %v5580_v41  ;;  %v5585_v52 = vld [vmem:[%s7596_s6 + $0x18] ss:$12 sps:$4 sm:$0xff]   ;;  %v5588_v54 = vld [vmem:[%s7596_s6 + $0x30] ss:$12 sps:$4 sm:$0xff]  }
  0x3c   :  { %538 = vmatpush1.bf16.msra.mxu1 %v5582_v42  ;;  %v5586_v53 = vld [vmem:[%s7596_s6 + $0x34] ss:$12 sps:$4 sm:$0xff]   ;;  %v5589_v56 = vld [vmem:[%s7596_s6 + $0x4c] ss:$12 sps:$4 sm:$0xff]   ;;  %v5592_v59 = vld [vmem:[%s7596_s6 + $0x64] ss:$12 sps:$4 sm:$0xff]  }
  0x3d   :  { %539 = vmatprep.subr.bf16.mxu1 %v5583_v43  ;;  %v5591_v57 = vld [vmem:[%s7596_s6 + $0x48] ss:$12 sps:$4 sm:$0xff]   ;;  %v5594_v60 = vld [vmem:[%s7596_s6 + $0x60] ss:$12 sps:$4 sm:$0xff]   ;;  %v5597_v62 = vld [vmem:[%s7596_s6 + $0x78] ss:$12 sps:$4 sm:$0xff]  }
  0x3e   :  { %v5595_v61 = vld [vmem:[%s7596_s6 + $0x7c] ss:$12 sps:$4 sm:$0xff]   ;;  %v5598_v63 = vld [vmem:[%s7596_s6 + $0x94] ss:$12 sps:$4 sm:$0xff]   ;;  %v5601_v1 = vld [vmem:[%s7596_s6 + $0xac] ss:$12 sps:$4 sm:$0xff]  }
  0x3f   :  { %v5600_v0 = vld [vmem:[%s7596_s6 + $0x90] ss:$12 sps:$4 sm:$0xff]   ;;  %v5603_v3 = vld [vmem:[%s7596_s6 + $0xa8] ss:$12 sps:$4 sm:$0xff]   ;;  %v6259_v14 = vld [vmem:[%s7597_s25] ss:$0 sm:$0xff] }
  0x40   :  { %540 = vmatpush1.bf16.msra.mxu1 %v5585_v52  ;;  %v6265_v18 = vld [vmem:[%s7598_s1] ss:$0 sm:$0xff]  ;;  %s7599_s25 = sld [smem:[#allocation6_spill]] }
  0x41   :  { %541 = vmatprep.subr.bf16.mxu1 %v5586_v53 }
  0x44   :  { %542 = vmatpush1.bf16.msra.mxu1 %v5588_v54 }
  0x45   :  { %543 = vmatprep.subr.bf16.mxu1 %v5589_v56  ;;  %v5605_v56 = vld [vmem:[%s7596_s6 + $0x20] ss:$12 sps:$4 sm:$0xff]  }
  0x48   :  { %544 = vmatpush1.bf16.msra.mxu1 %v5591_v57  ;;  %v5606_v57 = vld [vmem:[%s7596_s6 + $0x38] ss:$12 sps:$4 sm:$0xff]  }
  0x49   :  { %545 = vmatprep.subr.bf16.mxu1 %v5592_v59  ;;  %v5608_v59 = vld [vmem:[%s7596_s6 + $0x68] ss:$12 sps:$4 sm:$0xff]  }
  0x4c   :  { %546 = vmatpush1.bf16.msra.mxu1 %v5594_v60  ;;  %v5609_v60 = vld [vmem:[%s7596_s6 + $0x80] ss:$12 sps:$4 sm:$0xff]  }
  0x4d   :  { %547 = vmatprep.subr.bf16.mxu1 %v5595_v61  ;;  %v5610_v61 = vld [vmem:[%s7596_s6 + $0x98] ss:$12 sps:$4 sm:$0xff]  }
  0x50   :  { %548 = vmatpush1.bf16.msra.mxu1 %v5597_v62  ;;  %v5611_v62 = vld [vmem:[%s7596_s6 + $0xb0] ss:$12 sps:$4 sm:$0xff]  }
  0x51   :  { %549 = vmatprep.subr.bf16.mxu1 %v5598_v63  ;;  %v6358_v63 = vld [vmem:[%s7599_s25] sm:$0x3] }
  0x54   :  { %550 = vmatpush1.bf16.msra.mxu1 %v5600_v0 }
  0x55   :  { %551 = vmatprep.subr.bf16.mxu1 %v5601_v1 }
  0x58   :  { %552 = vmatpush1.bf16.msra.mxu1 %v5603_v3 }
  0x91   :  { %v87_v29 = vpop.permute.xlu0 %86 }
  0x92   :  { %vm97_vm0 = vcmp.eq.s32.totalorder %v6173_v28, %v87_v29 }
  0x93   :  { %5158 = vmatprep.mubr.msk.f32.mxu0 %vm97_vm0, %v5981_v30 }
  0x95   :  { %v90_v31 = vpop.permute.xlu0 %89 }
  0x96   :  { %vm98_vm1 = vcmp.eq.s32.totalorder %v6173_v28, %v90_v31  ;;  %v6288_v31 = vshrl.u32 %v83_v27, 7 }
  0x97   :  { %5159 = vmatmul.mubr.msk.f32.vlgmr.msra.gmra.mrb[0].mxu0 %vm98_vm1, %v5981_v30 }
 0x16a   :  { %v5160_v33 = vpop.f32.mrb[0].mxu0 }
 0x16b   :  { %v189_v35 = vpop.f32.mrb[1].mxu0  ;;  %v195_v38 = vadd.f32 %v5160_v33, %v6187_v34  ;;  %v6291_v33 = vsub.s32 0, %v6288_v31 }
 0x16c   :  { %v190_v37 = vadd.f32 %v189_v35, %v6182_v32  ;;  %v6294_v35 = vsub.s32 1, %v6288_v31 }
 0x16d   :  { %v216_v40 = vadd.f32 %v6192_v36, %v195_v38  ;;  %v6362_v0 = vrot.slane %v6358_v63, %v6291_v33 }
 0x16e   :  { %v215_v39 = vadd.f32 %v6192_v36, %v190_v37 }
 0x170   :  { %221 = vadd.xlane.f32.xlu1 %v215_v39 }
 0x174   :  { %223 = vadd.xlane.f32.xlu1 %v216_v40 }
 0x1fd   :  { %v222_v44 = vpop.xlane.xlu1 %221 }
 0x1fe   :  { %v230_v45 = vmul.f32 0.0078125, %v222_v44 }
 0x200   :  { %v234_v46 = vsub.f32 %v215_v39, %v230_v45 }
 0x201   :  { %v224_v47 = vpop.xlane.xlu1 %223 }
 0x202   :  { %v231_v48 = vmul.f32 0.0078125, %v224_v47  ;;  %v238_v49 = vmul.f32 %v234_v46, %v234_v46 }
 0x204   :  { %242 = vadd.xlane.f32.xlu0 %v238_v49  ;;  %v235_v50 = vsub.f32 %v216_v40, %v231_v48 }
 0x206   :  { %v239_v51 = vmul.f32 %v235_v50, %v235_v50 }
 0x208   :  { %244 = vadd.xlane.f32.xlu1 %v239_v51 }
 0x219   :  { %92 = vperm.xlu1 %5519, %v81_v55   ;;  %v5604_v55 = vld [vmem:[%s7596_s6 + $0x8] ss:$12 sps:$4 sm:$0xff]  }
 0x21a   :  { %5164 = vmatprep.subr.bf16.mxu1 %v5604_v55 }
 0x21d   :  { %95 = vperm.xlu1 %5519, %v82_v58   ;;  %v5607_v58 = vld [vmem:[%s7596_s6 + $0x50] ss:$12 sps:$4 sm:$0xff]  }
 0x291   :  { %v243_v4 = vpop.xlane.xlu0 %242 }
 0x292   :  { %v250_v5 = vmul.f32 0.0078125, %v243_v4 }
 0x294   :  { %v254_v6 = vadd.f32 1e-12, %v250_v5 }
 0x295   :  { %v245_v7 = vpop.xlane.xlu1 %244 }
 0x296   :  { %5756 = vrsqrt.f32 %v254_v6  ;;  %v251_v8 = vmul.f32 0.0078125, %v245_v7 }
 0x298   :  { %v255_v9 = vadd.f32 1e-12, %v251_v8 }
 0x299   :  { %v93_v10 = vpop.permute.xlu1 %92 }
 0x29a   :  { %5758 = vrsqrt.f32 %v255_v9  ;;  %vm99_vm2 = vcmp.eq.s32.totalorder %v6173_v28, %v93_v10 }
 0x29b   :  { %5161 = vmatprep.mubr.msk.f32.mxu0 %vm99_vm2, %v5981_v30 }
 0x29d   :  { %v96_v11 = vpop.permute.xlu1 %95 }
 0x29e   :  { %vm100_vm3 = vcmp.eq.s32.totalorder %v6173_v28, %v96_v11 }
 0x29f   :  { %5162 = vmatmul.mubr.msk.f32.gmra.mrb[2].mxu0 %vm100_vm3, %v5981_v30 }
 0x2a0   :  { %v5757_v12 = vpop.eup %5756  ;;  %5186 = vmatprep.mubr.msk.bf16.mxu0 %vm5983_vm4, %v5982_v23 }
 0x2a1   :  { %v262_v13 = vmul.f32 %v5757_v12, %v234_v46 }
 0x2a3   :  { %v272_v17 = vmul.f32 %v6259_v14, %v262_v13 }
 0x2a4   :  { %v5759_v15 = vpop.eup %5758 }
 0x2a5   :  { %v263_v16 = vmul.f32 %v5759_v15, %v235_v50  ;;  %v6269_v20 = vadd.f32 %v6265_v18, %v272_v17 }
 0x2a7   :  { %v273_v19 = vmul.f32 %v6259_v14, %v263_v16 }
 0x2a9   :  { %v6272_v21 = vadd.f32 %v6265_v18, %v273_v19 }
 0x2ab   :  { %v6276_v22 = vpack.c.bf16 %v6272_v21, %v6269_v20 }
 0x2ad   :  { %570 = vmatmul.mubr.bf16.vlgmr.msra.gmra.mrb[0].mxu1 %v6276_v22 }
 0x2ae   :  { %579 = vmatprep.mubr.bf16.mxu1 %v5980_v2  ;;  %5165 = vmatpush3.bf16.msra.mxu1 %v5604_v55 }
 0x2af   :  { %5166 = vmatprep.subr.bf16.mxu1 %v5605_v56 }
 0x2b2   :  { %5167 = vmatpush3.bf16.msra.mxu1 %v5605_v56 }
 0x2b3   :  { %5168 = vmatprep.subr.bf16.mxu1 %v5606_v57 }
 0x2b6   :  { %5169 = vmatpush3.bf16.msra.mxu1 %v5606_v57 }
 0x2b7   :  { %5170 = vmatprep.subr.bf16.mxu1 %v5607_v58 }
 0x2ba   :  { %5171 = vmatpush3.bf16.msra.mxu1 %v5607_v58 }
 0x2bb   :  { %5172 = vmatprep.subr.bf16.mxu1 %v5608_v59 }
 0x2be   :  { %5173 = vmatpush3.bf16.msra.mxu1 %v5608_v59 }
 0x2bf   :  { %5174 = vmatprep.subr.bf16.mxu1 %v5609_v60 }
 0x2c2   :  { %5175 = vmatpush3.bf16.msra.mxu1 %v5609_v60 }
 0x2c3   :  { %5176 = vmatprep.subr.bf16.mxu1 %v5610_v61 }
 0x2c6   :  { %5177 = vmatpush3.bf16.msra.mxu1 %v5610_v61 }
 0x2c7   :  { %5178 = vmatprep.subr.bf16.mxu1 %v5611_v62 }
 0x2ca   :  { %5179 = vmatpush3.bf16.msra.mxu1 %v5611_v62 }
 0x2cb   :  { %5190 = vmatprep.subr.bf16.mxu1 %v5982_v23 }
 0x372   :  { %v5163_v24 = vpop.f32.mrb[2].mxu0 }
 0x373   :  { %v205_v25 = vadd.f32 %v5163_v24, %v6187_v34  ;;  %v199_v26 = vpop.f32.mrb[3].mxu0  ;;  %v6299_v34 = vld [vmem:[%s7561_s9] sm:$0x7] }
 0x374   :  { %v200_v28 = vadd.f32 %v199_v26, %v6182_v32  ;;  %v6303_v32 = vrot.slane %v6299_v34, %v6291_v33  ;;  %v6307_v27 = vrot.slane %v6299_v34, %v6294_v35 }
 0x375   :  { %v218_v29 = vadd.f32 %v6192_v36, %v205_v25 }
 0x376   :  { %v217_v30 = vadd.f32 %v6192_v36, %v200_v28 }
 0x377   :  { %227 = vadd.xlane.f32.xlu0 %v218_v29 }
 0x378   :  { %225 = vadd.xlane.f32.xlu1 %v217_v30 }
 0x380   :  { %v571_v36 = vpop.f32.mrb[0].mxu1 }
 0x381   :  { %v573_v37 = vpop.f32.mrb[1].mxu1  ;;  %v572_v39 = vadd.f32 %v571_v36, %v6303_v32 }
 0x382   :  { %v575_v38 = vpop.f32.mrb[2].mxu1  ;;  %v574_v42 = vadd.f32 %v573_v37, %v6307_v27 }
 0x383   :  { %v576_v40 = vadd.f32 %v575_v38, %v6303_v32  ;;  %v577_v41 = vpop.f32.mrb[3].mxu1 }
 0x384   :  { %v578_v43 = vadd.f32 %v577_v41, %v6307_v27 }
 0x385   :  { %v6313_v44 = vpack.c.bf16 %v576_v40, %v572_v39 }
 0x386   :  { %v6315_v45 = vpack.c.bf16 %v578_v43, %v574_v42 }
 0x388   :  { %v647_v46 = vsel %vm642_vm5, %v6315_v45, 0 }
 0x389   :  { %5185 = vmatpush3.bf16.xpose.msra.mxu0 %v647_v46  ;;  %767 = vrot.lane.b32.xlu1 %v6313_v44, %s5984_s26 }
 0x38a   :  { %5202 = vmatprep.subr.bf16.mxu0 %v5982_v23 }
 0x38d   :  { %896 = vrot.lane.b32.xlu1 %v6315_v45, %s5985_s28 }
 0x390   :  { %5187 = vmatmul.mubr.msk.bf16.vlgmr.msra.gmra.mrb[4].mxu0 %vm642_vm5, %v6313_v44 }
 0x391   :  { %1021 = vrot.lane.b32.xlu1 %v6315_v45, %s5986_s2  ;;  %5204 = vmatprep.mubr.msk.bf16.mxu0 %vm5983_vm4, %v5982_v23 }
 0x404   :  { %v228_v47 = vpop.xlane.xlu0 %227 }
 0x405   :  { %v226_v48 = vpop.xlane.xlu1 %225  ;;  %v233_v49 = vmul.f32 0.0078125, %v228_v47 }
 0x406   :  { %v232_v50 = vmul.f32 0.0078125, %v226_v48 }
 0x407   :  { %v237_v53 = vsub.f32 %v218_v29, %v233_v49 }
 0x408   :  { %v236_v51 = vsub.f32 %v217_v30, %v232_v50  ;;  %v404_v50 = vsub.s32 2, %v6288_v31 }
 0x409   :  { %v241_v54 = vmul.f32 %v237_v53, %v237_v53 }
 0x40a   :  { %v240_v52 = vmul.f32 %v236_v51, %v236_v51  ;;  %v405_v57 = vrot.slane %v6299_v34, %v404_v50 }
 0x40c   :  { %246 = vadd.xlane.f32.xlu0 %v240_v52 }
 0x410   :  { %248 = vadd.xlane.f32.xlu0 %v241_v54 }
 0x463   :  { %v683_v1 = vpop.f32.mrb[4].mxu0 }
 0x464   :  { %v690_v3 = vmul.f32 0.17677669, %v683_v1  ;;  %v5188_v4 = vpop.f32.mrb[5].mxu0 }
 0x465   :  { %v686_v5 = vpop.f32.mrb[6].mxu0 }
 0x466   :  { %v691_v6 = vmul.f32 0.17677669, %v686_v5  ;;  %v5189_v7 = vpop.f32.mrb[7].mxu0  ;;  %v696_v8 = vadd.f32 %v6362_v0, %v690_v3 }
 0x468   :  { %v699_v9 = vsel %vm698_vm6, %v696_v8, -inf  ;;  %v697_v10 = vadd.f32 %v6362_v0, %v691_v6 }
 0x469   :  { %700 = vmax.xlane.f32.xlu0 %v699_v9 }
 0x46a   :  { %v702_v11 = vsel %vm698_vm6, %v697_v10, -inf }
 0x46d   :  { %703 = vmax.xlane.f32.xlu0 %v702_v11 }
 0x499   :  { %v247_v12 = vpop.xlane.xlu0 %246 }
 0x49a   :  { %v252_v13 = vmul.f32 0.0078125, %v247_v12  ;;  %v768_v12 = vpop.permute.xlu1 %767 }
 0x49c   :  { %v256_v15 = vadd.f32 1e-12, %v252_v13 }
 0x49d   :  { %v249_v16 = vpop.xlane.xlu0 %248 }
 0x49e   :  { %5760 = vrsqrt.f32 %v256_v15  ;;  %v253_v17 = vmul.f32 0.0078125, %v249_v16  ;;  %v897_v15 = vpop.permute.xlu1 %896 }
 0x49f   :  { %v902_v16 = vsel %vm642_vm5, %v897_v15, 0 }
 0x4a0   :  { %v257_v19 = vadd.f32 1e-12, %v253_v17 }
 0x4a2   :  { %5762 = vrsqrt.f32 %v257_v19  ;;  %v1022_v17 = vpop.permute.xlu1 %1021 }
 0x4a8   :  { %v5761_v24 = vpop.eup %5760 }
 0x4a9   :  { %v264_v25 = vmul.f32 %v5761_v24, %v236_v51  ;;  %v1027_v24 = vsel %vm642_vm5, %v1022_v17, 0 }
 0x4ab   :  { %v274_v29 = vmul.f32 %v6259_v14, %v264_v25 }
 0x4ac   :  { %v5763_v26 = vpop.eup %5762 }
 0x4ad   :  { %v265_v28 = vmul.f32 %v5763_v26, %v237_v53  ;;  %v6371_v36 = vadd.f32 %v6265_v18, %v274_v29 }
 0x4af   :  { %v275_v30 = vmul.f32 %v6259_v14, %v265_v28 }
 0x4b1   :  { %v6374_v37 = vadd.f32 %v6265_v18, %v275_v30 }
 0x4b3   :  { %v392_v38 = vpack.c.bf16 %v6374_v37, %v6371_v36 }
 0x4b5   :  { %580 = vmatmul.mubr.bf16.gmra.mrb[4].mxu1 %v392_v38 }
 0x4b6   :  { %5180 = vmatprep.mubr.bf16.mxu1 %v6276_v22 }
 0x4bd   :  { %5181 = vmatmul.mubr.bf16.vlgmr.msra.gmra.mrb[8].mxu1 %v392_v38 }
 0x4be   :  { %5192 = vmatprep.mubr.msk.bf16.mxu1 %vm5983_vm4, %v5982_v23 }
 0x4f6   :  { %v701_v39 = vpop.xlane.xlu0 %700 }
 0x4f7   :  { %v705_v40 = vsub.f32 %v696_v8, %v701_v39 }
 0x4f9   :  { %v707_v41 = vmul.f32 1.442695, %v705_v40 }
 0x4fa   :  { %v704_v14 = vpop.xlane.xlu0 %703 }
 0x4fb   :  { %5764 = vpow2.f32 %v707_v41  ;;  %v706_v42 = vsub.f32 %v697_v10, %v704_v14 }
 0x4fd   :  { %v709_v43 = vmul.f32 1.442695, %v706_v42 }
 0x4ff   :  { %5766 = vpow2.f32 %v709_v43 }
 0x505   :  { %v5765_v18 = vpop.eup %5764 }
 0x506   :  { %v711_v46 = vsel %vm698_vm6, %v5765_v18, 0.0 }
 0x507   :  { %712 = vadd.xlane.f32.xlu0 %v711_v46 }
 0x509   :  { %v5767_v47 = vpop.eup %5766 }
 0x50a   :  { %v714_v48 = vsel %vm698_vm6, %v5767_v47, 0.0 }
 0x50b   :  { %715 = vadd.xlane.f32.xlu0 %v714_v48 }
 0x521   :  { %770 = vrot.lane.b32.xlu0 %v6315_v45, %s5984_s26 }
 0x525   :  { %894 = vrot.lane.b32.xlu0 %v6313_v44, %s5985_s28 }
 0x529   :  { %1019 = vrot.lane.b32.xlu0 %v6313_v44, %s5986_s2 }
 0x588   :  { %v581_v22 = vpop.f32.mrb[4].mxu1 }
 0x589   :  { %v583_v49 = vpop.f32.mrb[5].mxu1  ;;  %v582_v52 = vadd.f32 %v581_v22, %v6303_v32 }
 0x58a   :  { %v585_v51 = vpop.f32.mrb[6].mxu1  ;;  %v584_v55 = vadd.f32 %v583_v49, %v6307_v27 }
 0x58b   :  { %v586_v53 = vadd.f32 %v585_v51, %v6303_v32  ;;  %v587_v54 = vpop.f32.mrb[7].mxu1 }
 0x58c   :  { %v588_v45 = vadd.f32 %v587_v54, %v6307_v27 }
 0x58d   :  { %v1176_v56 = vpack.c.bf16 %v586_v53, %v582_v52 }
 0x58e   :  { %v1177_v44 = vpack.c.bf16 %v588_v45, %v584_v55 }
 0x58f   :  { %1302 = vrot.lane.b32.xlu0 %v1176_v56, %s5984_s26 }
 0x590   :  { %v5182_v58 = vpop.f32.mrb[8].mxu1  ;;  %1305 = vrot.lane.b32.xlu1 %v1177_v44, %s5984_s26  ;;  %v1183_v26 = vsel %vm642_vm5, %v1177_v44, 0 }
 0x591   :  { %v633_v59 = vadd.f32 %v5182_v58, %v405_v57  ;;  %v624_v60 = vpop.f32.mrb[9].mxu1 }
 0x592   :  { %v5183_v61 = vpop.f32.mrb[10].mxu1  ;;  %v625_v1 = vadd.f32 %v624_v60, %v405_v57 }
 0x593   :  { %v636_v32 = vadd.f32 %v5183_v61, %v405_v57  ;;  %v627_v62 = vpop.f32.mrb[11].mxu1  ;;  %1429 = vrot.lane.b32.xlu0 %v1176_v56, %s5985_s28 }
 0x594   :  { %v628_v27 = vadd.f32 %v627_v62, %v405_v57  ;;  %1431 = vrot.lane.b32.xlu1 %v1177_v44, %s5985_s28  ;;  %v713_v3 = vpop.xlane.xlu0 %712 }
 0x595   :  { %v6401_v4 = vpack.c.bf16 %v636_v32, %v633_v59  ;;  %5768 = vrcp.f32 %v713_v3 }
 0x596   :  { %v6403_v34 = vpack.c.bf16 %v628_v27, %v625_v1 }
 0x597   :  { %1554 = vrot.lane.b32.xlu0 %v1176_v56, %s5986_s2 }
 0x598   :  { %5191 = vmatpush3.bf16.msra.mxu1 %v6403_v34  ;;  %1556 = vrot.lane.b32.xlu1 %v1177_v44, %s5986_s2  ;;  %v716_v5 = vpop.xlane.xlu0 %715 }
 0x599   :  { %5770 = vrcp.f32 %v716_v5  ;;  %5196 = vmatprep.subr.bf16.mxu1 %v5982_v23 }
 0x59c   :  { %v771_v10 = vpop.permute.xlu0 %770 }
 0x59d   :  { %v776_v13 = vsel %vm642_vm5, %v771_v10, 0 }
 0x59f   :  { %v5769_v6 = vpop.eup %5768 }
 0x5a0   :  { %v719_v8 = vmul.f32 %v5769_v6, %v5765_v18  ;;  %v895_v19 = vpop.permute.xlu0 %894 }
 0x5a3   :  { %v5771_v7 = vpop.eup %5770 }
 0x5a4   :  { %v720_v9 = vmul.f32 %v5771_v7, %v5767_v47  ;;  %v1020_v25 = vpop.permute.xlu0 %1019 }
 0x5a6   :  { %v721_v11 = vpack.c.bf16 %v720_v9, %v719_v8 }
 0x5a8   :  { %5193 = vmatmul.mubr.msk.bf16.vlgmr.msra.gmra.mrb[12].mxu1 %vm698_vm6, %v721_v11 }
 0x5a9   :  { %5197 = vmatpush3.bf16.xpose.msra.mxu1 %v776_v13  ;;  %5198 = vmatprep.mubr.msk.bf16.mxu1 %vm5983_vm4, %v5982_v23  ;;  %v6478_v13 = vrot.slane %v6358_v63, %v6294_v35 }
 0x5aa   :  { %5208 = vmatprep.subr.bf16.mxu1 %v5982_v23 }
 0x5b0   :  { %5199 = vmatmul.mubr.msk.bf16.vlgmr.msra.gmra.mrb[16].mxu1 %vm642_vm5, %v768_v12 }
 0x5b1   :  { %5209 = vmatpush3.bf16.xpose.msra.mxu1 %v902_v16  ;;  %5210 = vmatprep.mubr.msk.bf16.mxu1 %vm5983_vm4, %v5982_v23 }
 0x5b2   :  { %5220 = vmatprep.subr.bf16.mxu1 %v5982_v23 }
 0x5b8   :  { %5211 = vmatmul.mubr.msk.bf16.vlgmr.msra.gmra.mrb[20].mxu1 %vm642_vm5, %v895_v19 }
 0x5b9   :  { %5221 = vmatpush3.bf16.xpose.msra.mxu1 %v1027_v24  ;;  %5222 = vmatprep.mubr.msk.bf16.mxu1 %vm5983_vm4, %v5982_v23 }
 0x5ba   :  { %5232 = vmatprep.subr.bf16.mxu1 %v5982_v23 }
 0x5c0   :  { %5223 = vmatmul.mubr.msk.bf16.vlgmr.msra.gmra.mrb[24].mxu1 %vm642_vm5, %v1020_v25 }
 0x5c1   :  { %5233 = vmatpush3.bf16.xpose.msra.mxu1 %v1183_v26  ;;  %5234 = vmatprep.mubr.msk.bf16.mxu1 %vm5983_vm4, %v5982_v23 }
 0x5c2   :  { %5244 = vmatprep.subr.bf16.mxu1 %v5982_v23 }
 0x5c8   :  { %5235 = vmatmul.mubr.msk.bf16.vlgmr.msra.gmra.mrb[28].mxu1 %vm642_vm5, %v1176_v56 }
 0x5c9   :  { %5246 = vmatprep.mubr.msk.bf16.mxu1 %vm5983_vm4, %v5982_v23 }
 0x601   :  { %v1303_v38 = vpop.permute.xlu0 %1302 }
 0x602   :  { %v1306_v28 = vpop.permute.xlu1 %1305 }
 0x603   :  { %v1311_v29 = vsel %vm642_vm5, %v1306_v28, 0 }
 0x604   :  { %5245 = vmatpush3.bf16.xpose.msra.mxu1 %v1311_v29 }
 0x605   :  { %5256 = vmatprep.subr.bf16.mxu1 %v5982_v23  ;;  %v1430_v41 = vpop.permute.xlu0 %1429 }
 0x606   :  { %v1432_v30 = vpop.permute.xlu1 %1431 }
 0x607   :  { %v1437_v39 = vsel %vm642_vm5, %v1432_v30, 0 }
 0x609   :  { %v1555_v42 = vpop.permute.xlu0 %1554 }
 0x60a   :  { %v1557_v40 = vpop.permute.xlu1 %1556 }
 0x60b   :  { %5247 = vmatmul.mubr.msk.bf16.vlgmr.msra.gmra.mrb[32].mxu1 %vm642_vm5, %v1303_v38  ;;  %v1562_v14 = vsel %vm642_vm5, %v1557_v40, 0 }
 0x60c   :  { %5257 = vmatpush3.bf16.xpose.msra.mxu1 %v1437_v39  ;;  %5258 = vmatprep.mubr.msk.bf16.mxu1 %vm5983_vm4, %v5982_v23 }
 0x60d   :  { %5268 = vmatprep.subr.bf16.mxu1 %v5982_v23 }
 0x613   :  { %5259 = vmatmul.mubr.msk.bf16.vlgmr.msra.gmra.mrb[36].mxu1 %vm642_vm5, %v1430_v41 }
 0x614   :  { %5269 = vmatpush3.bf16.xpose.msra.mxu1 %v1562_v14  ;;  %5270 = vmatprep.mubr.msk.bf16.mxu1 %vm5983_vm4, %v5982_v23 }
 0x61b   :  { %5271 = vmatmul.mubr.msk.bf16.vlgmr.msra.gmra.mrb[40].mxu1 %vm642_vm5, %v1555_v42 }
 0x67b   :  { %v6444_v43 = vpop.f32.mrb[12].mxu1 }
 0x67c   :  { %v5194_v18 = vpop.f32.mrb[13].mxu1 }
 0x67d   :  { %v6446_v46 = vpop.f32.mrb[14].mxu1 }
 0x67e   :  { %v5195_v47 = vpop.f32.mrb[15].mxu1 }
 0x683   :  { %v812_v48 = vpop.f32.mrb[16].mxu1 }
 0x684   :  { %v819_v22 = vmul.f32 0.17677669, %v812_v48  ;;  %v5200_v49 = vpop.f32.mrb[17].mxu1 }
 0x685   :  { %v815_v51 = vpop.f32.mrb[18].mxu1 }
 0x686   :  { %v820_v52 = vmul.f32 0.17677669, %v815_v51  ;;  %v5201_v53 = vpop.f32.mrb[19].mxu1  ;;  %v6449_v54 = vadd.f32 %v819_v22, %v6362_v0 }
 0x688   :  { %v823_v55 = vsel %vm698_vm6, %v6449_v54, -inf  ;;  %v6454_v45 = vadd.f32 %v820_v52, %v6362_v0 }
 0x689   :  { %824 = vmax.xlane.f32.xlu1 %v823_v55 }
 0x68a   :  { %v826_v56 = vsel %vm698_vm6, %v6454_v45, -inf }
 0x68b   :  { %827 = vmax.xlane.f32.xlu0 %v826_v56  ;;  %v938_v57 = vpop.f32.mrb[20].mxu1 }
 0x68c   :  { %v945_v44 = vmul.f32 0.17677669, %v938_v57  ;;  %v5212_v58 = vpop.f32.mrb[21].mxu1 }
 0x68d   :  { %v941_v59 = vpop.f32.mrb[22].mxu1 }
 0x68e   :  { %v946_v60 = vmul.f32 0.17677669, %v941_v59  ;;  %v5213_v61 = vpop.f32.mrb[23].mxu1  ;;  %v6459_v32 = vadd.f32 %v945_v44, %v6362_v0 }
 0x690   :  { %v949_v62 = vsel %vm698_vm6, %v6459_v32, -inf  ;;  %v6464_v1 = vadd.f32 %v946_v60, %v6362_v0 }
 0x691   :  { %950 = vmax.xlane.f32.xlu0 %v949_v62 }
 0x692   :  { %v952_v27 = vsel %vm698_vm6, %v6464_v1, -inf }
 0x693   :  { %953 = vmax.xlane.f32.xlu1 %v952_v27  ;;  %v1063_v3 = vpop.f32.mrb[24].mxu1 }
 0x694   :  { %v1070_v5 = vmul.f32 0.17677669, %v1063_v3  ;;  %v5224_v6 = vpop.f32.mrb[25].mxu1 }
 0x695   :  { %v1066_v7 = vpop.f32.mrb[26].mxu1 }
 0x696   :  { %v1071_v8 = vmul.f32 0.17677669, %v1066_v7  ;;  %v5225_v9 = vpop.f32.mrb[27].mxu1  ;;  %v6469_v10 = vadd.f32 %v1070_v5, %v6362_v0 }
 0x698   :  { %v1074_v11 = vsel %vm698_vm6, %v6469_v10, -inf  ;;  %v6474_v12 = vadd.f32 %v1071_v8, %v6362_v0 }
 0x699   :  { %1075 = vmax.xlane.f32.xlu0 %v1074_v11 }
 0x69a   :  { %v1077_v15 = vsel %vm698_vm6, %v6474_v12, -inf }
 0x69b   :  { %1078 = vmax.xlane.f32.xlu1 %v1077_v15  ;;  %v1219_v16 = vpop.f32.mrb[28].mxu1 }
 0x69c   :  { %v1226_v17 = vmul.f32 0.17677669, %v1219_v16  ;;  %v5236_v19 = vpop.f32.mrb[29].mxu1 }
 0x69d   :  { %v1222_v24 = vpop.f32.mrb[30].mxu1 }
 0x69e   :  { %v1227_v25 = vmul.f32 0.17677669, %v1222_v24  ;;  %v5237_v26 = vpop.f32.mrb[31].mxu1  ;;  %v6483_v28 = vadd.f32 %v6478_v13, %v1226_v17 }
 0x6a0   :  { %v1234_v29 = vsel %vm698_vm6, %v6483_v28, -inf  ;;  %v6488_v30 = vadd.f32 %v6478_v13, %v1227_v25 }
 0x6a1   :  { %1235 = vmax.xlane.f32.xlu0 %v1234_v29 }
 0x6a2   :  { %v1237_v63 = vsel %vm698_vm6, %v6488_v30, -inf }
 0x6a3   :  { %1238 = vmax.xlane.f32.xlu1 %v1237_v63 }
 0x6de   :  { %v1347_v38 = vpop.f32.mrb[32].mxu1 }
 0x6df   :  { %v1354_v39 = vmul.f32 0.17677669, %v1347_v38  ;;  %v5248_v40 = vpop.f32.mrb[33].mxu1 }
 0x6e0   :  { %v1350_v41 = vpop.f32.mrb[34].mxu1 }
 0x6e1   :  { %v1355_v14 = vmul.f32 0.17677669, %v1350_v41  ;;  %v5249_v42 = vpop.f32.mrb[35].mxu1  ;;  %v6493_v18 = vadd.f32 %v1354_v39, %v6478_v13 }
 0x6e3   :  { %v1358_v47 = vsel %vm698_vm6, %v6493_v18, -inf  ;;  %v6498_v48 = vadd.f32 %v1355_v14, %v6478_v13 }
 0x6e4   :  { %1359 = vmax.xlane.f32.xlu0 %v1358_v47 }
 0x6e5   :  { %v1361_v22 = vsel %vm698_vm6, %v6498_v48, -inf }
 0x6e6   :  { %1362 = vmax.xlane.f32.xlu1 %v1361_v22  ;;  %v1473_v49 = vpop.f32.mrb[36].mxu1 }
 0x6e7   :  { %v1480_v51 = vmul.f32 0.17677669, %v1473_v49  ;;  %v5260_v52 = vpop.f32.mrb[37].mxu1 }
 0x6e8   :  { %v1476_v53 = vpop.f32.mrb[38].mxu1 }
 0x6e9   :  { %v1481_v55 = vmul.f32 0.17677669, %v1476_v53  ;;  %v5261_v56 = vpop.f32.mrb[39].mxu1  ;;  %v6503_v57 = vadd.f32 %v1480_v51, %v6478_v13 }
 0x6eb   :  { %v1484_v44 = vsel %vm698_vm6, %v6503_v57, -inf  ;;  %v6508_v58 = vadd.f32 %v1481_v55, %v6478_v13 }
 0x6ec   :  { %1485 = vmax.xlane.f32.xlu0 %v1484_v44 }
 0x6ed   :  { %v1487_v59 = vsel %vm698_vm6, %v6508_v58, -inf }
 0x6ee   :  { %1488 = vmax.xlane.f32.xlu1 %v1487_v59  ;;  %v1598_v60 = vpop.f32.mrb[40].mxu1 }
 0x6ef   :  { %v1605_v61 = vmul.f32 0.17677669, %v1598_v60  ;;  %v5272_v62 = vpop.f32.mrb[41].mxu1 }
 0x6f0   :  { %v1601_v27 = vpop.f32.mrb[42].mxu1 }
 0x6f1   :  { %v1606_v3 = vmul.f32 0.17677669, %v1601_v27  ;;  %v5273_v5 = vpop.f32.mrb[43].mxu1  ;;  %v6513_v6 = vadd.f32 %v1605_v61, %v6478_v13 }
 0x6f3   :  { %v1609_v7 = vsel %vm698_vm6, %v6513_v6, -inf  ;;  %v6518_v8 = vadd.f32 %v1606_v3, %v6478_v13 }
 0x6f4   :  { %1610 = vmax.xlane.f32.xlu0 %v1609_v7 }
 0x6f5   :  { %v1612_v9 = vsel %vm698_vm6, %v6518_v8, -inf }
 0x6f6   :  { %1613 = vmax.xlane.f32.xlu1 %v1612_v9 }
 0x707   :  { %972 = vrot.lane.b32.xlu1 %v6403_v34, %s5985_s28 }
 0x70a   :  { %847 = vrot.lane.b32.xlu0 %v6403_v34, %s5984_s26 }
 0x716   :  { %v825_v11 = vpop.xlane.xlu1 %824 }
 0x717   :  { %v829_v15 = vsub.f32 %v6449_v54, %v825_v11 }
 0x718   :  { %v828_v16 = vpop.xlane.xlu0 %827 }
 0x719   :  { %v831_v17 = vmul.f32 1.442695, %v829_v15  ;;  %v830_v19 = vsub.f32 %v6454_v45, %v828_v16 }
 0x71b   :  { %5772 = vpow2.f32 %v831_v17  ;;  %v833_v24 = vmul.f32 1.442695, %v830_v19 }
 0x71d   :  { %5774 = vpow2.f32 %v833_v24 }
 0x71e   :  { %v951_v25 = vpop.xlane.xlu0 %950 }
 0x71f   :  { %v955_v26 = vsub.f32 %v6459_v32, %v951_v25 }
 0x720   :  { %v954_v29 = vpop.xlane.xlu1 %953 }
 0x721   :  { %v957_v63 = vmul.f32 1.442695, %v955_v26  ;;  %v956_v38 = vsub.f32 %v6464_v1, %v954_v29 }
 0x723   :  { %5776 = vpow2.f32 %v957_v63  ;;  %v959_v39 = vmul.f32 1.442695, %v956_v38 }
 0x725   :  { %v6530_v40 = vpop.eup %5772  ;;  %5778 = vpow2.f32 %v959_v39 }
 0x726   :  { %v1076_v54 = vpop.xlane.xlu0 %1075  ;;  %v835_v42 = vsel %vm698_vm6, %v6530_v40, 0.0 }
 0x727   :  { %v6532_v41 = vpop.eup %5774  ;;  %v1080_v45 = vsub.f32 %v6469_v10, %v1076_v54 }
 0x728   :  { %v1079_v14 = vpop.xlane.xlu1 %1078  ;;  %v838_v1 = vsel %vm698_vm6, %v6532_v41, 0.0 }
 0x729   :  { %v1082_v47 = vmul.f32 1.442695, %v1080_v45  ;;  %v1081_v32 = vsub.f32 %v6474_v12, %v1079_v14  ;;  %836 = vadd.xlane.f32.xlu0 %v835_v42 }
 0x72b   :  { %5780 = vpow2.f32 %v1082_v47  ;;  %v1084_v22 = vmul.f32 1.442695, %v1081_v32  ;;  %839 = vadd.xlane.f32.xlu1 %v838_v1 }
 0x72d   :  { %v6540_v49 = vpop.eup %5776  ;;  %5782 = vpow2.f32 %v1084_v22 }
 0x72e   :  { %v1236_v51 = vpop.xlane.xlu0 %1235  ;;  %v961_v10 = vsel %vm698_vm6, %v6540_v49, 0.0 }
 0x72f   :  { %v6544_v52 = vpop.eup %5778  ;;  %v1240_v53 = vsub.f32 %v6483_v28, %v1236_v51  ;;  %962 = vadd.xlane.f32.xlu0 %v961_v10 }
 0x730   :  { %v1239_v12 = vpop.xlane.xlu1 %1238  ;;  %v964_v55 = vsel %vm698_vm6, %v6544_v52, 0.0 }
 0x731   :  { %v1242_v56 = vmul.f32 1.442695, %v1240_v53  ;;  %v1241_v44 = vsub.f32 %v6488_v30, %v1239_v12  ;;  %965 = vadd.xlane.f32.xlu1 %v964_v55 }
 0x733   :  { %5784 = vpow2.f32 %v1242_v56  ;;  %v1244_v59 = vmul.f32 1.442695, %v1241_v44 }
 0x735   :  { %v6550_v60 = vpop.eup %5780  ;;  %5786 = vpow2.f32 %v1244_v59 }
 0x736   :  { %v1086_v61 = vsel %vm698_vm6, %v6550_v60, 0.0 }
 0x737   :  { %v6554_v62 = vpop.eup %5782  ;;  %1087 = vadd.xlane.f32.xlu0 %v1086_v61 }
 0x738   :  { %v1089_v28 = vsel %vm698_vm6, %v6554_v62, 0.0 }
 0x739   :  { %1090 = vadd.xlane.f32.xlu1 %v1089_v28 }
 0x73d   :  { %v6558_v27 = vpop.eup %5784 }
 0x73e   :  { %v1246_v30 = vsel %vm698_vm6, %v6558_v27, 0.0 }
 0x73f   :  { %v6562_v3 = vpop.eup %5786  ;;  %1247 = vadd.xlane.f32.xlu0 %v1246_v30 }
 0x740   :  { %v1249_v5 = vsel %vm698_vm6, %v6562_v3, 0.0 }
 0x741   :  { %1250 = vadd.xlane.f32.xlu1 %v1249_v5 }
 0x755   :  { %1097 = vrot.lane.b32.xlu0 %v6403_v34, %s5986_s2 }
 0x771   :  { %v1360_v7 = vpop.xlane.xlu0 %1359 }
 0x772   :  { %v1364_v9 = vsub.f32 %v6493_v18, %v1360_v7 }
 0x773   :  { %v1363_v11 = vpop.xlane.xlu1 %1362 }
 0x774   :  { %v1366_v15 = vmul.f32 1.442695, %v1364_v9  ;;  %v1365_v16 = vsub.f32 %v6498_v48, %v1363_v11 }
 0x776   :  { %5788 = vpow2.f32 %v1366_v15  ;;  %v1368_v17 = vmul.f32 1.442695, %v1365_v16 }
 0x778   :  { %5790 = vpow2.f32 %v1368_v17 }
 0x779   :  { %v1486_v19 = vpop.xlane.xlu0 %1485 }
 0x77a   :  { %v1490_v24 = vsub.f32 %v6503_v57, %v1486_v19 }
 0x77b   :  { %v1489_v25 = vpop.xlane.xlu1 %1488 }
 0x77c   :  { %v1492_v26 = vmul.f32 1.442695, %v1490_v24  ;;  %v1491_v29 = vsub.f32 %v6508_v58, %v1489_v25 }
 0x77e   :  { %5792 = vpow2.f32 %v1492_v26  ;;  %v1494_v63 = vmul.f32 1.442695, %v1491_v29 }
 0x780   :  { %v6572_v34 = vpop.eup %5788  ;;  %5794 = vpow2.f32 %v1494_v63 }
 0x781   :  { %v1611_v18 = vpop.xlane.xlu0 %1610  ;;  %v1370_v38 = vsel %vm698_vm6, %v6572_v34, 0.0 }
 0x782   :  { %v6576_v48 = vpop.eup %5790  ;;  %v1615_v39 = vsub.f32 %v6513_v6, %v1611_v18  ;;  %1371 = vadd.xlane.f32.xlu1 %v1370_v38 }
 0x783   :  { %v1614_v54 = vpop.xlane.xlu1 %1613  ;;  %v1373_v58 = vsel %vm698_vm6, %v6576_v48, 0.0 }
 0x784   :  { %v1617_v57 = vmul.f32 1.442695, %v1615_v39  ;;  %v1616_v45 = vsub.f32 %v6518_v8, %v1614_v54 }
 0x785   :  { %v848_v14 = vpop.permute.xlu0 %847 }
 0x786   :  { %5796 = vpow2.f32 %v1617_v57  ;;  %v1619_v42 = vmul.f32 1.442695, %v1616_v45  ;;  %5203 = vmatpush3.bf16.msra.mxu0 %v848_v14  ;;  %1374 = vadd.xlane.f32.xlu1 %v1373_v58 }
 0x787   :  { %5214 = vmatprep.subr.bf16.mxu0 %v5982_v23  ;;  %v973_v53 = vpop.permute.xlu1 %972 }
 0x788   :  { %v6583_v47 = vpop.eup %5792  ;;  %5798 = vpow2.f32 %v1619_v42 }
 0x789   :  { %v1496_v6 = vsel %vm698_vm6, %v6583_v47, 0.0 }
 0x78a   :  { %v6587_v32 = vpop.eup %5794  ;;  %1497 = vadd.xlane.f32.xlu0 %v1496_v6 }
 0x78b   :  { %v1499_v8 = vsel %vm698_vm6, %v6587_v32, 0.0 }
 0x78c   :  { %1500 = vadd.xlane.f32.xlu1 %v1499_v8 }
 0x790   :  { %v6591_v1 = vpop.eup %5796 }
 0x791   :  { %v1621_v22 = vsel %vm698_vm6, %v6591_v1, 0.0 }
 0x792   :  { %v6595_v51 = vpop.eup %5798  ;;  %1622 = vadd.xlane.f32.xlu1 %v1621_v22 }
 0x793   :  { %v1624_v10 = vsel %vm698_vm6, %v6595_v51, 0.0 }
 0x796   :  { %1625 = vadd.xlane.f32.xlu1 %v1624_v10 }
 0x7a0   :  { %1507 = vrot.lane.b32.xlu0 %v6401_v4, %s5985_s28 }
 0x7a4   :  { %1632 = vrot.lane.b32.xlu0 %v6401_v4, %s5986_s2 }
 0x7a7   :  { %1382 = vrot.lane.b32.xlu1 %v6401_v4, %s5984_s26 }
 0x7b6   :  { %v837_v12 = vpop.xlane.xlu0 %836 }
 0x7b7   :  { %5800 = vrcp.f32 %v837_v12 }
 0x7b8   :  { %v840_v55 = vpop.xlane.xlu1 %839 }
 0x7b9   :  { %5802 = vrcp.f32 %v840_v55 }
 0x7bc   :  { %v963_v56 = vpop.xlane.xlu0 %962 }
 0x7bd   :  { %5804 = vrcp.f32 %v963_v56 }
 0x7be   :  { %v966_v44 = vpop.xlane.xlu1 %965 }
 0x7bf   :  { %5806 = vrcp.f32 %v966_v44 }
 0x7c1   :  { %v5801_v59 = vpop.eup %5800 }
 0x7c2   :  { %v843_v28 = vmul.f32 %v5801_v59, %v6530_v40 }
 0x7c3   :  { %v5803_v61 = vpop.eup %5802 }
 0x7c4   :  { %v844_v30 = vmul.f32 %v5803_v61, %v6532_v41  ;;  %v1088_v5 = vpop.xlane.xlu0 %1087 }
 0x7c5   :  { %5808 = vrcp.f32 %v1088_v5 }
 0x7c6   :  { %v1091_v7 = vpop.xlane.xlu1 %1090  ;;  %v845_v9 = vpack.c.bf16 %v844_v30, %v843_v28 }
 0x7c7   :  { %5810 = vrcp.f32 %v1091_v7  ;;  %v5805_v11 = vpop.eup %5804 }
 0x7c8   :  { %5205 = vmatmul.mubr.msk.bf16.vlgmr.msra.gmra.mrb[8].mxu0 %vm698_vm6, %v845_v9  ;;  %v969_v40 = vmul.f32 %v5805_v11, %v6540_v49 }
 0x7c9   :  { %v5807_v15 = vpop.eup %5806  ;;  %5215 = vmatpush3.bf16.msra.mxu0 %v973_v53  ;;  %5216 = vmatprep.mubr.msk.bf16.mxu0 %vm5983_vm4, %v5982_v23 }
 0x7ca   :  { %v970_v16 = vmul.f32 %v5807_v15, %v6544_v52  ;;  %5226 = vmatprep.subr.bf16.mxu0 %v5982_v23 }
 0x7cc   :  { %v1248_v41 = vpop.xlane.xlu0 %1247  ;;  %v971_v19 = vpack.c.bf16 %v970_v16, %v969_v40 }
 0x7cd   :  { %5812 = vrcp.f32 %v1248_v41 }
 0x7ce   :  { %v1251_v17 = vpop.xlane.xlu1 %1250 }
 0x7cf   :  { %5814 = vrcp.f32 %v1251_v17  ;;  %v5809_v24 = vpop.eup %5808 }
 0x7d0   :  { %v1098_v25 = vpop.permute.xlu0 %1097  ;;  %5217 = vmatmul.mubr.msk.bf16.vlgmr.msra.gmra.mrb[12].mxu0 %vm698_vm6, %v971_v19  ;;  %v1094_v49 = vmul.f32 %v5809_v24, %v6550_v60  ;;  %v5614_v19 = vld [vmem:[%s7562_s10 + $0x10] sm:$0xff]  }
 0x7d1   :  { %v5811_v26 = vpop.eup %5810  ;;  %5227 = vmatpush3.bf16.msra.mxu0 %v1098_v25  ;;  %5228 = vmatprep.mubr.msk.bf16.mxu0 %vm5983_vm4, %v5982_v23 }
 0x7d2   :  { %v1095_v52 = vmul.f32 %v5811_v26, %v6554_v62  ;;  %5238 = vmatprep.subr.bf16.mxu0 %v5982_v23 }
 0x7d4   :  { %v1096_v29 = vpack.c.bf16 %v1095_v52, %v1094_v49 }
 0x7d7   :  { %v5813_v63 = vpop.eup %5812 }
 0x7d8   :  { %5229 = vmatmul.mubr.msk.bf16.vlgmr.msra.gmra.mrb[16].mxu0 %vm698_vm6, %v1096_v29  ;;  %v1254_v62 = vmul.f32 %v5813_v63, %v6558_v27 }
 0x7d9   :  { %v5815_v18 = vpop.eup %5814  ;;  %5239 = vmatpush3.bf16.msra.mxu0 %v6401_v4  ;;  %5240 = vmatprep.mubr.msk.bf16.mxu0 %vm5983_vm4, %v5982_v23 }
 0x7da   :  { %v1255_v38 = vmul.f32 %v5815_v18, %v6562_v3  ;;  %5250 = vmatprep.subr.bf16.mxu0 %v5982_v23  ;;  %v5615_v18 = vld [vmem:[%s7562_s10 + $0x18] sm:$0xff]  }
 0x7dc   :  { %v1256_v39 = vpack.c.bf16 %v1255_v38, %v1254_v62  ;;  %v5616_v38 = vld [vmem:[%s7562_s10 + $0x20] sm:$0xff]  }
 0x7e0   :  { %5241 = vmatmul.mubr.msk.bf16.vlgmr.msra.gmra.mrb[20].mxu0 %vm698_vm6, %v1256_v39  ;;  %v5617_v39 = vld [vmem:[%s7562_s10 + $0x28] sm:$0xff]  }
 0x7e1   :  { %5252 = vmatprep.mubr.msk.bf16.mxu0 %vm5983_vm4, %v5982_v23 }
 0x80f   :  { %v1372_v60 = vpop.xlane.xlu1 %1371 }
 0x813   :  { %v1375_v54 = vpop.xlane.xlu1 %1374 }
 0x814   :  { %5816 = vrcp.f32 %v1375_v54 }
 0x815   :  { %5818 = vrcp.f32 %v1372_v60 }
 0x817   :  { %v1498_v57 = vpop.xlane.xlu0 %1497 }
 0x819   :  { %v1501_v4 = vpop.xlane.xlu1 %1500 }
 0x81a   :  { %5820 = vrcp.f32 %v1501_v4  ;;  %v5618_v4 = vld [vmem:[%s7562_s10 + $0x30] sm:$0xff]  }
 0x81b   :  { %5822 = vrcp.f32 %v1498_v57  ;;  %v1508_v10 = vpop.permute.xlu0 %1507 }
 0x81e   :  { %v5817_v14 = vpop.eup %5816 }
 0x81f   :  { %v1623_v45 = vpop.xlane.xlu1 %1622  ;;  %v5819_v58 = vpop.eup %5818  ;;  %v1379_v27 = vmul.f32 %v5817_v14, %v6576_v48 }
 0x820   :  { %v1378_v42 = vmul.f32 %v5819_v58, %v6572_v34  ;;  %v1633_v56 = vpop.permute.xlu0 %1632 }
 0x822   :  { %v1380_v8 = vpack.c.bf16 %v1379_v27, %v1378_v42 }
 0x823   :  { %v1626_v3 = vpop.xlane.xlu1 %1625 }
 0x824   :  { %5824 = vrcp.f32 %v1626_v3  ;;  %v5821_v22 = vpop.eup %5820  ;;  %v5619_v3 = vld [vmem:[%s7562_s10 + $0x38] sm:$0xff]  }
 0x825   :  { %5826 = vrcp.f32 %v1623_v45  ;;  %v5823_v53 = vpop.eup %5822  ;;  %v1505_v48 = vmul.f32 %v5821_v22, %v6587_v32 }
 0x826   :  { %v1504_v34 = vmul.f32 %v5823_v53, %v6583_v47 }
 0x827   :  { %v1383_v6 = vpop.permute.xlu1 %1382 }
 0x828   :  { %5251 = vmatpush3.bf16.msra.mxu0 %v1383_v6  ;;  %v1506_v12 = vpack.c.bf16 %v1505_v48, %v1504_v34 }
 0x829   :  { %5262 = vmatprep.subr.bf16.mxu0 %v5982_v23 }
 0x82b   :  { %5253 = vmatmul.mubr.msk.bf16.vlgmr.msra.gmra.mrb[24].mxu0 %vm698_vm6, %v1380_v8 }
 0x82c   :  { %5263 = vmatpush3.bf16.msra.mxu0 %v1508_v10  ;;  %5264 = vmatprep.mubr.msk.bf16.mxu0 %vm5983_vm4, %v5982_v23 }
 0x82d   :  { %5274 = vmatprep.subr.bf16.mxu0 %v5982_v23 }
 0x82e   :  { %v5825_v55 = vpop.eup %5824 }
 0x82f   :  { %v5827_v44 = vpop.eup %5826  ;;  %v1630_v59 = vmul.f32 %v5825_v55, %v6595_v51  ;;  %v5613_v51 = vld [vmem:[%s7562_s10 + $0x8] sm:$0xff]  }
 0x830   :  { %v1629_v61 = vmul.f32 %v5827_v44, %v6591_v1  ;;  %v5612_v1 = vld [vmem:[%s7562_s10] sm:$0xff]  }
 0x831   :  { %5280 = vmatprep.subr.bf16.mxu1 %v5612_v1 }
 0x832   :  { %v1631_v28 = vpack.c.bf16 %v1630_v59, %v1629_v61  ;;  %5281 = vmatpush3.bf16.msra.mxu1 %v5612_v1 }
 0x833   :  { %5265 = vmatmul.mubr.msk.bf16.vlgmr.msra.gmra.mrb[28].mxu0 %vm698_vm6, %v1506_v12  ;;  %5282 = vmatprep.subr.bf16.mxu1 %v5613_v51 }
 0x834   :  { %5275 = vmatpush3.bf16.msra.mxu0 %v1633_v56  ;;  %5276 = vmatprep.mubr.msk.bf16.mxu0 %vm5983_vm4, %v5982_v23 }
 0x836   :  { %5283 = vmatpush3.bf16.msra.mxu1 %v5613_v51 }
 0x837   :  { %5284 = vmatprep.subr.bf16.mxu1 %v5614_v19 }
 0x83a   :  { %5285 = vmatpush3.bf16.msra.mxu1 %v5614_v19 }
 0x83b   :  { %5277 = vmatmul.mubr.msk.bf16.vlgmr.msra.gmra.mrb[32].mxu0 %vm698_vm6, %v1631_v28  ;;  %5286 = vmatprep.subr.bf16.mxu1 %v5615_v18 }
 0x83c   :  { %2007 = vmatprep.mubr.bf16.mxu0 %v5980_v2 }
 0x83e   :  { %5287 = vmatpush3.bf16.msra.mxu1 %v5615_v18 }
 0x83f   :  { %5288 = vmatprep.subr.bf16.mxu1 %v5616_v38 }
 0x842   :  { %5289 = vmatpush3.bf16.msra.mxu1 %v5616_v38 }
 0x843   :  { %5290 = vmatprep.subr.bf16.mxu1 %v5617_v39 }
 0x846   :  { %5291 = vmatpush3.bf16.msra.mxu1 %v5617_v39 }
 0x847   :  { %5292 = vmatprep.subr.bf16.mxu1 %v5618_v4 }
 0x84a   :  { %5293 = vmatpush3.bf16.msra.mxu1 %v5618_v4 }
 0x84b   :  { %5294 = vmatprep.subr.bf16.mxu1 %v5619_v3 }
 0x84e   :  { %5295 = vmatpush3.bf16.msra.mxu1 %v5619_v3 }
 0x89b   :  { %v887_v47 = vpop.f32.mrb[8].mxu0 }
 0x89c   :  { %v5206_v32 = vpop.f32.mrb[9].mxu0 }
 0x89d   :  { %v890_v30 = vpop.f32.mrb[10].mxu0 }
 0x89e   :  { %v5520_v5 = vpack.i.bf16 %v890_v30, %v887_v47  ;;  %v5207_v7 = vpop.f32.mrb[11].mxu0 }
 0x8a0   :  { %5521 = vrot.lane.b32.xlu0 %v5520_v5, %s5986_s2 }
 0x8a3   :  { %v1012_v9 = vpop.f32.mrb[12].mxu0 }
 0x8a4   :  { %v5218_v11 = vpop.f32.mrb[13].mxu0 }
 0x8a5   :  { %v1015_v15 = vpop.f32.mrb[14].mxu0 }
 0x8a6   :  { %v5525_v16 = vpack.i.bf16 %v1015_v15, %v1012_v9  ;;  %v5219_v40 = vpop.f32.mrb[15].mxu0 }
 0x8a8   :  { %5526 = vrot.lane.b32.xlu0 %v5525_v16, %s5985_s28 }
 0x8ab   :  { %v1137_v41 = vpop.f32.mrb[16].mxu0 }
 0x8ac   :  { %v5230_v17 = vpop.f32.mrb[17].mxu0 }
 0x8ad   :  { %v1140_v24 = vpop.f32.mrb[18].mxu0 }
 0x8ae   :  { %v5530_v25 = vpack.i.bf16 %v1140_v24, %v1137_v41  ;;  %v5231_v26 = vpop.f32.mrb[19].mxu0 }
 0x8b0   :  { %5531 = vrot.lane.b32.xlu0 %v5530_v25, %s5984_s26 }
 0x8b3   :  { %v6657_v52 = vpop.f32.mrb[20].mxu0 }
 0x8b4   :  { %v5242_v49 = vpop.f32.mrb[21].mxu0 }
 0x8b5   :  { %v1297_v29 = vpop.f32.mrb[22].mxu0 }
 0x8b6   :  { %v5243_v63 = vpop.f32.mrb[23].mxu0 }
 0x8fe   :  { %v1422_v62 = vpop.f32.mrb[24].mxu0 }
 0x8ff   :  { %v5254_v60 = vpop.f32.mrb[25].mxu0 }
 0x900   :  { %v1425_v54 = vpop.f32.mrb[26].mxu0 }
 0x901   :  { %v5535_v57 = vpack.i.bf16 %v1425_v54, %v1422_v62  ;;  %v5255_v45 = vpop.f32.mrb[27].mxu0  ;;  %v4673_v62 = vld [vmem:[%s7563_s11] ss:$0 sm:$0xff] }
 0x903   :  { %5536 = vrot.lane.b32.xlu1 %v5535_v57, %s5986_s2 }
 0x906   :  { %v1547_v14 = vpop.f32.mrb[28].mxu0 }
 0x907   :  { %v5266_v58 = vpop.f32.mrb[29].mxu0 }
 0x908   :  { %v1550_v27 = vpop.f32.mrb[30].mxu0  ;;  %v5620_v58 = vld [vmem:[%s7566_s14] ss:$8 sps:$4 sm:$0xff]  }
 0x909   :  { %v5540_v42 = vpack.i.bf16 %v1550_v27, %v1547_v14  ;;  %v5267_v6 = vpop.f32.mrb[31].mxu0  ;;  %v5622_v27 = vld [vmem:[%s7566_s14 + $0x4] ss:$8 sps:$4 sm:$0xff]  }
 0x90a   :  { %1975 = vmatprep.subr.bf16.mxu0 %v5622_v27  ;;  %v5650_v27 = vld [vmem:[%s7568_s16 + $0x58] sm:$0xff]  }
 0x90b   :  { %5541 = vrot.lane.b32.xlu1 %v5540_v42, %s5985_s28  ;;  %v5625_v42 = vld [vmem:[%s7566_s14 + $0x14] ss:$8 sps:$4 sm:$0xff]   ;;  %1976 = vmatpush1.bf16.msra.mxu0 %v5620_v58 }
 0x90c   :  { %1977 = vmatprep.subr.bf16.mxu0 %v5625_v42  ;;  %v5649_v58 = vld [vmem:[%s7568_s16 + $0x10] sm:$0xff]   ;;  %v5651_v42 = vld [vmem:[%s7568_s16 + $0x18] sm:$0xff]  }
 0x90e   :  { %v1672_v8 = vpop.f32.mrb[32].mxu0 }
 0x90f   :  { %v5278_v22 = vpop.f32.mrb[33].mxu0 }
 0x910   :  { %v1675_v10 = vpop.f32.mrb[34].mxu0 }
 0x911   :  { %v5545_v53 = vpack.i.bf16 %v1675_v10, %v1672_v8  ;;  %v5279_v48 = vpop.f32.mrb[35].mxu0 }
 0x912   :  { %v5522_v34 = vpop.permute.xlu0 %5521 }
 0x913   :  { %5546 = vrot.lane.b32.xlu0 %v5545_v53, %s5984_s26  ;;  %v5524_v55 = vunpack.i.h.bf16 %v5522_v34  ;;  %v5523_v56 = vunpack.i.l.bf16 %v5522_v34 }
 0x915   :  { %v1169_v28 = vsel %vm642_vm5, %v6446_v46, %v5524_v55  ;;  %v1168_v47 = vsel %vm642_vm5, %v6444_v43, %v5523_v56  ;;  %v5628_v56 = vld [vmem:[%s7566_s14 + $0x24] ss:$8 sps:$4 sm:$0xff]  }
 0x91a   :  { %v5527_v12 = vpop.permute.xlu0 %5526 }
 0x91b   :  { %v5529_v44 = vunpack.i.h.bf16 %v5527_v12  ;;  %v5528_v59 = vunpack.i.l.bf16 %v5527_v12 }
 0x91d   :  { %v1172_v5 = vsel %vm1170_vm7, %v1169_v28, %v5529_v44  ;;  %v1171_v7 = vsel %vm1170_vm7, %v1168_v47, %v5528_v59  ;;  %v5626_v44 = vld [vmem:[%s7566_s14 + $0x20] ss:$8 sps:$4 sm:$0xff]   ;;  %v5631_v59 = vld [vmem:[%s7566_s14 + $0x34] ss:$8 sps:$4 sm:$0xff]   ;;  %v5635_v47 = vld [vmem:[%s7566_s14 + $0x50] ss:$8 sps:$4 sm:$0xff]  }
 0x91e   :  { %v5637_v28 = vld [vmem:[%s7566_s14 + $0x54] ss:$8 sps:$4 sm:$0xff]  }
 0x922   :  { %v5532_v61 = vpop.permute.xlu0 %5531 }
 0x923   :  { %v5534_v32 = vunpack.i.h.bf16 %v5532_v61  ;;  %v5533_v30 = vunpack.i.l.bf16 %v5532_v61  ;;  %v5632_v61 = vld [vmem:[%s7566_s14 + $0x40] ss:$8 sps:$4 sm:$0xff]  }
 0x925   :  { %v1174_v9 = vsel %vm1173_vm8, %v1171_v7, %v5533_v30  ;;  %v1175_v11 = vsel %vm1173_vm8, %v1172_v5, %v5534_v32  ;;  %v5640_v32 = vld [vmem:[%s7566_s14 + $0x64] ss:$8 sps:$4 sm:$0xff]   ;;  %v5638_v30 = vld [vmem:[%s7566_s14 + $0x60] ss:$8 sps:$4 sm:$0xff]   ;;  %v5643_v5 = vld [vmem:[%s7566_s14 + $0x74] ss:$8 sps:$4 sm:$0xff]  }
 0x926   :  { %v1709_v15 = vpack.c.bf16 %v1175_v11, %v1174_v9  ;;  %v5641_v7 = vld [vmem:[%s7566_s14 + $0x70] ss:$8 sps:$4 sm:$0xff]  }
 0x928   :  { %5296 = vmatprep.mubr.bf16.mxu1 %v1709_v15 }
 0x975   :  { %v5537_v16 = vpop.permute.xlu1 %5536 }
 0x976   :  { %v5539_v1 = vunpack.i.h.bf16 %v5537_v16  ;;  %v5538_v51 = vunpack.i.l.bf16 %v5537_v16 }
 0x978   :  { %v1704_v43 = vsel %vm642_vm5, %v1297_v29, %v5539_v1  ;;  %v1703_v19 = vsel %vm642_vm5, %v6657_v52, %v5538_v51 }
 0x97d   :  { %v5542_v40 = vpop.permute.xlu1 %5541 }
 0x97e   :  { %v5544_v46 = vunpack.i.h.bf16 %v5542_v40  ;;  %v5543_v41 = vunpack.i.l.bf16 %v5542_v40 }
 0x980   :  { %v1706_v26 = vsel %vm1170_vm7, %v1704_v43, %v5544_v46  ;;  %v1705_v49 = vsel %vm1170_vm7, %v1703_v19, %v5543_v41 }
 0x985   :  { %v5547_v17 = vpop.permute.xlu0 %5546 }
 0x986   :  { %v5549_v24 = vunpack.i.h.bf16 %v5547_v17  ;;  %v5548_v25 = vunpack.i.l.bf16 %v5547_v17 }
 0x988   :  { %v1708_v63 = vsel %vm1173_vm8, %v1706_v26, %v5549_v24  ;;  %v1707_v18 = vsel %vm1173_vm8, %v1705_v49, %v5548_v25  ;;  %v4682_v49 = vld [vmem:[%s7564_s12] ss:$0 sm:$0xff] }
 0x989   :  { %v1710_v38 = vpack.c.bf16 %v1708_v63, %v1707_v18 }
 0x98b   :  { %5297 = vmatmul.mubr.bf16.vlgmr.msra.gmra.mrb[44].mxu1 %v1710_v38 }
 0xa5e   :  { %v5298_v29 = vpop.f32.mrb[44].mxu1 }
 0xa5f   :  { %v1808_v39 = vadd.f32 %v5298_v29, %v4673_v62  ;;  %v1799_v60 = vpop.f32.mrb[45].mxu1  ;;  %v4683_v29 = vld [vmem:[%s7565_s13] ss:$0 sm:$0xff] }
 0xa60   :  { %v1800_v52 = vadd.f32 %v4673_v62, %v1799_v60  ;;  %v5299_v54 = vpop.f32.mrb[46].mxu1 }
 0xa61   :  { %v1811_v4 = vadd.f32 %v5299_v54, %v4673_v62  ;;  %v1802_v57 = vpop.f32.mrb[47].mxu1  ;;  %v1816_v12 = vadd.f32 %v1808_v39, %v6371_v36  ;;  %v5629_v36 = vld [vmem:[%s7566_s14 + $0x30] ss:$8 sps:$4 sm:$0xff]  }
 0xa62   :  { %v1803_v45 = vadd.f32 %v4673_v62, %v1802_v57  ;;  %v1814_v14 = vadd.f32 %v1800_v52, %v6269_v20  ;;  %v5623_v20 = vld [vmem:[%s7566_s14 + $0x10] ss:$8 sps:$4 sm:$0xff]   ;;  %v5645_v57 = vld [vmem:[%s7568_s16] sm:$0xff]  }
 0xa63   :  { %1978 = vmatpush1.bf16.msra.mxu0 %v5623_v20  ;;  %v1817_v55 = vadd.f32 %v1811_v4, %v6374_v37  ;;  %v5634_v37 = vld [vmem:[%s7566_s14 + $0x44] ss:$8 sps:$4 sm:$0xff]  }
 0xa64   :  { %1818 = vadd.xlane.f32.xlu1 %v1814_v14  ;;  %v1815_v3 = vadd.f32 %v1803_v45, %v6272_v21  ;;  %1979 = vmatprep.subr.bf16.mxu0 %v5628_v56  ;;  %v5644_v4 = vld [vmem:[%s7568_s16 + $0x40] sm:$0xff]   ;;  %v5646_v45 = vld [vmem:[%s7568_s16 + $0x48] sm:$0xff]  }
 0xa65   :  { %4999 = vmatprep.subr.bf16.mxu1 %v5644_v4  ;;  %v5652_v20 = vld [vmem:[%s7568_s16 + $0x60] sm:$0xff]  }
 0xa66   :  { %1820 = vadd.xlane.f32.xlu0 %v1815_v3  ;;  %5000 = vmatpush3.bf16.msra.mxu1 %v5645_v57 }
 0xa67   :  { %1980 = vmatpush1.bf16.msra.mxu0 %v5626_v44  ;;  %5001 = vmatprep.subr.bf16.mxu1 %v5646_v45 }
 0xa68   :  { %1981 = vmatprep.subr.bf16.mxu0 %v5631_v59 }
 0xa6b   :  { %1982 = vmatpush1.bf16.msra.mxu0 %v5629_v36 }
 0xa6c   :  { %1983 = vmatprep.subr.bf16.mxu0 %v5634_v37 }
 0xa6f   :  { %1984 = vmatpush1.bf16.msra.mxu0 %v5632_v61 }
 0xa70   :  { %1985 = vmatprep.subr.bf16.mxu0 %v5637_v28 }
 0xa73   :  { %1986 = vmatpush1.bf16.msra.mxu0 %v5635_v47 }
 0xa74   :  { %1987 = vmatprep.subr.bf16.mxu0 %v5640_v32 }
 0xa77   :  { %1988 = vmatpush1.bf16.msra.mxu0 %v5638_v30 }
 0xa78   :  { %1989 = vmatprep.subr.bf16.mxu0 %v5643_v5 }
 0xa7b   :  { %1990 = vmatpush1.bf16.msra.mxu0 %v5641_v7 }
 0xaf1   :  { %v1819_v21 = vpop.xlane.xlu1 %1818 }
 0xaf2   :  { %v1826_v6 = vmul.f32 0.0078125, %v1819_v21  ;;  %v5653_v21 = vld [vmem:[%s7568_s16 + $0x20] sm:$0xff]  }
 0xaf3   :  { %v1821_v8 = vpop.xlane.xlu0 %1820 }
 0xaf4   :  { %v1830_v22 = vsub.f32 %v1814_v14, %v1826_v6  ;;  %v1827_v10 = vmul.f32 0.0078125, %v1821_v8  ;;  %v5647_v14 = vld [vmem:[%s7568_s16 + $0x8] sm:$0xff]  }
 0xaf5   :  { %5002 = vmatpush3.bf16.msra.mxu1 %v5647_v14  ;;  %v5654_v6 = vld [vmem:[%s7568_s16 + $0x68] sm:$0xff]  }
 0xaf6   :  { %v1831_v53 = vsub.f32 %v1815_v3, %v1827_v10  ;;  %v1834_v48 = vmul.f32 %v1830_v22, %v1830_v22  ;;  %v5648_v3 = vld [vmem:[%s7568_s16 + $0x50] sm:$0xff]   ;;  %v5655_v8 = vld [vmem:[%s7568_s16 + $0x28] sm:$0xff]  }
 0xaf7   :  { %5003 = vmatprep.subr.bf16.mxu1 %v5648_v3  ;;  %v5657_v10 = vld [vmem:[%s7568_s16 + $0x30] sm:$0xff]  }
 0xaf8   :  { %1838 = vadd.xlane.f32.xlu0 %v1834_v48  ;;  %v1835_v34 = vmul.f32 %v1831_v53, %v1831_v53  ;;  %v5659_v48 = vld [vmem:[%s7568_s16 + $0x38] sm:$0xff]  }
 0xaf9   :  { %5004 = vmatpush3.bf16.msra.mxu1 %v5649_v58 }
 0xafa   :  { %1840 = vadd.xlane.f32.xlu1 %v1835_v34  ;;  %5005 = vmatprep.subr.bf16.mxu1 %v5650_v27 }
 0xafc   :  { %1822 = vadd.xlane.f32.xlu0 %v1816_v12 }
 0xafd   :  { %5006 = vmatpush3.bf16.msra.mxu1 %v5651_v42 }
 0xafe   :  { %1824 = vadd.xlane.f32.xlu1 %v1817_v55  ;;  %5007 = vmatprep.subr.bf16.mxu1 %v5652_v20 }
 0xb01   :  { %5008 = vmatpush3.bf16.msra.mxu1 %v5653_v21 }
 0xb02   :  { %5009 = vmatprep.subr.bf16.mxu1 %v5654_v6 }
 0xb05   :  { %5010 = vmatpush3.bf16.msra.mxu1 %v5655_v8 }
 0xb85   :  { %v1839_v9 = vpop.xlane.xlu0 %1838 }
 0xb86   :  { %v1846_v11 = vmul.f32 0.0078125, %v1839_v9  ;;  %v355_v9 = vld [vmem:[%s7567_s15] sm:$0x3] }
 0xb87   :  { %v1841_v15 = vpop.xlane.xlu1 %1840 }
 0xb88   :  { %v1850_v16 = vadd.f32 1e-12, %v1846_v11  ;;  %v1847_v40 = vmul.f32 0.0078125, %v1841_v15  ;;  %v1888_v11 = vrot.slane %v355_v9, %v6291_v33  ;;  %v1892_v15 = vrot.slane %v355_v9, %v6294_v35 }
 0xb89   :  { %v1823_v1 = vpop.xlane.xlu0 %1822 }
 0xb8a   :  { %5828 = vrsqrt.f32 %v1850_v16  ;;  %v1851_v51 = vadd.f32 1e-12, %v1847_v40  ;;  %v1828_v46 = vmul.f32 0.0078125, %v1823_v1 }
 0xb8b   :  { %v1825_v41 = vpop.xlane.xlu1 %1824 }
 0xb8c   :  { %5830 = vrsqrt.f32 %v1851_v51  ;;  %v1832_v17 = vsub.f32 %v1816_v12, %v1828_v46  ;;  %v1829_v43 = vmul.f32 0.0078125, %v1825_v41 }
 0xb8e   :  { %v1833_v19 = vsub.f32 %v1817_v55, %v1829_v43  ;;  %v1836_v24 = vmul.f32 %v1832_v17, %v1832_v17 }
 0xb90   :  { %1842 = vadd.xlane.f32.xlu0 %v1836_v24  ;;  %v1837_v25 = vmul.f32 %v1833_v19, %v1833_v19 }
 0xb92   :  { %1844 = vadd.xlane.f32.xlu1 %v1837_v25 }
 0xb94   :  { %v5829_v26 = vpop.eup %5828 }
 0xb95   :  { %v1858_v63 = vmul.f32 %v5829_v26, %v1830_v22  ;;  %v5656_v22 = vld [vmem:[%s7568_s16 + $0x70] sm:$0xff]  }
 0xb96   :  { %v5831_v18 = vpop.eup %5830  ;;  %5011 = vmatprep.subr.bf16.mxu1 %v5656_v22 }
 0xb97   :  { %v1859_v38 = vmul.f32 %v5831_v18, %v1831_v53  ;;  %v1868_v62 = vmul.f32 %v4682_v49, %v1858_v63  ;;  %v5658_v53 = vld [vmem:[%s7568_s16 + $0x78] sm:$0xff]   ;;  %5012 = vmatpush3.bf16.msra.mxu1 %v5657_v10 }
 0xb98   :  { %5013 = vmatprep.subr.bf16.mxu1 %v5658_v53 }
 0xb99   :  { %v1869_v39 = vmul.f32 %v4682_v49, %v1859_v38  ;;  %v6753_v60 = vadd.f32 %v4683_v29, %v1868_v62 }
 0xb9b   :  { %v6755_v52 = vadd.f32 %v4683_v29, %v1869_v39  ;;  %5014 = vmatpush3.bf16.msra.mxu1 %v5659_v48 }
 0xb9d   :  { %v1882_v54 = vpack.c.bf16 %v6755_v52, %v6753_v60 }
 0xb9f   :  { %2008 = vmatmul.mubr.bf16.vlgmr.msra.gmra.mrb[36].mxu0 %v1882_v54 }
 0xba0   :  { %2017 = vmatprep.mubr.bf16.mxu0 %v5980_v2 }
 0xc1d   :  { %v1843_v34 = vpop.xlane.xlu0 %1842 }
 0xc1e   :  { %v1848_v12 = vmul.f32 0.0078125, %v1843_v34 }
 0xc1f   :  { %v1845_v55 = vpop.xlane.xlu1 %1844 }
 0xc20   :  { %v1852_v56 = vadd.f32 1e-12, %v1848_v12  ;;  %v1849_v44 = vmul.f32 0.0078125, %v1845_v55 }
 0xc22   :  { %5832 = vrsqrt.f32 %v1852_v56  ;;  %v1853_v59 = vadd.f32 1e-12, %v1849_v44 }
 0xc24   :  { %5834 = vrsqrt.f32 %v1853_v59 }
 0xc2c   :  { %v5833_v36 = vpop.eup %5832 }
 0xc2d   :  { %v1860_v37 = vmul.f32 %v5833_v36, %v1832_v17 }
 0xc2e   :  { %v5835_v61 = vpop.eup %5834 }
 0xc2f   :  { %v1861_v28 = vmul.f32 %v5835_v61, %v1833_v19  ;;  %v1870_v47 = vmul.f32 %v4682_v49, %v1860_v37 }
 0xc31   :  { %v1871_v32 = vmul.f32 %v4682_v49, %v1861_v28  ;;  %v6808_v30 = vadd.f32 %v4683_v29, %v1870_v47 }
 0xc33   :  { %v6810_v5 = vadd.f32 %v4683_v29, %v1871_v32 }
 0xc35   :  { %v1883_v7 = vpack.c.bf16 %v6810_v5, %v6808_v30 }
 0xc37   :  { %2018 = vmatmul.mubr.bf16.gmra.mrb[40].mxu0 %v1883_v7 }
 0xc38   :  { %2617 = vmatprep.mubr.bf16.mxu0 %v5980_v2 }
 0xc72   :  { %v2009_v16 = vpop.f32.mrb[36].mxu0 }
 0xc73   :  { %v2010_v40 = vadd.f32 %v2009_v16, %v1888_v11  ;;  %v2011_v1 = vpop.f32.mrb[37].mxu0 }
 0xc74   :  { %v2012_v51 = vadd.f32 %v2011_v1, %v1892_v15  ;;  %v2013_v46 = vpop.f32.mrb[38].mxu0 }
 0xc75   :  { %v2036_v41 = vmul.f32 0.044715, %v2010_v40  ;;  %v2014_v17 = vadd.f32 %v2013_v46, %v1888_v11  ;;  %v2015_v43 = vpop.f32.mrb[39].mxu0  ;;  %v2028_v53 = vmul.f32 0.5, %v2010_v40 }
 0xc76   :  { %v2037_v19 = vmul.f32 0.044715, %v2012_v51  ;;  %v2016_v24 = vadd.f32 %v2015_v43, %v1892_v15  ;;  %v2029_v12 = vmul.f32 0.5, %v2012_v51 }
 0xc77   :  { %v2044_v25 = vmul.f32 %v2036_v41, %v2010_v40  ;;  %v2038_v26 = vmul.f32 0.044715, %v2014_v17  ;;  %v2030_v48 = vmul.f32 0.5, %v2014_v17 }
 0xc78   :  { %v2045_v49 = vmul.f32 %v2037_v19, %v2012_v51  ;;  %v2039_v63 = vmul.f32 0.044715, %v2016_v24  ;;  %v2031_v55 = vmul.f32 0.5, %v2016_v24 }
 0xc79   :  { %v2052_v18 = vmul.f32 %v2044_v25, %v2010_v40  ;;  %v2046_v38 = vmul.f32 %v2038_v26, %v2014_v17 }
 0xc7a   :  { %v2053_v62 = vmul.f32 %v2045_v49, %v2012_v51  ;;  %v2047_v29 = vmul.f32 %v2039_v63, %v2016_v24 }
 0xc7b   :  { %v2060_v39 = vadd.f32 %v2052_v18, %v2010_v40  ;;  %v2054_v54 = vmul.f32 %v2046_v38, %v2014_v17 }
 0xc7c   :  { %v2055_v4 = vmul.f32 %v2047_v29, %v2016_v24  ;;  %v2061_v57 = vadd.f32 %v2053_v62, %v2012_v51 }
 0xc7d   :  { %v2068_v45 = vmul.f32 0.7978846, %v2060_v39  ;;  %v2062_v14 = vadd.f32 %v2054_v54, %v2014_v17 }
 0xc7e   :  { %v2063_v3 = vadd.f32 %v2055_v4, %v2016_v24  ;;  %v2069_v58 = vmul.f32 0.7978846, %v2061_v57 }
 0xc7f   :  { %5836 = vtanh.f32 %v2068_v45  ;;  %v2070_v27 = vmul.f32 0.7978846, %v2062_v14 }
 0xc80   :  { %v2071_v42 = vmul.f32 0.7978846, %v2063_v3  ;;  %5838 = vtanh.f32 %v2069_v58 }
 0xc81   :  { %5840 = vtanh.f32 %v2070_v27 }
 0xc82   :  { %5842 = vtanh.f32 %v2071_v42 }
 0xc89   :  { %v5837_v20 = vpop.eup %5836 }
 0xc8a   :  { %v5839_v21 = vpop.eup %5838  ;;  %v2084_v6 = vadd.f32 1.0, %v5837_v20 }
 0xc8b   :  { %v5841_v8 = vpop.eup %5840  ;;  %v2085_v22 = vadd.f32 1.0, %v5839_v21 }
 0xc8c   :  { %v5843_v10 = vpop.eup %5842  ;;  %v2086_v34 = vadd.f32 1.0, %v5841_v8  ;;  %v2092_v44 = vmul.f32 %v2084_v6, %v2028_v53 }
 0xc8d   :  { %v2087_v56 = vadd.f32 1.0, %v5843_v10  ;;  %v2093_v36 = vmul.f32 %v2085_v22, %v2029_v12 }
 0xc8e   :  { %v2094_v59 = vmul.f32 %v2086_v34, %v2030_v48 }
 0xc8f   :  { %v2095_v37 = vmul.f32 %v2087_v56, %v2031_v55 }
 0xc90   :  { %v2100_v61 = vpack.c.bf16 %v2094_v59, %v2092_v44  ;;  %v4700_v59 = vld [vmem:[%s7569_s17] ss:$0 sm:$0xff] }
 0xc91   :  { %v2101_v28 = vpack.c.bf16 %v2095_v37, %v2093_v36 }
 0xc93   :  { %2238 = vmatprep.mubr.bf16.mxu1 %v2101_v28 }
 0xc94   :  { %2239 = vmatmul.mubr.bf16.vlgmr.msra.gmra.mrb[48].mxu1 %v2100_v61 }
 0xd0a   :  { %v2019_v47 = vpop.f32.mrb[40].mxu0 }
 0xd0b   :  { %v2020_v32 = vadd.f32 %v2019_v47, %v1888_v11  ;;  %v2021_v7 = vpop.f32.mrb[41].mxu0 }
 0xd0c   :  { %v2022_v9 = vadd.f32 %v2021_v7, %v1892_v15  ;;  %v2023_v16 = vpop.f32.mrb[42].mxu0 }
 0xd0d   :  { %v2040_v1 = vmul.f32 0.044715, %v2020_v32  ;;  %v2024_v40 = vadd.f32 %v2023_v16, %v1888_v11  ;;  %v2025_v46 = vpop.f32.mrb[43].mxu0  ;;  %v2032_v20 = vmul.f32 0.5, %v2020_v32 }
 0xd0e   :  { %v2041_v41 = vmul.f32 0.044715, %v2022_v9  ;;  %v2026_v51 = vadd.f32 %v2025_v46, %v1892_v15  ;;  %v2033_v8 = vmul.f32 0.5, %v2022_v9  ;;  %v5665_v46 = vld [vmem:[%s7596_s6 + $0xdc] ss:$12 sps:$4 sm:$0xff]  }
 0xd0f   :  { %v2048_v17 = vmul.f32 %v2040_v1, %v2020_v32  ;;  %v2042_v43 = vmul.f32 0.044715, %v2024_v40  ;;  %v2034_v21 = vmul.f32 0.5, %v2024_v40  ;;  %v5660_v1 = vld [vmem:[%s7596_s6 + $0xc0] ss:$12 sps:$4 sm:$0xff]  }
 0xd10   :  { %v2049_v19 = vmul.f32 %v2041_v41, %v2022_v9  ;;  %v2043_v24 = vmul.f32 0.044715, %v2026_v51  ;;  %v2035_v22 = vmul.f32 0.5, %v2026_v51 }
 0xd11   :  { %v2056_v25 = vmul.f32 %v2048_v17, %v2020_v32  ;;  %v2050_v26 = vmul.f32 %v2042_v43, %v2024_v40 }
 0xd12   :  { %v2057_v49 = vmul.f32 %v2049_v19, %v2022_v9  ;;  %v2051_v63 = vmul.f32 %v2043_v24, %v2026_v51 }
 0xd13   :  { %v2058_v18 = vmul.f32 %v2050_v26, %v2024_v40  ;;  %v2064_v38 = vadd.f32 %v2056_v25, %v2020_v32 }
 0xd14   :  { %v2059_v62 = vmul.f32 %v2051_v63, %v2026_v51  ;;  %v2065_v29 = vadd.f32 %v2057_v49, %v2022_v9 }
 0xd15   :  { %v2066_v39 = vadd.f32 %v2058_v18, %v2024_v40  ;;  %v2072_v54 = vmul.f32 0.7978846, %v2064_v38  ;;  %v5662_v40 = vld [vmem:[%s7596_s6 + $0xc4] ss:$12 sps:$4 sm:$0xff]  }
 0xd16   :  { %v2067_v4 = vadd.f32 %v2059_v62, %v2026_v51  ;;  %v2073_v57 = vmul.f32 0.7978846, %v2065_v29  ;;  %2585 = vmatprep.subr.bf16.mxu0 %v5662_v40 }
 0xd17   :  { %v2074_v11 = vmul.f32 0.7978846, %v2066_v39  ;;  %5844 = vtanh.f32 %v2072_v54  ;;  %2586 = vmatpush1.bf16.msra.mxu0 %v5660_v1  ;;  %v4718_v1 = vld [vmem:[%s7600_s3] ss:$0 sm:$0xff] }
 0xd18   :  { %v2075_v45 = vmul.f32 0.7978846, %v2067_v4  ;;  %5846 = vtanh.f32 %v2073_v57  ;;  %2587 = vmatprep.subr.bf16.mxu0 %v5665_v46  ;;  %v5668_v57 = vld [vmem:[%s7596_s6 + $0xf4] ss:$12 sps:$4 sm:$0xff]  }
 0xd19   :  { %5848 = vtanh.f32 %v2074_v11  ;;  %v5666_v11 = vld [vmem:[%s7596_s6 + $0xf0] ss:$12 sps:$4 sm:$0xff]  }
 0xd1a   :  { %5850 = vtanh.f32 %v2075_v45  ;;  %v5671_v45 = vld [vmem:[%s7596_s6 + $0x10c] ss:$12 sps:$4 sm:$0xff]  }
 0xd21   :  { %v5845_v15 = vpop.eup %5844 }
 0xd22   :  { %v5847_v14 = vpop.eup %5846  ;;  %v2088_v3 = vadd.f32 1.0, %v5845_v15  ;;  %v5672_v15 = vld [vmem:[%s7596_s6 + $0x120] ss:$12 sps:$4 sm:$0xff]  }
 0xd23   :  { %v5849_v58 = vpop.eup %5848  ;;  %v2089_v27 = vadd.f32 1.0, %v5847_v14  ;;  %v5677_v14 = vld [vmem:[%s7596_s6 + $0x13c] ss:$12 sps:$4 sm:$0xff]  }
 0xd24   :  { %v5851_v42 = vpop.eup %5850  ;;  %v2090_v6 = vadd.f32 1.0, %v5849_v58  ;;  %v2096_v53 = vmul.f32 %v2088_v3, %v2032_v20  ;;  %v5675_v3 = vld [vmem:[%s7596_s6 + $0x138] ss:$12 sps:$4 sm:$0xff]   ;;  %v5680_v58 = vld [vmem:[%s7596_s6 + $0x154] ss:$12 sps:$4 sm:$0xff]  }
 0xd25   :  { %v2091_v10 = vadd.f32 1.0, %v5851_v42  ;;  %v2097_v34 = vmul.f32 %v2089_v27, %v2033_v8  ;;  %v5678_v27 = vld [vmem:[%s7596_s6 + $0x150] ss:$12 sps:$4 sm:$0xff]   ;;  %v5681_v42 = vld [vmem:[%s7596_s6 + $0x168] ss:$12 sps:$4 sm:$0xff]  }
 0xd26   :  { %v2098_v48 = vmul.f32 %v2090_v6, %v2034_v21  ;;  %v5683_v20 = vld [vmem:[%s7596_s6 + $0x16c] ss:$12 sps:$4 sm:$0xff]   ;;  %v5684_v21 = vld [vmem:[%s7596_s6 + $0xc8] ss:$12 sps:$4 sm:$0xff]  }
 0xd27   :  { %v2099_v12 = vmul.f32 %v2091_v10, %v2035_v22  ;;  %v5685_v6 = vld [vmem:[%s7596_s6 + $0xe0] ss:$12 sps:$4 sm:$0xff]   ;;  %5300 = vmatprep.subr.bf16.mxu1 %v5684_v21 }
 0xd28   :  { %v2102_v55 = vpack.c.bf16 %v2098_v48, %v2096_v53  ;;  %5301 = vmatpush3.bf16.msra.mxu1 %v5684_v21 }
 0xd29   :  { %v2103_v56 = vpack.c.bf16 %v2099_v12, %v2097_v34  ;;  %5302 = vmatprep.subr.bf16.mxu1 %v5685_v6 }
 0xd2b   :  { %2246 = vmatprep.mubr.bf16.mxu1 %v2103_v56 }
 0xd2c   :  { %2247 = vmatmul.mubr.bf16.gmra.mrb[52].mxu1 %v2102_v55 }
 0xd2d   :  { %5303 = vmatpush3.bf16.msra.mxu1 %v5685_v6 }
 0xd67   :  { %v5015_v44 = vpop.f32.mrb[48].mxu1 }
 0xd68   :  { %v5016_v36 = vpop.f32.mrb[49].mxu1 }
 0xd69   :  { %v5017_v37 = vadd.f32 %v5016_v36, %v5015_v44  ;;  %v5018_v61 = vpop.f32.mrb[50].mxu1 }
 0xd6a   :  { %v5019_v28 = vpop.f32.mrb[51].mxu1 }
 0xd6b   :  { %v2241_v47 = vadd.f32 %v5017_v37, %v4700_v59  ;;  %v5020_v32 = vadd.f32 %v5019_v28, %v5018_v61 }
 0xd6d   :  { %v2244_v7 = vadd.f32 %v5020_v32, %v4700_v59  ;;  %v2255_v9 = vadd.f32 %v2241_v47, %v6753_v60  ;;  %v5663_v60 = vld [vmem:[%s7596_s6 + $0xd8] ss:$12 sps:$4 sm:$0xff]   ;;  %v4717_v47 = vld [vmem:[%s7570_s18] ss:$0 sm:$0xff] }
 0xd6e   :  { %2588 = vmatpush1.bf16.msra.mxu0 %v5663_v60 }
 0xd6f   :  { %2259 = vadd.xlane.f32.xlu0 %v2255_v9  ;;  %v2256_v16 = vadd.f32 %v2244_v7, %v6755_v52  ;;  %2589 = vmatprep.subr.bf16.mxu0 %v5668_v57 }
 0xd71   :  { %2261 = vadd.xlane.f32.xlu1 %v2256_v16 }
 0xd72   :  { %2590 = vmatpush1.bf16.msra.mxu0 %v5666_v11 }
 0xd73   :  { %2591 = vmatprep.subr.bf16.mxu0 %v5671_v45 }
 0xdfc   :  { %v2260_v52 = vpop.xlane.xlu0 %2259 }
 0xdfd   :  { %v2267_v41 = vmul.f32 0.0078125, %v2260_v52 }
 0xdfe   :  { %v2262_v51 = vpop.xlane.xlu1 %2261 }
 0xdff   :  { %v6837_v17 = vsub.f32 %v2255_v9, %v2267_v41  ;;  %v2268_v43 = vmul.f32 0.0078125, %v2262_v51  ;;  %v5021_v19 = vpop.f32.mrb[52].mxu1  ;;  %v5686_v41 = vld [vmem:[%s7596_s6 + $0xf8] ss:$12 sps:$4 sm:$0xff]   ;;  %v5687_v51 = vld [vmem:[%s7596_s6 + $0x110] ss:$12 sps:$4 sm:$0xff]  }
 0xe00   :  { %v5022_v24 = vpop.f32.mrb[53].mxu1  ;;  %5304 = vmatprep.subr.bf16.mxu1 %v5686_v41 }
 0xe01   :  { %v6839_v25 = vsub.f32 %v2256_v16, %v2268_v43  ;;  %v5023_v26 = vadd.f32 %v5022_v24, %v5021_v19  ;;  %v5024_v49 = vpop.f32.mrb[54].mxu1  ;;  %v2275_v63 = vmul.f32 %v6837_v17, %v6837_v17  ;;  %5305 = vmatpush3.bf16.msra.mxu1 %v5686_v41  ;;  %v5689_v43 = vld [vmem:[%s7596_s6 + $0x140] ss:$12 sps:$4 sm:$0xff]   ;;  %v5690_v19 = vld [vmem:[%s7596_s6 + $0x158] ss:$12 sps:$4 sm:$0xff]  }
 0xe02   :  { %v5025_v18 = vpop.f32.mrb[55].mxu1  ;;  %5306 = vmatprep.subr.bf16.mxu1 %v5687_v51  ;;  %v5691_v24 = vld [vmem:[%s7596_s6 + $0x170] ss:$12 sps:$4 sm:$0xff]  }
 0xe03   :  { %v2249_v38 = vadd.f32 %v5023_v26, %v4700_v59  ;;  %v5026_v62 = vadd.f32 %v5025_v18, %v5024_v49  ;;  %2279 = vadd.xlane.f32.xlu0 %v2275_v63  ;;  %v2276_v29 = vmul.f32 %v6839_v25, %v6839_v25 }
 0xe05   :  { %v2252_v39 = vadd.f32 %v5026_v62, %v4700_v59  ;;  %2281 = vadd.xlane.f32.xlu1 %v2276_v29  ;;  %v2257_v54 = vadd.f32 %v2249_v38, %v6808_v30  ;;  %v5669_v30 = vld [vmem:[%s7596_s6 + $0x108] ss:$12 sps:$4 sm:$0xff]   ;;  %5307 = vmatpush3.bf16.msra.mxu1 %v5687_v51 }
 0xe06   :  { %2592 = vmatpush1.bf16.msra.mxu0 %v5669_v30 }
 0xe07   :  { %2263 = vadd.xlane.f32.xlu0 %v2257_v54  ;;  %v2258_v4 = vadd.f32 %v2252_v39, %v6810_v5  ;;  %v5674_v5 = vld [vmem:[%s7596_s6 + $0x124] ss:$12 sps:$4 sm:$0xff]  }
 0xe08   :  { %2593 = vmatprep.subr.bf16.mxu0 %v5674_v5  ;;  %v4751_v5 = vld [vmem:[%s7561_s9 + $0x3] sm:$0x7] }
 0xe09   :  { %2265 = vadd.xlane.f32.xlu1 %v2258_v4 }
 0xe0a   :  { %2594 = vmatpush1.bf16.msra.mxu0 %v5672_v15  ;;  %v2445_v15 = vrot.slane %v4751_v5, %v6291_v33 }
 0xe0b   :  { %2595 = vmatprep.subr.bf16.mxu0 %v5677_v14 }
 0xe0e   :  { %2596 = vmatpush1.bf16.msra.mxu0 %v5675_v3  ;;  %v2449_v3 = vrot.slane %v4751_v5, %v6294_v35 }
 0xe0f   :  { %2597 = vmatprep.subr.bf16.mxu0 %v5680_v58 }
 0xe12   :  { %2598 = vmatpush1.bf16.msra.mxu0 %v5678_v27 }
 0xe13   :  { %2599 = vmatprep.subr.bf16.mxu0 %v5683_v20 }
 0xe16   :  { %2600 = vmatpush1.bf16.msra.mxu0 %v5681_v42 }
 0xe17   :  { %5320 = vmatprep.subr.bf16.mxu0 %v5982_v23 }
 0xe90   :  { %v2280_v8 = vpop.xlane.xlu0 %2279 }
 0xe91   :  { %v2287_v22 = vmul.f32 0.0078125, %v2280_v8 }
 0xe92   :  { %v2282_v10 = vpop.xlane.xlu1 %2281 }
 0xe93   :  { %v2291_v53 = vadd.f32 1e-12, %v2287_v22  ;;  %v2288_v48 = vmul.f32 0.0078125, %v2282_v10 }
 0xe94   :  { %v2264_v34 = vpop.xlane.xlu0 %2263 }
 0xe95   :  { %5852 = vrsqrt.f32 %v2291_v53  ;;  %v2292_v12 = vadd.f32 1e-12, %v2288_v48  ;;  %v2269_v55 = vmul.f32 0.0078125, %v2264_v34  ;;  %v2453_v48 = vrot.slane %v4751_v5, %v404_v50 }
 0xe96   :  { %v2266_v56 = vpop.xlane.xlu1 %2265 }
 0xe97   :  { %5854 = vrsqrt.f32 %v2292_v12  ;;  %v2273_v44 = vsub.f32 %v2257_v54, %v2269_v55  ;;  %v2270_v59 = vmul.f32 0.0078125, %v2266_v56 }
 0xe99   :  { %v2274_v36 = vsub.f32 %v2258_v4, %v2270_v59  ;;  %v2277_v37 = vmul.f32 %v2273_v44, %v2273_v44 }
 0xe9b   :  { %2283 = vadd.xlane.f32.xlu0 %v2277_v37  ;;  %v2278_v61 = vmul.f32 %v2274_v36, %v2274_v36 }
 0xe9d   :  { %2285 = vadd.xlane.f32.xlu1 %v2278_v61 }
 0xe9f   :  { %v5853_v28 = vpop.eup %5852 }
 0xea0   :  { %v2299_v32 = vmul.f32 %v5853_v28, %v6837_v17  ;;  %v5688_v17 = vld [vmem:[%s7596_s6 + $0x128] ss:$12 sps:$4 sm:$0xff]  }
 0xea1   :  { %v5855_v7 = vpop.eup %5854  ;;  %5308 = vmatprep.subr.bf16.mxu1 %v5688_v17 }
 0xea2   :  { %v2309_v9 = vmul.f32 %v4717_v47, %v2299_v32  ;;  %v2300_v16 = vmul.f32 %v5855_v7, %v6839_v25  ;;  %5309 = vmatpush3.bf16.msra.mxu1 %v5688_v17 }
 0xea3   :  { %5310 = vmatprep.subr.bf16.mxu1 %v5689_v43 }
 0xea4   :  { %v2310_v40 = vmul.f32 %v4717_v47, %v2300_v16  ;;  %v6898_v46 = vadd.f32 %v4718_v1, %v2309_v9 }
 0xea6   :  { %v6900_v60 = vadd.f32 %v4718_v1, %v2310_v40  ;;  %5311 = vmatpush3.bf16.msra.mxu1 %v5689_v43 }
 0xea7   :  { %5312 = vmatprep.subr.bf16.mxu1 %v5690_v19 }
 0xea8   :  { %v2439_v52 = vpack.c.bf16 %v6900_v60, %v6898_v46 }
 0xeaa   :  { %2618 = vmatmul.mubr.bf16.vlgmr.msra.gmra.mrb[44].mxu0 %v2439_v52  ;;  %5316 = vmatprep.mubr.bf16.mxu1 %v2439_v52 }
 0xeab   :  { %2627 = vmatprep.mubr.bf16.mxu0 %v5980_v2  ;;  %5313 = vmatpush3.bf16.msra.mxu1 %v5690_v19 }
 0xeac   :  { %5314 = vmatprep.subr.bf16.mxu1 %v5691_v24 }
 0xeaf   :  { %5315 = vmatpush3.bf16.msra.mxu1 %v5691_v24 }
 0xeb0   :  { %5338 = vmatprep.subr.bf16.mxu1 %v5982_v23 }
 0xf28   :  { %v2284_v25 = vpop.xlane.xlu0 %2283 }
 0xf29   :  { %v2289_v26 = vmul.f32 0.0078125, %v2284_v25 }
 0xf2a   :  { %v2286_v49 = vpop.xlane.xlu1 %2285 }
 0xf2b   :  { %v2293_v63 = vadd.f32 1e-12, %v2289_v26  ;;  %v2290_v18 = vmul.f32 0.0078125, %v2286_v49 }
 0xf2d   :  { %5856 = vrsqrt.f32 %v2293_v63  ;;  %v2294_v38 = vadd.f32 1e-12, %v2290_v18 }
 0xf2f   :  { %5858 = vrsqrt.f32 %v2294_v38 }
 0xf37   :  { %v5857_v62 = vpop.eup %5856 }
 0xf38   :  { %v2301_v29 = vmul.f32 %v5857_v62, %v2273_v44 }
 0xf39   :  { %v5859_v39 = vpop.eup %5858 }
 0xf3a   :  { %v2302_v54 = vmul.f32 %v5859_v39, %v2274_v36  ;;  %v2311_v4 = vmul.f32 %v4717_v47, %v2301_v29 }
 0xf3c   :  { %v2312_v57 = vmul.f32 %v4717_v47, %v2302_v54  ;;  %v6924_v11 = vadd.f32 %v4718_v1, %v2311_v4 }
 0xf3e   :  { %v6926_v45 = vadd.f32 %v4718_v1, %v2312_v57 }
 0xf40   :  { %v2440_v30 = vpack.c.bf16 %v6926_v45, %v6924_v11 }
 0xf42   :  { %2628 = vmatmul.mubr.bf16.gmra.mrb[48].mxu0 %v2440_v30  ;;  %5317 = vmatmul.mubr.bf16.vlgmr.msra.gmra.mrb[56].mxu1 %v2440_v30 }
 0xf43   :  { %5322 = vmatprep.mubr.msk.bf16.mxu0 %vm5983_vm4, %v5982_v23  ;;  %5340 = vmatprep.mubr.msk.bf16.mxu1 %vm5983_vm4, %v5982_v23 }
 0xf7d   :  { %v2619_v14 = vpop.f32.mrb[44].mxu0 }
 0xf7e   :  { %v2621_v58 = vpop.f32.mrb[45].mxu0  ;;  %v2620_v42 = vadd.f32 %v2619_v14, %v2445_v15 }
 0xf7f   :  { %v2623_v27 = vpop.f32.mrb[46].mxu0  ;;  %v2622_v6 = vadd.f32 %v2621_v58, %v2449_v3 }
 0xf80   :  { %v2624_v20 = vadd.f32 %v2623_v27, %v2445_v15  ;;  %v2625_v21 = vpop.f32.mrb[47].mxu0 }
 0xf81   :  { %v2626_v8 = vadd.f32 %v2625_v21, %v2449_v3 }
 0xf82   :  { %v2687_v22 = vpack.c.bf16 %v2624_v20, %v2620_v42 }
 0xf83   :  { %v2688_v10 = vpack.c.bf16 %v2626_v8, %v2622_v6 }
 0xf85   :  { %v2694_v53 = vsel %vm642_vm5, %v2688_v10, 0 }
 0xf86   :  { %5321 = vmatpush3.bf16.xpose.msra.mxu0 %v2694_v53 }
 0xf87   :  { %5326 = vmatprep.subr.bf16.mxu0 %v5982_v23 }
 0xf8d   :  { %5323 = vmatmul.mubr.msk.bf16.vlgmr.msra.gmra.mrb[52].mxu0 %vm642_vm5, %v2687_v22 }
 0xf8e   :  { %5328 = vmatprep.mubr.msk.bf16.mxu0 %vm5983_vm4, %v5982_v23 }
0x1015   :  { %v2629_v34 = vpop.f32.mrb[48].mxu0  ;;  %v5318_v12 = vpop.f32.mrb[56].mxu1 }
0x1016   :  { %v2681_v55 = vadd.f32 %v5318_v12, %v2453_v48  ;;  %v2631_v56 = vpop.f32.mrb[49].mxu0  ;;  %v2672_v44 = vpop.f32.mrb[57].mxu1  ;;  %v2630_v37 = vadd.f32 %v2629_v34, %v2445_v15 }
0x1017   :  { %v2633_v59 = vpop.f32.mrb[50].mxu0  ;;  %v5319_v36 = vpop.f32.mrb[58].mxu1  ;;  %v2632_v7 = vadd.f32 %v2631_v56, %v2449_v3  ;;  %v2673_v9 = vadd.f32 %v2672_v44, %v2453_v48 }
0x1018   :  { %v2634_v61 = vadd.f32 %v2633_v59, %v2445_v15  ;;  %v2684_v28 = vadd.f32 %v5319_v36, %v2453_v48  ;;  %v2635_v47 = vpop.f32.mrb[51].mxu0  ;;  %v2675_v32 = vpop.f32.mrb[59].mxu1 }
0x1019   :  { %v2636_v16 = vadd.f32 %v2635_v47, %v2449_v3  ;;  %v2676_v1 = vadd.f32 %v2675_v32, %v2453_v48 }
0x101a   :  { %v6946_v40 = vpack.c.bf16 %v2634_v61, %v2630_v37  ;;  %v6948_v31 = vpack.c.bf16 %v2684_v28, %v2681_v55 }
0x101b   :  { %v6950_v50 = vpack.c.bf16 %v2636_v16, %v2632_v7  ;;  %v6952_v52 = vpack.c.bf16 %v2676_v1, %v2673_v9 }
0x101d   :  { %5327 = vmatpush3.bf16.msra.mxu0 %v6952_v52  ;;  %v3223_v55 = vsel %vm642_vm5, %v6950_v50, 0 }
0x101e   :  { %5332 = vmatprep.subr.bf16.mxu0 %v5982_v23 }
0x1060   :  { %v2730_v41 = vpop.f32.mrb[52].mxu0 }
0x1061   :  { %v2737_v51 = vmul.f32 0.17677669, %v2730_v41  ;;  %v5324_v17 = vpop.f32.mrb[53].mxu0 }
0x1062   :  { %v2733_v43 = vpop.f32.mrb[54].mxu0 }
0x1063   :  { %v2738_v19 = vmul.f32 0.17677669, %v2733_v43  ;;  %v5325_v24 = vpop.f32.mrb[55].mxu0  ;;  %v2739_v25 = vadd.f32 %v2737_v51, %v6362_v0 }
0x1065   :  { %v2741_v26 = vsel %vm698_vm6, %v2739_v25, -inf  ;;  %v2740_v49 = vadd.f32 %v2738_v19, %v6362_v0 }
0x1066   :  { %2742 = vmax.xlane.f32.xlu0 %v2741_v26 }
0x1067   :  { %v2744_v63 = vsel %vm698_vm6, %v2740_v49, -inf }
0x1068   :  { %2745 = vmax.xlane.f32.xlu1 %v2744_v63 }
0x10f3   :  { %v2743_v18 = vpop.xlane.xlu0 %2742 }
0x10f4   :  { %v2747_v38 = vsub.f32 %v2739_v25, %v2743_v18 }
0x10f5   :  { %v2746_v62 = vpop.xlane.xlu1 %2745 }
0x10f6   :  { %v2749_v29 = vmul.f32 1.442695, %v2747_v38  ;;  %v2748_v39 = vsub.f32 %v2740_v49, %v2746_v62 }
0x10f8   :  { %5860 = vpow2.f32 %v2749_v29  ;;  %v2751_v54 = vmul.f32 1.442695, %v2748_v39 }
0x10fa   :  { %5862 = vpow2.f32 %v2751_v54 }
0x1102   :  { %v5861_v4 = vpop.eup %5860 }
0x1103   :  { %v2753_v57 = vsel %vm698_vm6, %v5861_v4, 0.0 }
0x1104   :  { %v5863_v30 = vpop.eup %5862  ;;  %2754 = vadd.xlane.f32.xlu0 %v2753_v57 }
0x1105   :  { %v2756_v5 = vsel %vm698_vm6, %v5863_v30, 0.0 }
0x1106   :  { %2757 = vadd.xlane.f32.xlu1 %v2756_v5 }
0x1117   :  { %2809 = vrot.lane.b32.xlu1 %v2687_v22, %s5984_s26 }
0x111a   :  { %2812 = vrot.lane.b32.xlu0 %v2688_v10, %s5984_s26 }
0x111b   :  { %2938 = vrot.lane.b32.xlu1 %v2688_v10, %s5985_s28 }
0x111e   :  { %2936 = vrot.lane.b32.xlu0 %v2687_v22, %s5985_s28 }
0x111f   :  { %3063 = vrot.lane.b32.xlu1 %v2688_v10, %s5986_s2 }
0x1122   :  { %3061 = vrot.lane.b32.xlu0 %v2687_v22, %s5986_s2 }
0x1123   :  { %3341 = vrot.lane.b32.xlu1 %v6950_v50, %s5984_s26 }
0x1126   :  { %3338 = vrot.lane.b32.xlu0 %v6946_v40, %s5984_s26 }
0x1127   :  { %3467 = vrot.lane.b32.xlu1 %v6950_v50, %s5985_s28 }
0x112a   :  { %3465 = vrot.lane.b32.xlu0 %v6946_v40, %s5985_s28 }
0x112b   :  { %3592 = vrot.lane.b32.xlu1 %v6950_v50, %s5986_s2 }
0x112e   :  { %3590 = vrot.lane.b32.xlu0 %v6946_v40, %s5986_s2 }
0x1191   :  { %v2755_v15 = vpop.xlane.xlu0 %2754 }
0x1192   :  { %5864 = vrcp.f32 %v2755_v15 }
0x1193   :  { %v2758_v14 = vpop.xlane.xlu1 %2757 }
0x1194   :  { %5866 = vrcp.f32 %v2758_v14 }
0x1195   :  { %v2813_v20 = vpop.permute.xlu0 %2812 }
0x1196   :  { %v2818_v8 = vsel %vm642_vm5, %v2813_v20, 0 }
0x1197   :  { %v2810_v6 = vpop.permute.xlu1 %2809 }
0x1199   :  { %v2937_v48 = vpop.permute.xlu0 %2936 }
0x119b   :  { %v2939_v22 = vpop.permute.xlu1 %2938 }
0x119c   :  { %v5865_v3 = vpop.eup %5864  ;;  %v2944_v10 = vsel %vm642_vm5, %v2939_v22, 0 }
0x119d   :  { %v2761_v27 = vmul.f32 %v5865_v3, %v5861_v4  ;;  %v3062_v12 = vpop.permute.xlu0 %3061 }
0x119e   :  { %v5867_v58 = vpop.eup %5866 }
0x119f   :  { %v2762_v42 = vmul.f32 %v5867_v58, %v5863_v30  ;;  %v3064_v53 = vpop.permute.xlu1 %3063 }
0x11a0   :  { %v3069_v34 = vsel %vm642_vm5, %v3064_v53, 0 }
0x11a1   :  { %v2763_v21 = vpack.c.bf16 %v2762_v42, %v2761_v27  ;;  %v3339_v36 = vpop.permute.xlu0 %3338 }
0x11a3   :  { %5329 = vmatmul.mubr.msk.bf16.vlgmr.msra.gmra.mrb[56].mxu0 %vm698_vm6, %v2763_v21  ;;  %v3342_v56 = vpop.permute.xlu1 %3341 }
0x11a4   :  { %5333 = vmatpush3.bf16.xpose.msra.mxu0 %v2818_v8  ;;  %5334 = vmatprep.mubr.msk.bf16.mxu0 %vm5983_vm4, %v5982_v23  ;;  %v3347_v44 = vsel %vm642_vm5, %v3342_v56, 0 }
0x11a5   :  { %5344 = vmatprep.subr.bf16.mxu0 %v5982_v23  ;;  %v3466_v28 = vpop.permute.xlu0 %3465 }
0x11a7   :  { %v3468_v59 = vpop.permute.xlu1 %3467 }
0x11a8   :  { %v3473_v37 = vsel %vm642_vm5, %v3468_v59, 0 }
0x11a9   :  { %v3591_v32 = vpop.permute.xlu0 %3590 }
0x11ab   :  { %5335 = vmatmul.mubr.msk.bf16.vlgmr.msra.gmra.mrb[60].mxu0 %vm642_vm5, %v2810_v6  ;;  %v3593_v61 = vpop.permute.xlu1 %3592 }
0x11ac   :  { %5345 = vmatpush3.bf16.xpose.msra.mxu0 %v2944_v10  ;;  %5346 = vmatprep.mubr.msk.bf16.mxu0 %vm5983_vm4, %v5982_v23  ;;  %v3598_v47 = vsel %vm642_vm5, %v3593_v61, 0 }
0x11ad   :  { %5356 = vmatprep.subr.bf16.mxu0 %v5982_v23 }
0x11b3   :  { %5347 = vmatmul.mubr.msk.bf16.vlgmr.msra.gmra.mrb[64].mxu0 %vm642_vm5, %v2937_v48 }
0x11b4   :  { %5357 = vmatpush3.bf16.xpose.msra.mxu0 %v3069_v34  ;;  %5358 = vmatprep.mubr.msk.bf16.mxu0 %vm5983_vm4, %v5982_v23 }
0x11b5   :  { %5368 = vmatprep.subr.bf16.mxu0 %v5982_v23 }
0x11bb   :  { %5359 = vmatmul.mubr.msk.bf16.vlgmr.msra.gmra.mrb[68].mxu0 %vm642_vm5, %v3062_v12 }
0x11bc   :  { %5369 = vmatpush3.bf16.xpose.msra.mxu0 %v3223_v55  ;;  %5370 = vmatprep.mubr.msk.bf16.mxu0 %vm5983_vm4, %v5982_v23 }
0x11bd   :  { %5380 = vmatprep.subr.bf16.mxu0 %v5982_v23 }
0x11c3   :  { %5371 = vmatmul.mubr.msk.bf16.vlgmr.msra.gmra.mrb[72].mxu0 %vm642_vm5, %v6946_v40 }
0x11c4   :  { %5381 = vmatpush3.bf16.xpose.msra.mxu0 %v3347_v44  ;;  %5382 = vmatprep.mubr.msk.bf16.mxu0 %vm5983_vm4, %v5982_v23 }
0x11c5   :  { %5392 = vmatprep.subr.bf16.mxu0 %v5982_v23 }
0x11cb   :  { %5383 = vmatmul.mubr.msk.bf16.vlgmr.msra.gmra.mrb[76].mxu0 %vm642_vm5, %v3339_v36 }
0x11cc   :  { %5393 = vmatpush3.bf16.xpose.msra.mxu0 %v3473_v37  ;;  %5394 = vmatprep.mubr.msk.bf16.mxu0 %vm5983_vm4, %v5982_v23 }
0x11cd   :  { %5404 = vmatprep.subr.bf16.mxu0 %v5982_v23 }
0x11d3   :  { %5395 = vmatmul.mubr.msk.bf16.vlgmr.msra.gmra.mrb[80].mxu0 %vm642_vm5, %v3466_v28 }
0x11d4   :  { %5405 = vmatpush3.bf16.xpose.msra.mxu0 %v3598_v47  ;;  %5406 = vmatprep.mubr.msk.bf16.mxu0 %vm5983_vm4, %v5982_v23 }
0x11db   :  { %5407 = vmatmul.mubr.msk.bf16.vlgmr.msra.gmra.mrb[84].mxu0 %vm642_vm5, %v3591_v32 }
0x1276   :  { %v7017_v7 = vpop.f32.mrb[56].mxu0 }
0x1277   :  { %v5330_v9 = vpop.f32.mrb[57].mxu0 }
0x1278   :  { %v7019_v16 = vpop.f32.mrb[58].mxu0 }
0x1279   :  { %v5331_v1 = vpop.f32.mrb[59].mxu0 }
0x127e   :  { %v2854_v40 = vpop.f32.mrb[60].mxu0 }
0x127f   :  { %v2861_v50 = vmul.f32 0.17677669, %v2854_v40  ;;  %v5336_v41 = vpop.f32.mrb[61].mxu0 }
0x1280   :  { %v2857_v51 = vpop.f32.mrb[62].mxu0 }
0x1281   :  { %v2862_v17 = vmul.f32 0.17677669, %v2857_v51  ;;  %v5337_v43 = vpop.f32.mrb[63].mxu0  ;;  %v7022_v19 = vadd.f32 %v2861_v50, %v6362_v0 }
0x1283   :  { %v7025_v24 = vadd.f32 %v2862_v17, %v6362_v0  ;;  %v2865_v25 = vsel %vm698_vm6, %v7022_v19, -inf }
0x1284   :  { %2866 = vmax.xlane.f32.xlu1 %v2865_v25 }
0x1285   :  { %v2868_v26 = vsel %vm698_vm6, %v7025_v24, -inf }
0x1286   :  { %v2980_v49 = vpop.f32.mrb[64].mxu0  ;;  %2869 = vmax.xlane.f32.xlu0 %v2868_v26 }
0x1287   :  { %v2987_v63 = vmul.f32 0.17677669, %v2980_v49  ;;  %v5348_v18 = vpop.f32.mrb[65].mxu0 }
0x1288   :  { %v2983_v38 = vpop.f32.mrb[66].mxu0 }
0x1289   :  { %v7032_v62 = vadd.f32 %v2987_v63, %v6362_v0  ;;  %v2988_v29 = vmul.f32 0.17677669, %v2983_v38  ;;  %v5349_v39 = vpop.f32.mrb[67].mxu0 }
0x128b   :  { %v7035_v54 = vadd.f32 %v2988_v29, %v6362_v0  ;;  %v2991_v4 = vsel %vm698_vm6, %v7032_v62, -inf }
0x128c   :  { %2992 = vmax.xlane.f32.xlu0 %v2991_v4 }
0x128d   :  { %v2994_v57 = vsel %vm698_vm6, %v7035_v54, -inf }
0x128e   :  { %v3105_v30 = vpop.f32.mrb[68].mxu0  ;;  %2995 = vmax.xlane.f32.xlu1 %v2994_v57 }
0x128f   :  { %v3112_v5 = vmul.f32 0.17677669, %v3105_v30  ;;  %v5360_v15 = vpop.f32.mrb[69].mxu0 }
0x1290   :  { %v3108_v14 = vpop.f32.mrb[70].mxu0 }
0x1291   :  { %v7042_v3 = vadd.f32 %v3112_v5, %v6362_v0  ;;  %v3113_v58 = vmul.f32 0.17677669, %v3108_v14  ;;  %v5361_v27 = vpop.f32.mrb[71].mxu0 }
0x1293   :  { %v7045_v42 = vadd.f32 %v3113_v58, %v6362_v0  ;;  %v3116_v20 = vsel %vm698_vm6, %v7042_v3, -inf }
0x1294   :  { %3117 = vmax.xlane.f32.xlu0 %v3116_v20 }
0x1295   :  { %v3119_v21 = vsel %vm698_vm6, %v7045_v42, -inf }
0x1296   :  { %3120 = vmax.xlane.f32.xlu1 %v3119_v21  ;;  %v3259_v6 = vpop.f32.mrb[72].mxu0 }
0x1297   :  { %v3266_v8 = vmul.f32 0.17677669, %v3259_v6  ;;  %v5372_v22 = vpop.f32.mrb[73].mxu0 }
0x1298   :  { %v3262_v10 = vpop.f32.mrb[74].mxu0 }
0x1299   :  { %v7052_v53 = vadd.f32 %v3266_v8, %v6478_v13  ;;  %v3267_v48 = vmul.f32 0.17677669, %v3262_v10  ;;  %v5373_v34 = vpop.f32.mrb[75].mxu0 }
0x129b   :  { %v7055_v0 = vadd.f32 %v3267_v48, %v6478_v13  ;;  %v3270_v12 = vsel %vm698_vm6, %v7052_v53, -inf }
0x129c   :  { %3271 = vmax.xlane.f32.xlu0 %v3270_v12 }
0x129d   :  { %v3273_v55 = vsel %vm698_vm6, %v7055_v0, -inf }
0x129e   :  { %3274 = vmax.xlane.f32.xlu1 %v3273_v55  ;;  %v3383_v56 = vpop.f32.mrb[76].mxu0 }
0x129f   :  { %v3390_v44 = vmul.f32 0.17677669, %v3383_v56  ;;  %v5384_v59 = vpop.f32.mrb[77].mxu0 }
0x12a0   :  { %v3386_v36 = vpop.f32.mrb[78].mxu0 }
0x12a1   :  { %v7062_v37 = vadd.f32 %v3390_v44, %v6478_v13  ;;  %v3391_v61 = vmul.f32 0.17677669, %v3386_v36  ;;  %v5385_v28 = vpop.f32.mrb[79].mxu0 }
0x12a3   :  { %v7065_v47 = vadd.f32 %v3391_v61, %v6478_v13  ;;  %v3394_v32 = vsel %vm698_vm6, %v7062_v37, -inf }
0x12a4   :  { %3395 = vmax.xlane.f32.xlu0 %v3394_v32 }
0x12a5   :  { %v3397_v9 = vsel %vm698_vm6, %v7065_v47, -inf }
0x12a6   :  { %3398 = vmax.xlane.f32.xlu1 %v3397_v9  ;;  %v3509_v1 = vpop.f32.mrb[80].mxu0 }
0x12a7   :  { %v3516_v40 = vmul.f32 0.17677669, %v3509_v1  ;;  %v5396_v50 = vpop.f32.mrb[81].mxu0 }
0x12a8   :  { %v3512_v41 = vpop.f32.mrb[82].mxu0 }
0x12a9   :  { %v7072_v51 = vadd.f32 %v3516_v40, %v6478_v13  ;;  %v3517_v17 = vmul.f32 0.17677669, %v3512_v41  ;;  %v5397_v43 = vpop.f32.mrb[83].mxu0 }
0x12ab   :  { %v7075_v25 = vadd.f32 %v3517_v17, %v6478_v13  ;;  %v3520_v26 = vsel %vm698_vm6, %v7072_v51, -inf }
0x12ac   :  { %3521 = vmax.xlane.f32.xlu0 %v3520_v26 }
0x12ad   :  { %v3523_v49 = vsel %vm698_vm6, %v7075_v25, -inf }
0x12ae   :  { %3524 = vmax.xlane.f32.xlu1 %v3523_v49  ;;  %v3634_v63 = vpop.f32.mrb[84].mxu0 }
0x12af   :  { %v3641_v18 = vmul.f32 0.17677669, %v3634_v63  ;;  %v5408_v38 = vpop.f32.mrb[85].mxu0 }
0x12b0   :  { %v3637_v29 = vpop.f32.mrb[86].mxu0 }
0x12b1   :  { %v7082_v39 = vadd.f32 %v3641_v18, %v6478_v13  ;;  %v3642_v4 = vmul.f32 0.17677669, %v3637_v29  ;;  %v5409_v57 = vpop.f32.mrb[87].mxu0 }
0x12b3   :  { %v7085_v30 = vadd.f32 %v3642_v4, %v6478_v13  ;;  %v3645_v5 = vsel %vm698_vm6, %v7082_v39, -inf }
0x12b4   :  { %3646 = vmax.xlane.f32.xlu0 %v3645_v5 }
0x12b5   :  { %v3648_v15 = vsel %vm698_vm6, %v7085_v30, -inf }
0x12b6   :  { %3649 = vmax.xlane.f32.xlu1 %v3648_v15 }
0x12c7   :  { %3014 = vrot.lane.b32.xlu1 %v6952_v52, %s5985_s28 }
0x12ca   :  { %2889 = vrot.lane.b32.xlu0 %v6952_v52, %s5984_s26 }
0x1311   :  { %v2867_v14 = vpop.xlane.xlu1 %2866 }
0x1312   :  { %v2871_v58 = vsub.f32 %v7022_v19, %v2867_v14 }
0x1313   :  { %v2870_v27 = vpop.xlane.xlu0 %2869 }
0x1314   :  { %v2873_v13 = vmul.f32 1.442695, %v2871_v58  ;;  %v2872_v20 = vsub.f32 %v7025_v24, %v2870_v27 }
0x1316   :  { %5868 = vpow2.f32 %v2873_v13  ;;  %v2875_v21 = vmul.f32 1.442695, %v2872_v20 }
0x1318   :  { %5870 = vpow2.f32 %v2875_v21 }
0x1319   :  { %v2993_v6 = vpop.xlane.xlu0 %2992 }
0x131a   :  { %v2997_v8 = vsub.f32 %v7032_v62, %v2993_v6 }
0x131b   :  { %v2996_v22 = vpop.xlane.xlu1 %2995 }
0x131c   :  { %v2999_v10 = vmul.f32 1.442695, %v2997_v8  ;;  %v2998_v48 = vsub.f32 %v7035_v54, %v2996_v22 }
0x131e   :  { %5872 = vpow2.f32 %v2999_v10  ;;  %v3001_v34 = vmul.f32 1.442695, %v2998_v48 }
0x1320   :  { %v7099_v12 = vpop.eup %5868  ;;  %5874 = vpow2.f32 %v3001_v34 }
0x1321   :  { %v3118_v19 = vpop.xlane.xlu0 %3117  ;;  %v2877_v55 = vsel %vm698_vm6, %v7099_v12, 0.0 }
0x1322   :  { %v7103_v24 = vpop.eup %5870  ;;  %v3122_v56 = vsub.f32 %v7042_v3, %v3118_v19  ;;  %2878 = vadd.xlane.f32.xlu0 %v2877_v55 }
0x1323   :  { %v3121_v44 = vpop.xlane.xlu1 %3120  ;;  %v2880_v62 = vsel %vm698_vm6, %v7103_v24, 0.0 }
0x1324   :  { %v3124_v59 = vmul.f32 1.442695, %v3122_v56  ;;  %v3123_v54 = vsub.f32 %v7045_v42, %v3121_v44  ;;  %2881 = vadd.xlane.f32.xlu1 %v2880_v62 }
0x1326   :  { %5876 = vpow2.f32 %v3124_v59  ;;  %v3126_v36 = vmul.f32 1.442695, %v3123_v54 }
0x1328   :  { %v7109_v61 = vpop.eup %5872  ;;  %5878 = vpow2.f32 %v3126_v36 }
0x1329   :  { %v3272_v28 = vpop.xlane.xlu0 %3271  ;;  %v3003_v32 = vsel %vm698_vm6, %v7109_v61, 0.0 }
0x132a   :  { %v7113_v9 = vpop.eup %5874  ;;  %v3276_v3 = vsub.f32 %v7052_v53, %v3272_v28  ;;  %3004 = vadd.xlane.f32.xlu0 %v3003_v32 }
0x132b   :  { %v3275_v1 = vpop.xlane.xlu1 %3274  ;;  %v3006_v40 = vsel %vm698_vm6, %v7113_v9, 0.0 }
0x132c   :  { %v3278_v42 = vmul.f32 1.442695, %v3276_v3  ;;  %v3277_v50 = vsub.f32 %v7055_v0, %v3275_v1  ;;  %3007 = vadd.xlane.f32.xlu1 %v3006_v40 }
0x132e   :  { %5880 = vpow2.f32 %v3278_v42  ;;  %v3280_v41 = vmul.f32 1.442695, %v3277_v50 }
0x1330   :  { %v7119_v17 = vpop.eup %5876  ;;  %5882 = vpow2.f32 %v3280_v41 }
0x1331   :  { %v3396_v43 = vpop.xlane.xlu0 %3395  ;;  %v3128_v26 = vsel %vm698_vm6, %v7119_v17, 0.0 }
0x1332   :  { %v7123_v49 = vpop.eup %5878  ;;  %v3400_v53 = vsub.f32 %v7062_v37, %v3396_v43  ;;  %3129 = vadd.xlane.f32.xlu0 %v3128_v26 }
0x1333   :  { %v3399_v63 = vpop.xlane.xlu1 %3398  ;;  %v3131_v18 = vsel %vm698_vm6, %v7123_v49, 0.0 }
0x1334   :  { %v3402_v0 = vmul.f32 1.442695, %v3400_v53  ;;  %v3401_v38 = vsub.f32 %v7065_v47, %v3399_v63  ;;  %3132 = vadd.xlane.f32.xlu1 %v3131_v18 }
0x1336   :  { %5884 = vpow2.f32 %v3402_v0  ;;  %v3404_v29 = vmul.f32 1.442695, %v3401_v38 }
0x1338   :  { %v7129_v4 = vpop.eup %5880  ;;  %5886 = vpow2.f32 %v3404_v29 }
0x1339   :  { %v3282_v57 = vsel %vm698_vm6, %v7129_v4, 0.0  ;;  %v3522_v47 = vpop.xlane.xlu0 %3521 }
0x133a   :  { %v7133_v5 = vpop.eup %5882  ;;  %3283 = vadd.xlane.f32.xlu0 %v3282_v57  ;;  %v3526_v62 = vsub.f32 %v7072_v51, %v3522_v47 }
0x133b   :  { %v3525_v37 = vpop.xlane.xlu1 %3524  ;;  %v3285_v15 = vsel %vm698_vm6, %v7133_v5, 0.0 }
0x133c   :  { %v3527_v14 = vsub.f32 %v7075_v25, %v3525_v37  ;;  %3286 = vadd.xlane.f32.xlu1 %v3285_v15  ;;  %v3528_v59 = vmul.f32 1.442695, %v3526_v62 }
0x133e   :  { %v3530_v58 = vmul.f32 1.442695, %v3527_v14 }
0x1340   :  { %v7138_v27 = vpop.eup %5884  ;;  %5888 = vpow2.f32 %v3530_v58 }
0x1341   :  { %v3647_v13 = vpop.xlane.xlu0 %3646  ;;  %v3406_v20 = vsel %vm698_vm6, %v7138_v27, 0.0 }
0x1342   :  { %v7142_v21 = vpop.eup %5886  ;;  %v3651_v6 = vsub.f32 %v7082_v39, %v3647_v13  ;;  %3407 = vadd.xlane.f32.xlu1 %v3406_v20 }
0x1343   :  { %v3650_v8 = vpop.xlane.xlu1 %3649  ;;  %v3409_v48 = vsel %vm698_vm6, %v7142_v21, 0.0 }
0x1344   :  { %v3653_v22 = vmul.f32 1.442695, %v3651_v6  ;;  %v3652_v10 = vsub.f32 %v7085_v30, %v3650_v8 }
0x1345   :  { %v2890_v25 = vpop.permute.xlu0 %2889 }
0x1346   :  { %5890 = vpow2.f32 %v3653_v22  ;;  %v3655_v34 = vmul.f32 1.442695, %v3652_v10  ;;  %5339 = vmatpush3.bf16.msra.mxu1 %v2890_v25  ;;  %3410 = vadd.xlane.f32.xlu1 %v3409_v48 }
0x1347   :  { %5350 = vmatprep.subr.bf16.mxu1 %v5982_v23  ;;  %v3015_v36 = vpop.permute.xlu1 %3014 }
0x1348   :  { %5892 = vpow2.f32 %v3655_v34 }
0x1349   :  { %5894 = vpow2.f32 %v3528_v59 }
0x134a   :  { %v7149_v19 = vpop.eup %5888 }
0x134b   :  { %v3535_v39 = vsel %vm698_vm6, %v7149_v19, 0.0 }
0x134c   :  { %3536 = vadd.xlane.f32.xlu1 %v3535_v39 }
0x1350   :  { %v7153_v55 = vpop.eup %5890  ;;  %3139 = vrot.lane.b32.xlu0 %v6952_v52, %s5986_s2 }
0x1351   :  { %v3657_v30 = vsel %vm698_vm6, %v7153_v55, 0.0 }
0x1352   :  { %v7159_v56 = vpop.eup %5892  ;;  %3658 = vadd.xlane.f32.xlu1 %v3657_v30 }
0x1353   :  { %v3660_v44 = vsel %vm698_vm6, %v7159_v56, 0.0  ;;  %v7166_v54 = vpop.eup %5894 }
0x1354   :  { %v3532_v52 = vsel %vm698_vm6, %v7166_v54, 0.0 }
0x1356   :  { %3661 = vadd.xlane.f32.xlu1 %v3660_v44 }
0x1367   :  { %3418 = vrot.lane.b32.xlu1 %v6948_v31, %s5984_s26 }
0x136f   :  { %3533 = vadd.xlane.f32.xlu0 %v3532_v52 }
0x1385   :  { %3543 = vrot.lane.b32.xlu0 %v6948_v31, %s5985_s28 }
0x1389   :  { %3668 = vrot.lane.b32.xlu0 %v6948_v31, %s5986_s2 }
0x13af   :  { %v2879_v28 = vpop.xlane.xlu0 %2878 }
0x13b0   :  { %5896 = vrcp.f32 %v2879_v28 }
0x13b1   :  { %v2882_v51 = vpop.xlane.xlu1 %2881 }
0x13b2   :  { %5898 = vrcp.f32 %v2882_v51 }
0x13b7   :  { %v3005_v32 = vpop.xlane.xlu0 %3004 }
0x13b8   :  { %5900 = vrcp.f32 %v3005_v32 }
0x13b9   :  { %v3008_v3 = vpop.xlane.xlu1 %3007 }
0x13ba   :  { %v5897_v1 = vpop.eup %5896  ;;  %5902 = vrcp.f32 %v3008_v3 }
0x13bb   :  { %v2885_v42 = vmul.f32 %v5897_v1, %v7099_v12 }
0x13bc   :  { %v5899_v40 = vpop.eup %5898 }
0x13bd   :  { %v2886_v50 = vmul.f32 %v5899_v40, %v7103_v24 }
0x13bf   :  { %v3130_v41 = vpop.xlane.xlu0 %3129  ;;  %v2887_v43 = vpack.c.bf16 %v2886_v50, %v2885_v42 }
0x13c0   :  { %5904 = vrcp.f32 %v3130_v41 }
0x13c1   :  { %5341 = vmatmul.mubr.msk.bf16.vlgmr.msra.gmra.mrb[60].mxu1 %vm698_vm6, %v2887_v43  ;;  %v3133_v26 = vpop.xlane.xlu1 %3132 }
0x13c2   :  { %v5901_v53 = vpop.eup %5900  ;;  %5351 = vmatpush3.bf16.msra.mxu1 %v3015_v36  ;;  %5906 = vrcp.f32 %v3133_v26  ;;  %5352 = vmatprep.mubr.msk.bf16.mxu1 %vm5983_vm4, %v5982_v23 }
0x13c3   :  { %5362 = vmatprep.subr.bf16.mxu1 %v5982_v23  ;;  %v3011_v18 = vmul.f32 %v5901_v53, %v7109_v61 }
0x13c4   :  { %v5903_v63 = vpop.eup %5902 }
0x13c5   :  { %v3012_v12 = vmul.f32 %v5903_v63, %v7113_v9 }
0x13c7   :  { %v3284_v24 = vpop.xlane.xlu0 %3283  ;;  %v3013_v0 = vpack.c.bf16 %v3012_v12, %v3011_v18 }
0x13c8   :  { %5908 = vrcp.f32 %v3284_v24 }
0x13c9   :  { %5353 = vmatmul.mubr.msk.bf16.vlgmr.msra.gmra.mrb[64].mxu1 %vm698_vm6, %v3013_v0  ;;  %v3287_v38 = vpop.xlane.xlu1 %3286 }
0x13ca   :  { %v5905_v29 = vpop.eup %5904  ;;  %5910 = vrcp.f32 %v3287_v38  ;;  %5364 = vmatprep.mubr.msk.bf16.mxu1 %vm5983_vm4, %v5982_v23 }
0x13cb   :  { %v3140_v57 = vpop.permute.xlu0 %3139  ;;  %v3136_v15 = vmul.f32 %v5905_v29, %v7119_v17  ;;  %v5692_v29 = vld [vmem:[%s7562_s10 + $0x40] sm:$0xff]  }
0x13cc   :  { %v5907_v37 = vpop.eup %5906  ;;  %5363 = vmatpush3.bf16.msra.mxu1 %v3140_v57  ;;  %v5693_v57 = vld [vmem:[%s7562_s10 + $0x48] sm:$0xff]   ;;  %5416 = vmatprep.subr.bf16.mxu0 %v5692_v29 }
0x13cd   :  { %v3137_v61 = vmul.f32 %v5907_v37, %v7123_v49  ;;  %5374 = vmatprep.subr.bf16.mxu1 %v5982_v23  ;;  %5417 = vmatpush3.bf16.msra.mxu0 %v5692_v29  ;;  %v5694_v37 = vld [vmem:[%s7562_s10 + $0x50] sm:$0xff]  }
0x13ce   :  { %5418 = vmatprep.subr.bf16.mxu0 %v5693_v57 }
0x13cf   :  { %v3408_v9 = vpop.xlane.xlu1 %3407  ;;  %v3138_v14 = vpack.c.bf16 %v3137_v61, %v3136_v15 }
0x13d1   :  { %5365 = vmatmul.mubr.msk.bf16.vlgmr.msra.gmra.mrb[68].mxu1 %vm698_vm6, %v3138_v14  ;;  %5419 = vmatpush3.bf16.msra.mxu0 %v5693_v57  ;;  %v5695_v14 = vld [vmem:[%s7562_s10 + $0x58] sm:$0xff]   ;;  %v4863_v57 = vld [vmem:[%s7563_s11 + $0x1] ss:$0 sm:$0xff] }
0x13d2   :  { %v5909_v47 = vpop.eup %5908  ;;  %5375 = vmatpush3.bf16.msra.mxu1 %v6948_v31  ;;  %5376 = vmatprep.mubr.msk.bf16.mxu1 %vm5983_vm4, %v5982_v23 }
0x13d3   :  { %5386 = vmatprep.subr.bf16.mxu1 %v5982_v23  ;;  %v3290_v13 = vmul.f32 %v5909_v47, %v7129_v4  ;;  %v3411_v49 = vpop.xlane.xlu1 %3410  ;;  %5420 = vmatprep.subr.bf16.mxu0 %v5694_v37 }
0x13d4   :  { %v5911_v58 = vpop.eup %5910  ;;  %5912 = vrcp.f32 %v3411_v49  ;;  %v5698_v49 = vld [vmem:[%s7562_s10 + $0x70] sm:$0xff]  }
0x13d5   :  { %v3291_v17 = vmul.f32 %v5911_v58, %v7133_v5  ;;  %5914 = vrcp.f32 %v3408_v9  ;;  %5421 = vmatpush3.bf16.msra.mxu0 %v5694_v37 }
0x13d6   :  { %5422 = vmatprep.subr.bf16.mxu0 %v5695_v14 }
0x13d7   :  { %v3292_v20 = vpack.c.bf16 %v3291_v17, %v3290_v13  ;;  %v5696_v13 = vld [vmem:[%s7562_s10 + $0x60] sm:$0xff]   ;;  %v5697_v17 = vld [vmem:[%s7562_s10 + $0x68] sm:$0xff]  }
0x13d9   :  { %5377 = vmatmul.mubr.msk.bf16.vlgmr.msra.gmra.mrb[72].mxu1 %vm698_vm6, %v3292_v20  ;;  %v3537_v31 = vpop.xlane.xlu1 %3536  ;;  %5423 = vmatpush3.bf16.msra.mxu0 %v5695_v14 }
0x13da   :  { %5388 = vmatprep.mubr.msk.bf16.mxu1 %vm5983_vm4, %v5982_v23  ;;  %5916 = vrcp.f32 %v3537_v31  ;;  %5424 = vmatprep.subr.bf16.mxu0 %v5696_v13  ;;  %v5699_v31 = vld [vmem:[%s7562_s10 + $0x78] sm:$0xff]  }
0x13dd   :  { %5425 = vmatpush3.bf16.msra.mxu0 %v5696_v13 }
0x13de   :  { %v5913_v8 = vpop.eup %5912  ;;  %5426 = vmatprep.subr.bf16.mxu0 %v5697_v17 }
0x13df   :  { %v3659_v6 = vpop.xlane.xlu1 %3658  ;;  %v5915_v10 = vpop.eup %5914  ;;  %v3415_v25 = vmul.f32 %v5913_v8, %v7142_v21 }
0x13e0   :  { %v3414_v4 = vmul.f32 %v5915_v10, %v7138_v27 }
0x13e1   :  { %5427 = vmatpush3.bf16.msra.mxu0 %v5697_v17 }
0x13e2   :  { %v3416_v5 = vpack.c.bf16 %v3415_v25, %v3414_v4  ;;  %5428 = vmatprep.subr.bf16.mxu0 %v5698_v49 }
0x13e3   :  { %v3662_v22 = vpop.xlane.xlu1 %3661 }
0x13e4   :  { %v5917_v27 = vpop.eup %5916 }
0x13e5   :  { %v3541_v30 = vmul.f32 %v5917_v27, %v7149_v19  ;;  %5429 = vmatpush3.bf16.msra.mxu0 %v5698_v49 }
0x13e6   :  { %5430 = vmatprep.subr.bf16.mxu0 %v5699_v31 }
0x13e7   :  { %v3419_v48 = vpop.permute.xlu1 %3418 }
0x13e8   :  { %5387 = vmatpush3.bf16.msra.mxu1 %v3419_v48 }
0x13e9   :  { %5398 = vmatprep.subr.bf16.mxu1 %v5982_v23  ;;  %5431 = vmatpush3.bf16.msra.mxu0 %v5699_v31 }
0x13eb   :  { %5389 = vmatmul.mubr.msk.bf16.vlgmr.msra.gmra.mrb[76].mxu1 %vm698_vm6, %v3416_v5 }
0x13ec   :  { %5400 = vmatprep.mubr.msk.bf16.mxu1 %vm5983_vm4, %v5982_v23 }
0x13fc   :  { %v3534_v34 = vpop.xlane.xlu0 %3533 }
0x13fd   :  { %5918 = vrcp.f32 %v3534_v34 }
0x13fe   :  { %5920 = vrcp.f32 %v3662_v22 }
0x13ff   :  { %5922 = vrcp.f32 %v3659_v6 }
0x1400   :  { %v3544_v39 = vpop.permute.xlu0 %3543 }
0x1401   :  { %5399 = vmatpush3.bf16.msra.mxu1 %v3544_v39 }
0x1402   :  { %5410 = vmatprep.subr.bf16.mxu1 %v5982_v23 }
0x1404   :  { %v3669_v52 = vpop.permute.xlu0 %3668 }
0x1407   :  { %v5919_v21 = vpop.eup %5918 }
0x1408   :  { %v3540_v44 = vmul.f32 %v5919_v21, %v7166_v54  ;;  %v5921_v59 = vpop.eup %5920 }
0x1409   :  { %v5923_v36 = vpop.eup %5922  ;;  %v3666_v28 = vmul.f32 %v5921_v59, %v7159_v56 }
0x140a   :  { %v3542_v62 = vpack.c.bf16 %v3541_v30, %v3540_v44  ;;  %v3665_v51 = vmul.f32 %v5923_v36, %v7153_v55 }
0x140c   :  { %5401 = vmatmul.mubr.msk.bf16.vlgmr.msra.gmra.mrb[80].mxu1 %vm698_vm6, %v3542_v62  ;;  %v3667_v32 = vpack.c.bf16 %v3666_v28, %v3665_v51 }
0x140d   :  { %5411 = vmatpush3.bf16.msra.mxu1 %v3669_v52  ;;  %5412 = vmatprep.mubr.msk.bf16.mxu1 %vm5983_vm4, %v5982_v23 }
0x1414   :  { %5413 = vmatmul.mubr.msk.bf16.vlgmr.msra.gmra.mrb[84].mxu1 %vm698_vm6, %v3667_v32 }
0x1415   :  { %4043 = vmatprep.mubr.bf16.mxu1 %v5980_v2 }
0x1494   :  { %v2929_v19 = vpop.f32.mrb[60].mxu1 }
0x1495   :  { %v5342_v54 = vpop.f32.mrb[61].mxu1 }
0x1496   :  { %v2932_v3 = vpop.f32.mrb[62].mxu1 }
0x1497   :  { %v5550_v1 = vpack.i.bf16 %v2932_v3, %v2929_v19  ;;  %v5343_v40 = vpop.f32.mrb[63].mxu1 }
0x1499   :  { %5551 = vrot.lane.b32.xlu0 %v5550_v1, %s5986_s2 }
0x149c   :  { %v3054_v42 = vpop.f32.mrb[64].mxu1 }
0x149d   :  { %v5354_v50 = vpop.f32.mrb[65].mxu1 }
0x149e   :  { %v3057_v41 = vpop.f32.mrb[66].mxu1 }
0x149f   :  { %v5555_v43 = vpack.i.bf16 %v3057_v41, %v3054_v42  ;;  %v5355_v26 = vpop.f32.mrb[67].mxu1 }
0x14a1   :  { %5556 = vrot.lane.b32.xlu0 %v5555_v43, %s5985_s28 }
0x14a4   :  { %v3179_v55 = vpop.f32.mrb[68].mxu1 }
0x14a5   :  { %v5366_v56 = vpop.f32.mrb[69].mxu1 }
0x14a6   :  { %v3182_v53 = vpop.f32.mrb[70].mxu1 }
0x14a7   :  { %v5560_v63 = vpack.i.bf16 %v3182_v53, %v3179_v55  ;;  %v5367_v18 = vpop.f32.mrb[71].mxu1 }
0x14a9   :  { %5561 = vrot.lane.b32.xlu0 %v5560_v63, %s5984_s26 }
0x14ac   :  { %v7217_v12 = vpop.f32.mrb[72].mxu1 }
0x14ad   :  { %v5378_v24 = vpop.f32.mrb[73].mxu1 }
0x14ae   :  { %v7219_v0 = vpop.f32.mrb[74].mxu1 }
0x14af   :  { %v5379_v38 = vpop.f32.mrb[75].mxu1 }
0x14be   :  { %v3458_v15 = vpop.f32.mrb[76].mxu1 }
0x14bf   :  { %v5390_v61 = vpop.f32.mrb[77].mxu1 }
0x14c0   :  { %v3461_v9 = vpop.f32.mrb[78].mxu1 }
0x14c1   :  { %v5565_v47 = vpack.i.bf16 %v3461_v9, %v3458_v15  ;;  %v5391_v58 = vpop.f32.mrb[79].mxu1 }
0x14c3   :  { %5566 = vrot.lane.b32.xlu1 %v5565_v47, %s5986_s2 }
0x14df   :  { %v3583_v20 = vpop.f32.mrb[80].mxu1 }
0x14e0   :  { %v5402_v6 = vpop.f32.mrb[81].mxu1 }
0x14e1   :  { %v3586_v8 = vpop.f32.mrb[82].mxu1 }
0x14e2   :  { %v5570_v22 = vpack.i.bf16 %v3586_v8, %v3583_v20  ;;  %v5403_v10 = vpop.f32.mrb[83].mxu1  ;;  %v5700_v20 = vld [vmem:[%s7566_s14 + $0x80] ss:$8 sps:$4 sm:$0xff]  }
0x14e4   :  { %5571 = vrot.lane.b32.xlu1 %v5570_v22, %s5985_s28 }
0x14e7   :  { %v3708_v25 = vpop.f32.mrb[84].mxu1 }
0x14e8   :  { %v5414_v4 = vpop.f32.mrb[85].mxu1 }
0x14e9   :  { %v3711_v48 = vpop.f32.mrb[86].mxu1 }
0x14ea   :  { %v5575_v5 = vpack.i.bf16 %v3711_v48, %v3708_v25  ;;  %v5415_v34 = vpop.f32.mrb[87].mxu1 }
0x14ec   :  { %5576 = vrot.lane.b32.xlu0 %v5575_v5, %s5984_s26 }
0x150b   :  { %v5552_v39 = vpop.permute.xlu0 %5551 }
0x150c   :  { %v5554_v21 = vunpack.i.h.bf16 %v5552_v39  ;;  %v5553_v30 = vunpack.i.l.bf16 %v5552_v39 }
0x150e   :  { %v3211_v52 = vsel %vm642_vm5, %v7019_v16, %v5554_v21  ;;  %v3210_v36 = vsel %vm642_vm5, %v7017_v7, %v5553_v30 }
0x1513   :  { %v5557_v27 = vpop.permute.xlu0 %5556 }
0x1514   :  { %v5559_v44 = vunpack.i.h.bf16 %v5557_v27  ;;  %v5558_v62 = vunpack.i.l.bf16 %v5557_v27 }
0x1516   :  { %v3213_v32 = vsel %vm1170_vm7, %v3211_v52, %v5559_v44  ;;  %v3212_v19 = vsel %vm1170_vm7, %v3210_v36, %v5558_v62  ;;  %v5708_v62 = vld [vmem:[%s7566_s14 + $0xa4] ss:$8 sps:$4 sm:$0xff]   ;;  %v5711_v52 = vld [vmem:[%s7566_s14 + $0xb4] ss:$8 sps:$4 sm:$0xff]   ;;  %v5709_v36 = vld [vmem:[%s7566_s14 + $0xb0] ss:$8 sps:$4 sm:$0xff]  }
0x151b   :  { %v5562_v59 = vpop.permute.xlu0 %5561 }
0x151c   :  { %v5564_v28 = vunpack.i.h.bf16 %v5562_v59  ;;  %v5563_v51 = vunpack.i.l.bf16 %v5562_v59  ;;  %v5706_v59 = vld [vmem:[%s7566_s14 + $0xa0] ss:$8 sps:$4 sm:$0xff]  }
0x151e   :  { %v3214_v54 = vsel %vm1173_vm8, %v3212_v19, %v5563_v51  ;;  %v3215_v3 = vsel %vm1173_vm8, %v3213_v32, %v5564_v28  ;;  %v5714_v28 = vld [vmem:[%s7566_s14 + $0xc4] ss:$8 sps:$4 sm:$0xff]   ;;  %v5712_v51 = vld [vmem:[%s7566_s14 + $0xc0] ss:$8 sps:$4 sm:$0xff]   ;;  %v5717_v32 = vld [vmem:[%s7566_s14 + $0xd4] ss:$8 sps:$4 sm:$0xff]  }
0x151f   :  { %v3745_v1 = vpack.c.bf16 %v3215_v3, %v3214_v54  ;;  %v5715_v19 = vld [vmem:[%s7566_s14 + $0xd0] ss:$8 sps:$4 sm:$0xff]   ;;  %v5720_v54 = vld [vmem:[%s7566_s14 + $0xe4] ss:$8 sps:$4 sm:$0xff]   ;;  %v5718_v3 = vld [vmem:[%s7566_s14 + $0xe0] ss:$8 sps:$4 sm:$0xff]  }
0x1521   :  { %5432 = vmatprep.mubr.bf16.mxu0 %v3745_v1  ;;  %v5723_v1 = vld [vmem:[%s7566_s14 + $0xf4] ss:$8 sps:$4 sm:$0xff]  }
0x1535   :  { %v5567_v40 = vpop.permute.xlu1 %5566 }
0x1536   :  { %v5569_v50 = vunpack.i.h.bf16 %v5567_v40  ;;  %v5568_v41 = vunpack.i.l.bf16 %v5567_v40  ;;  %v5721_v40 = vld [vmem:[%s7566_s14 + $0xf0] ss:$8 sps:$4 sm:$0xff]  }
0x1538   :  { %v3740_v7 = vsel %vm642_vm5, %v7219_v0, %v5569_v50  ;;  %v3739_v55 = vsel %vm642_vm5, %v7217_v12, %v5568_v41 }
0x1556   :  { %v5572_v42 = vpop.permute.xlu1 %5571 }
0x1557   :  { %v5574_v16 = vunpack.i.h.bf16 %v5572_v42  ;;  %v5573_v43 = vunpack.i.l.bf16 %v5572_v42 }
0x1559   :  { %v3742_v63 = vsel %vm1170_vm7, %v3740_v7, %v5574_v16  ;;  %v3741_v18 = vsel %vm1170_vm7, %v3739_v55, %v5573_v43 }
0x155e   :  { %v5577_v26 = vpop.permute.xlu0 %5576 }
0x155f   :  { %v5579_v56 = vunpack.i.h.bf16 %v5577_v26  ;;  %v5578_v53 = vunpack.i.l.bf16 %v5577_v26 }
0x1561   :  { %v3744_v24 = vsel %vm1173_vm8, %v3742_v63, %v5579_v56  ;;  %v3743_v38 = vsel %vm1173_vm8, %v3741_v18, %v5578_v53 }
0x1562   :  { %v3746_v29 = vpack.c.bf16 %v3744_v24, %v3743_v38  ;;  %v4872_v38 = vld [vmem:[%s7564_s12 + $0x1] ss:$0 sm:$0xff] }
0x1564   :  { %5433 = vmatmul.mubr.bf16.vlgmr.msra.gmra.mrb[88].mxu0 %v3746_v29 }
0x1637   :  { %v5434_v0 = vpop.f32.mrb[88].mxu0 }
0x1638   :  { %v3835_v37 = vpop.f32.mrb[89].mxu0  ;;  %v3844_v58 = vadd.f32 %v5434_v0, %v4863_v57 }
0x1639   :  { %v3836_v15 = vadd.f32 %v4863_v57, %v3835_v37  ;;  %v5435_v12 = vpop.f32.mrb[90].mxu0 }
0x163a   :  { %v3838_v61 = vpop.f32.mrb[91].mxu0  ;;  %v3847_v14 = vadd.f32 %v5435_v12, %v4863_v57  ;;  %v3852_v49 = vadd.f32 %v3844_v58, %v6924_v11  ;;  %v5703_v11 = vld [vmem:[%s7566_s14 + $0x90] ss:$8 sps:$4 sm:$0xff]  }
0x163b   :  { %v3850_v9 = vadd.f32 %v3836_v15, %v6898_v46  ;;  %v3839_v47 = vadd.f32 %v4863_v57, %v3838_v61  ;;  %v5702_v46 = vld [vmem:[%s7566_s14 + $0x84] ss:$8 sps:$4 sm:$0xff]   ;;  %v4873_v15 = vld [vmem:[%s7565_s13 + $0x1] ss:$0 sm:$0xff] }
0x163c   :  { %v3853_v17 = vadd.f32 %v3847_v14, %v6926_v45  ;;  %4011 = vmatprep.subr.bf16.mxu1 %v5702_v46 }
0x163d   :  { %v3851_v13 = vadd.f32 %v3839_v47, %v6900_v60  ;;  %3854 = vadd.xlane.f32.xlu1 %v3850_v9  ;;  %v5705_v60 = vld [vmem:[%s7566_s14 + $0x94] ss:$8 sps:$4 sm:$0xff]   ;;  %4012 = vmatpush1.bf16.msra.mxu1 %v5700_v20 }
0x163e   :  { %4013 = vmatprep.subr.bf16.mxu1 %v5705_v60 }
0x163f   :  { %3856 = vadd.xlane.f32.xlu0 %v3851_v13 }
0x1641   :  { %3860 = vadd.xlane.f32.xlu1 %v3853_v17  ;;  %4014 = vmatpush1.bf16.msra.mxu1 %v5703_v11 }
0x1642   :  { %4015 = vmatprep.subr.bf16.mxu1 %v5708_v62 }
0x1643   :  { %3858 = vadd.xlane.f32.xlu0 %v3852_v49 }
0x1645   :  { %4016 = vmatpush1.bf16.msra.mxu1 %v5706_v59 }
0x1646   :  { %4017 = vmatprep.subr.bf16.mxu1 %v5711_v52 }
0x1649   :  { %4018 = vmatpush1.bf16.msra.mxu1 %v5709_v36 }
0x164a   :  { %4019 = vmatprep.subr.bf16.mxu1 %v5714_v28 }
0x164d   :  { %4020 = vmatpush1.bf16.msra.mxu1 %v5712_v51 }
0x164e   :  { %4021 = vmatprep.subr.bf16.mxu1 %v5717_v32 }
0x1651   :  { %4022 = vmatpush1.bf16.msra.mxu1 %v5715_v19 }
0x1652   :  { %4023 = vmatprep.subr.bf16.mxu1 %v5720_v54 }
0x1655   :  { %4024 = vmatpush1.bf16.msra.mxu1 %v5718_v3 }
0x1656   :  { %4025 = vmatprep.subr.bf16.mxu1 %v5723_v1 }
0x1659   :  { %4026 = vmatpush1.bf16.msra.mxu1 %v5721_v40 }
0x165a   :  { %5436 = vmatprep.subr.bf16.mxu1 %v5982_v23 }
0x16ca   :  { %v3855_v45 = vpop.xlane.xlu1 %3854 }
0x16cb   :  { %v3862_v31 = vmul.f32 0.0078125, %v3855_v45  ;;  %v5724_v45 = vld [vmem:[%s7568_s16 + $0xc0] sm:$0xff]  }
0x16cc   :  { %v3857_v6 = vpop.xlane.xlu0 %3856  ;;  %5079 = vmatprep.subr.bf16.mxu0 %v5724_v45 }
0x16cd   :  { %v3866_v8 = vsub.f32 %v3850_v9, %v3862_v31  ;;  %v3863_v22 = vmul.f32 0.0078125, %v3857_v6  ;;  %v5725_v31 = vld [vmem:[%s7568_s16 + $0x80] sm:$0xff]   ;;  %v5727_v6 = vld [vmem:[%s7568_s16 + $0x88] sm:$0xff]  }
0x16ce   :  { %v3861_v10 = vpop.xlane.xlu1 %3860  ;;  %5080 = vmatpush3.bf16.msra.mxu0 %v5725_v31 }
0x16cf   :  { %v3867_v25 = vsub.f32 %v3851_v13, %v3863_v22  ;;  %v3865_v4 = vmul.f32 0.0078125, %v3861_v10  ;;  %v3870_v48 = vmul.f32 %v3866_v8, %v3866_v8  ;;  %v5729_v22 = vld [vmem:[%s7568_s16 + $0x90] sm:$0xff]   ;;  %v5730_v10 = vld [vmem:[%s7568_s16 + $0xd8] sm:$0xff]  }
0x16d0   :  { %v3859_v5 = vpop.xlane.xlu0 %3858 }
0x16d1   :  { %v7283_v34 = vsub.f32 %v3853_v17, %v3865_v4  ;;  %v3864_v39 = vmul.f32 0.0078125, %v3859_v5  ;;  %3874 = vadd.xlane.f32.xlu0 %v3870_v48  ;;  %v3871_v27 = vmul.f32 %v3867_v25, %v3867_v25  ;;  %v5732_v4 = vld [vmem:[%s7568_s16 + $0xe0] sm:$0xff]   ;;  %v5734_v5 = vld [vmem:[%s7568_s16 + $0xe8] sm:$0xff]  }
0x16d2   :  { %v5733_v48 = vld [vmem:[%s7568_s16 + $0xa0] sm:$0xff]  }
0x16d3   :  { %v3868_v21 = vsub.f32 %v3852_v49, %v3864_v39  ;;  %3876 = vadd.xlane.f32.xlu1 %v3871_v27  ;;  %v3873_v44 = vmul.f32 %v7283_v34, %v7283_v34  ;;  %v5736_v39 = vld [vmem:[%s7568_s16 + $0xf0] sm:$0xff]  }
0x16d4   :  { %v5737_v27 = vld [vmem:[%s7568_s16 + $0xb0] sm:$0xff]  }
0x16d5   :  { %v3872_v30 = vmul.f32 %v3868_v21, %v3868_v21 }
0x16d7   :  { %3878 = vadd.xlane.f32.xlu0 %v3872_v30  ;;  %3880 = vadd.xlane.f32.xlu1 %v3873_v44  ;;  %v5739_v30 = vld [vmem:[%s7568_s16 + $0xb8] sm:$0xff]   ;;  %v4787_v44 = vld [vmem:[%s7567_s15 + $0x2] sm:$0x3] }
0x16d8   :  { %v3924_v62 = vrot.slane %v4787_v44, %v6291_v33  ;;  %v3928_v59 = vrot.slane %v4787_v44, %v6294_v35 }
0x175e   :  { %v3875_v42 = vpop.xlane.xlu0 %3874 }
0x175f   :  { %v3882_v50 = vmul.f32 0.0078125, %v3875_v42 }
0x1760   :  { %v3877_v41 = vpop.xlane.xlu1 %3876 }
0x1761   :  { %v3886_v16 = vadd.f32 1e-12, %v3882_v50  ;;  %v3883_v43 = vmul.f32 0.0078125, %v3877_v41 }
0x1763   :  { %5924 = vrsqrt.f32 %v3886_v16  ;;  %v3887_v26 = vadd.f32 1e-12, %v3883_v43 }
0x1764   :  { %v3879_v7 = vpop.xlane.xlu0 %3878  ;;  %v3881_v55 = vpop.xlane.xlu1 %3880 }
0x1765   :  { %5926 = vrsqrt.f32 %v3887_v26  ;;  %v3884_v56 = vmul.f32 0.0078125, %v3879_v7  ;;  %v3885_v53 = vmul.f32 0.0078125, %v3881_v55 }
0x1767   :  { %v3888_v63 = vadd.f32 1e-12, %v3884_v56  ;;  %v3889_v18 = vadd.f32 1e-12, %v3885_v53 }
0x1769   :  { %5928 = vrsqrt.f32 %v3888_v63 }
0x176a   :  { %5930 = vrsqrt.f32 %v3889_v18 }
0x176d   :  { %v5925_v24 = vpop.eup %5924 }
0x176e   :  { %v3894_v29 = vmul.f32 %v5925_v24, %v3866_v8  ;;  %v5728_v8 = vld [vmem:[%s7568_s16 + $0xd0] sm:$0xff]  }
0x176f   :  { %v5927_v57 = vpop.eup %5926 }
0x1770   :  { %v3895_v0 = vmul.f32 %v5927_v57, %v3867_v25  ;;  %v3904_v37 = vmul.f32 %v4872_v38, %v3894_v29  ;;  %v5731_v25 = vld [vmem:[%s7568_s16 + $0x98] sm:$0xff]  }
0x1772   :  { %v3905_v12 = vmul.f32 %v4872_v38, %v3895_v0  ;;  %v7330_v14 = vadd.f32 %v4873_v15, %v3904_v37 }
0x1773   :  { %v5929_v61 = vpop.eup %5928 }
0x1774   :  { %v5931_v9 = vpop.eup %5930  ;;  %v7332_v47 = vadd.f32 %v4873_v15, %v3905_v12  ;;  %v3896_v58 = vmul.f32 %v5929_v61, %v3868_v21  ;;  %v5738_v21 = vld [vmem:[%s7568_s16 + $0xf8] sm:$0xff]  }
0x1775   :  { %v3897_v13 = vmul.f32 %v5931_v9, %v7283_v34  ;;  %v5735_v34 = vld [vmem:[%s7568_s16 + $0xa8] sm:$0xff]  }
0x1776   :  { %v3918_v17 = vpack.c.bf16 %v7332_v47, %v7330_v14  ;;  %v3906_v49 = vmul.f32 %v4872_v38, %v3896_v58 }
0x1777   :  { %v3907_v20 = vmul.f32 %v4872_v38, %v3897_v13 }
0x1778   :  { %4044 = vmatmul.mubr.bf16.vlgmr.msra.gmra.mrb[88].mxu1 %v3918_v17  ;;  %v7338_v46 = vadd.f32 %v4873_v15, %v3906_v49 }
0x1779   :  { %4053 = vmatprep.mubr.bf16.mxu1 %v5980_v2  ;;  %v7340_v60 = vadd.f32 %v4873_v15, %v3907_v20  ;;  %v5726_v2 = vld [vmem:[%s7568_s16 + $0xc8] sm:$0xff]  }
0x177a   :  { %5081 = vmatprep.subr.bf16.mxu0 %v5726_v2 }
0x177b   :  { %v3919_v11 = vpack.c.bf16 %v7340_v60, %v7338_v46  ;;  %5082 = vmatpush3.bf16.msra.mxu0 %v5727_v6 }
0x177c   :  { %5083 = vmatprep.subr.bf16.mxu0 %v5728_v8 }
0x177f   :  { %5084 = vmatpush3.bf16.msra.mxu0 %v5729_v22 }
0x1780   :  { %4054 = vmatmul.mubr.bf16.gmra.mrb[92].mxu1 %v3919_v11  ;;  %5085 = vmatprep.subr.bf16.mxu0 %v5730_v10 }
0x1781   :  { %5452 = vmatprep.mubr.msk.bf16.mxu1 %vm5983_vm4, %v5982_v23 }
0x1783   :  { %5086 = vmatpush3.bf16.msra.mxu0 %v5731_v25 }
0x1784   :  { %5087 = vmatprep.subr.bf16.mxu0 %v5732_v4 }
0x1787   :  { %5088 = vmatpush3.bf16.msra.mxu0 %v5733_v48 }
0x1788   :  { %5089 = vmatprep.subr.bf16.mxu0 %v5734_v5 }
0x178b   :  { %5090 = vmatpush3.bf16.msra.mxu0 %v5735_v34 }
0x178c   :  { %5091 = vmatprep.subr.bf16.mxu0 %v5736_v39 }
0x178f   :  { %5092 = vmatpush3.bf16.msra.mxu0 %v5737_v27 }
0x1790   :  { %5093 = vmatprep.subr.bf16.mxu0 %v5738_v21 }
0x1793   :  { %5094 = vmatpush3.bf16.msra.mxu0 %v5739_v30 }
0x184b   :  { %v4045_v52 = vpop.f32.mrb[88].mxu1 }
0x184c   :  { %v7399_v36 = vadd.f32 %v4045_v52, %v3924_v62  ;;  %v4047_v28 = vpop.f32.mrb[89].mxu1 }
0x184d   :  { %v7401_v51 = vadd.f32 %v4047_v28, %v3928_v59  ;;  %v4049_v32 = vpop.f32.mrb[90].mxu1 }
0x184e   :  { %v4072_v19 = vmul.f32 0.044715, %v7399_v36  ;;  %v7404_v54 = vadd.f32 %v4049_v32, %v3924_v62  ;;  %v4051_v3 = vpop.f32.mrb[91].mxu1 }
0x184f   :  { %v4073_v1 = vmul.f32 0.044715, %v7401_v51  ;;  %v7407_v40 = vadd.f32 %v4051_v3, %v3928_v59 }
0x1850   :  { %v4080_v42 = vmul.f32 %v4072_v19, %v7399_v36  ;;  %v4074_v50 = vmul.f32 0.044715, %v7404_v54 }
0x1851   :  { %v4081_v41 = vmul.f32 %v4073_v1, %v7401_v51  ;;  %v4075_v16 = vmul.f32 0.044715, %v7407_v40  ;;  %v4064_v1 = vmul.f32 0.5, %v7399_v36 }
0x1852   :  { %v4088_v43 = vmul.f32 %v4080_v42, %v7399_v36  ;;  %v4082_v26 = vmul.f32 %v4074_v50, %v7404_v54  ;;  %v4066_v42 = vmul.f32 0.5, %v7404_v54 }
0x1853   :  { %v4089_v7 = vmul.f32 %v4081_v41, %v7401_v51  ;;  %v4083_v55 = vmul.f32 %v4075_v16, %v7407_v40  ;;  %v4055_v56 = vpop.f32.mrb[92].mxu1  ;;  %v4065_v41 = vmul.f32 0.5, %v7401_v51  ;;  %v4067_v16 = vmul.f32 0.5, %v7407_v40 }
0x1854   :  { %v4096_v53 = vadd.f32 %v4088_v43, %v7399_v36  ;;  %v4090_v63 = vmul.f32 %v4082_v26, %v7404_v54  ;;  %v7419_v18 = vadd.f32 %v4055_v56, %v3924_v62  ;;  %v4057_v24 = vpop.f32.mrb[93].mxu1 }
0x1855   :  { %v4091_v38 = vmul.f32 %v4083_v55, %v7407_v40  ;;  %v7422_v29 = vadd.f32 %v4057_v24, %v3928_v59  ;;  %v4059_v57 = vpop.f32.mrb[94].mxu1  ;;  %v4097_v0 = vadd.f32 %v4089_v7, %v7401_v51 }
0x1856   :  { %v4104_v37 = vmul.f32 0.7978846, %v4096_v53  ;;  %v4098_v15 = vadd.f32 %v4090_v63, %v7404_v54  ;;  %v4076_v12 = vmul.f32 0.044715, %v7419_v18  ;;  %v4060_v61 = vadd.f32 %v4059_v57, %v3924_v62  ;;  %v4061_v9 = vpop.f32.mrb[95].mxu1 }
0x1857   :  { %v4077_v58 = vmul.f32 0.044715, %v7422_v29  ;;  %v4062_v13 = vadd.f32 %v4061_v9, %v3928_v59  ;;  %v4099_v17 = vadd.f32 %v4091_v38, %v7407_v40  ;;  %v4105_v49 = vmul.f32 0.7978846, %v4097_v0 }
0x1858   :  { %5932 = vtanh.f32 %v4104_v37  ;;  %v4106_v20 = vmul.f32 0.7978846, %v4098_v15  ;;  %v4084_v11 = vmul.f32 %v4076_v12, %v7419_v18  ;;  %v4078_v45 = vmul.f32 0.044715, %v4060_v61 }
0x1859   :  { %v4085_v31 = vmul.f32 %v4077_v58, %v7422_v29  ;;  %v4079_v2 = vmul.f32 0.044715, %v4062_v13  ;;  %v4107_v6 = vmul.f32 0.7978846, %v4099_v17  ;;  %5934 = vtanh.f32 %v4105_v49 }
0x185a   :  { %5936 = vtanh.f32 %v4106_v20  ;;  %v4092_v8 = vmul.f32 %v4084_v11, %v7419_v18  ;;  %v4086_v22 = vmul.f32 %v4078_v45, %v4060_v61  ;;  %v4068_v54 = vmul.f32 0.5, %v7419_v18 }
0x185b   :  { %v4093_v10 = vmul.f32 %v4085_v31, %v7422_v29  ;;  %v4087_v25 = vmul.f32 %v4079_v2, %v4062_v13  ;;  %5938 = vtanh.f32 %v4107_v6  ;;  %v4070_v51 = vmul.f32 0.5, %v4060_v61  ;;  %v5740_v31 = vld [vmem:[%s7572_s20] sm:$0xff]   ;;  %v5745_v2 = vld [vmem:[%s7572_s20 + $0x28] sm:$0xff]   ;;  %v5746_v6 = vld [vmem:[%s7572_s20 + $0x30] sm:$0xff]  }
0x185c   :  { %v4094_v4 = vmul.f32 %v4086_v22, %v4060_v61  ;;  %v4100_v48 = vadd.f32 %v4092_v8, %v7419_v18  ;;  %v4069_v40 = vmul.f32 0.5, %v7422_v29  ;;  %v4071_v12 = vmul.f32 0.5, %v4062_v13  ;;  %5437 = vmatpush3.bf16.msra.mxu1 %v5740_v31  ;;  %v5741_v18 = vld [vmem:[%s7572_s20 + $0x8] sm:$0xff]   ;;  %v5747_v8 = vld [vmem:[%s7572_s20 + $0x38] sm:$0xff]   ;;  %v4359_v22 = vld [vmem:[%s7601_s29] sm:$0x3] }
0x185d   :  { %v4095_v5 = vmul.f32 %v4087_v25, %v4062_v13  ;;  %v4101_v34 = vadd.f32 %v4093_v10, %v7422_v29  ;;  %5438 = vmatprep.subr.bf16.mxu1 %v5982_v23  ;;  %v5742_v29 = vld [vmem:[%s7572_s20 + $0x10] sm:$0xff]   ;;  %v4376_v10 = vpack.c.bf16 %v4359_v22, %v4359_v22 }
0x185e   :  { %v4102_v39 = vadd.f32 %v4094_v4, %v4060_v61  ;;  %v4108_v27 = vmul.f32 0.7978846, %v4100_v48  ;;  %v5743_v61 = vld [vmem:[%s7572_s20 + $0x18] sm:$0xff]   ;;  %v4890_v4 = vld [vmem:[%s7569_s17 + $0x1] ss:$0 sm:$0xff] }
0x185f   :  { %v4103_v21 = vadd.f32 %v4095_v5, %v4062_v13  ;;  %v4109_v30 = vmul.f32 0.7978846, %v4101_v34  ;;  %v5744_v13 = vld [vmem:[%s7572_s20 + $0x20] sm:$0xff]  }
0x1860   :  { %v4110_v44 = vmul.f32 0.7978846, %v4102_v39  ;;  %5940 = vtanh.f32 %v4108_v27  ;;  %5439 = vmatpush3.bf16.msra.mxu1 %v5741_v18 }
0x1861   :  { %v4111_v62 = vmul.f32 0.7978846, %v4103_v21  ;;  %5942 = vtanh.f32 %v4109_v30  ;;  %5440 = vmatprep.subr.bf16.mxu1 %v5982_v23 }
0x1862   :  { %v5933_v59 = vpop.eup %5932  ;;  %5944 = vtanh.f32 %v4110_v44 }
0x1863   :  { %v5935_v52 = vpop.eup %5934  ;;  %v4120_v28 = vadd.f32 1.0, %v5933_v59  ;;  %5946 = vtanh.f32 %v4111_v62 }
0x1864   :  { %v5937_v32 = vpop.eup %5936  ;;  %v4121_v19 = vadd.f32 1.0, %v5935_v52  ;;  %5441 = vmatpush3.bf16.msra.mxu1 %v5742_v29 }
0x1865   :  { %v5939_v3 = vpop.eup %5938  ;;  %v4122_v50 = vadd.f32 1.0, %v5937_v32  ;;  %v4128_v26 = vmul.f32 %v4120_v28, %v4064_v1  ;;  %5442 = vmatprep.subr.bf16.mxu1 %v5982_v23 }
0x1866   :  { %v4123_v43 = vadd.f32 1.0, %v5939_v3  ;;  %v4129_v55 = vmul.f32 %v4121_v19, %v4065_v41 }
0x1867   :  { %v4130_v7 = vmul.f32 %v4122_v50, %v4066_v42 }
0x1868   :  { %v4131_v56 = vmul.f32 %v4123_v43, %v4067_v16  ;;  %5443 = vmatpush3.bf16.msra.mxu1 %v5743_v61 }
0x1869   :  { %v4136_v53 = vpack.c.bf16 %v4130_v7, %v4128_v26  ;;  %5444 = vmatprep.subr.bf16.mxu1 %v5982_v23 }
0x186a   :  { %v5941_v63 = vpop.eup %5940  ;;  %v4137_v24 = vpack.c.bf16 %v4131_v56, %v4129_v55 }
0x186b   :  { %v5943_v38 = vpop.eup %5942  ;;  %v4124_v57 = vadd.f32 1.0, %v5941_v63 }
0x186c   :  { %v5945_v0 = vpop.eup %5944  ;;  %4274 = vmatprep.mubr.bf16.mxu0 %v4137_v24  ;;  %v4125_v36 = vadd.f32 1.0, %v5943_v38  ;;  %5445 = vmatpush3.bf16.msra.mxu1 %v5744_v13 }
0x186d   :  { %v5947_v37 = vpop.eup %5946  ;;  %4275 = vmatmul.mubr.bf16.vlgmr.msra.gmra.mrb[92].mxu0 %v4136_v53  ;;  %v4126_v15 = vadd.f32 1.0, %v5945_v0  ;;  %v4132_v58 = vmul.f32 %v4124_v57, %v4068_v54  ;;  %5446 = vmatprep.subr.bf16.mxu1 %v5982_v23  ;;  %v5748_v0 = vld [vmem:[%s7574_s22] sm:$0xff]   ;;  %v5751_v54 = vld [vmem:[%s7574_s22 + $0x18] sm:$0xff]  }
0x186e   :  { %v4127_v9 = vadd.f32 1.0, %v5947_v37  ;;  %v4133_v49 = vmul.f32 %v4125_v36, %v4069_v40  ;;  %v5749_v36 = vld [vmem:[%s7574_s22 + $0x8] sm:$0xff]   ;;  %5456 = vmatprep.subr.bf16.mxu0 %v5748_v0  ;;  %v5750_v37 = vld [vmem:[%s7574_s22 + $0x10] sm:$0xff]  }
0x186f   :  { %v4134_v17 = vmul.f32 %v4126_v15, %v4070_v51  ;;  %5457 = vmatpush3.bf16.msra.mxu0 %v5748_v0  ;;  %v5752_v15 = vld [vmem:[%s7574_s22 + $0x20] sm:$0xff]  }
0x1870   :  { %v4135_v20 = vmul.f32 %v4127_v9, %v4071_v12  ;;  %5447 = vmatpush3.bf16.msra.mxu1 %v5745_v2  ;;  %5458 = vmatprep.subr.bf16.mxu0 %v5749_v36 }
0x1871   :  { %v4138_v11 = vpack.c.bf16 %v4134_v17, %v4132_v58  ;;  %5448 = vmatprep.subr.bf16.mxu1 %v5982_v23  ;;  %v5753_v58 = vld [vmem:[%s7574_s22 + $0x28] sm:$0xff]   ;;  %v5754_v17 = vld [vmem:[%s7574_s22 + $0x30] sm:$0xff]  }
0x1872   :  { %v4139_v45 = vpack.c.bf16 %v4135_v20, %v4133_v49  ;;  %v5755_v49 = vld [vmem:[%s7574_s22 + $0x38] sm:$0xff]  }
0x1873   :  { %5459 = vmatpush3.bf16.msra.mxu0 %v5749_v36 }
0x1874   :  { %4282 = vmatprep.mubr.bf16.mxu0 %v4139_v45  ;;  %5449 = vmatpush3.bf16.msra.mxu1 %v5746_v6 }
0x1875   :  { %4283 = vmatmul.mubr.bf16.gmra.mrb[96].mxu0 %v4138_v11  ;;  %5450 = vmatprep.subr.bf16.mxu1 %v5982_v23 }
0x1876   :  { %5460 = vmatprep.subr.bf16.mxu0 %v5750_v37 }
0x1877   :  { %5461 = vmatpush3.bf16.msra.mxu0 %v5750_v37 }
0x1878   :  { %5451 = vmatpush3.bf16.msra.mxu1 %v5747_v8  ;;  %5462 = vmatprep.subr.bf16.mxu0 %v5751_v54 }
0x187b   :  { %5453 = vmatmul.mubr.bf16.vlgmr.msra.gmra.mrb[96].mxu1 %v4376_v10  ;;  %5463 = vmatpush3.bf16.msra.mxu0 %v5751_v54  ;;  %v4909_v10 = vld [vmem:[%s7573_s21] ss:$0 sm:$0xff] }
0x187c   :  { %5464 = vmatprep.subr.bf16.mxu0 %v5752_v15 }
0x187f   :  { %5465 = vmatpush3.bf16.msra.mxu0 %v5752_v15 }
0x1880   :  { %5466 = vmatprep.subr.bf16.mxu0 %v5753_v58 }
0x1883   :  { %5467 = vmatpush3.bf16.msra.mxu0 %v5753_v58 }
0x1884   :  { %5468 = vmatprep.subr.bf16.mxu0 %v5754_v17 }
0x1887   :  { %5469 = vmatpush3.bf16.msra.mxu0 %v5754_v17 }
0x1888   :  { %5470 = vmatprep.subr.bf16.mxu0 %v5755_v49 }
0x188b   :  { %5471 = vmatpush3.bf16.msra.mxu0 %v5755_v49 }
0x1940   :  { %v5095_v25 = vpop.f32.mrb[92].mxu0 }
0x1941   :  { %v5096_v48 = vpop.f32.mrb[93].mxu0 }
0x1942   :  { %v5097_v5 = vadd.f32 %v5096_v48, %v5095_v25  ;;  %v5098_v34 = vpop.f32.mrb[94].mxu0 }
0x1943   :  { %v5099_v39 = vpop.f32.mrb[95].mxu0 }
0x1944   :  { %v4277_v27 = vadd.f32 %v5097_v5, %v4890_v4  ;;  %v5100_v21 = vadd.f32 %v5099_v39, %v5098_v34  ;;  %v4908_v39 = vld [vmem:[%s7600_s3 + $0x1] ss:$0 sm:$0xff]  ;;  %s5987_s3 = smov [#allocation2]  }
0x1945   :  { %s4615_s27 = sshll.u32 %s5987_s3, 4  ;;  %s4616_s27 = int_to_ptr.vmem [resolvable:$true] %s4615_s27 }
0x1946   :  { %v4280_v30 = vadd.f32 %v5100_v21, %v4890_v4  ;;  %v4291_v44 = vadd.f32 %v4277_v27, %v7330_v14  ;;  %s5956_s29 = scalar_lea.vmem %s4616_s27, 512  ;;  %p5961_p1 = scmp.lt.s32.totalorder %s4616_s27, %s4616_s27 }
0x1947   :  { %p5957_p0 = scmp.ne.s32.totalorder %s4616_s27, %s5956_s29  ;;  %p5962_p2 = scmp.lt.s32.totalorder %s5956_s29, %s5956_s29 }
0x1948   :  { %4295 = vadd.xlane.f32.xlu0 %v4291_v44  ;;  %v5101_v62 = vpop.f32.mrb[96].mxu0  ;;  %v4292_v23 = vadd.f32 %v4280_v30, %v7332_v47 }
0x1949   :  { %v5102_v59 = vpop.f32.mrb[97].mxu0  ;;  %p5963_p3 = por %p5962_p2, %p5961_p1 }
0x194a   :  { %v5103_v52 = vadd.f32 %v5102_v59, %v5101_v62  ;;  %4297 = vadd.xlane.f32.xlu1 %v4292_v23  ;;  %v5104_v28 = vpop.f32.mrb[98].mxu0 }
0x194b   :  { %v5105_v32 = vpop.f32.mrb[99].mxu0  ;;  %p5964_p4 = pnand %p5963_p3, %p5957_p0 }
0x194c   :  { %v4285_v19 = vadd.f32 %v5103_v52, %v4890_v4  ;;  %v5106_v3 = vadd.f32 %v5105_v32, %v5104_v28 }
0x194e   :  { %v4288_v1 = vadd.f32 %v5106_v3, %v4890_v4  ;;  %v4293_v42 = vadd.f32 %v4285_v19, %v7338_v46  ;;  %v4466_v51 = vpop.f32.mrb[96].mxu1  ;;  %v4907_v4 = vld [vmem:[%s7570_s18 + $0x1] ss:$0 sm:$0xff] }
0x194f   :  { %v5454_v40 = vpop.f32.mrb[97].mxu1  ;;  %v4467_v5 = vadd.f32 %v4909_v10, %v4466_v51 }
0x1950   :  { %4299 = vadd.xlane.f32.xlu0 %v4293_v42  ;;  %v4294_v50 = vadd.f32 %v4288_v1, %v7340_v60  ;;  %v4469_v12 = vpop.f32.mrb[98].mxu1 }
0x1951   :  { %v5455_v9 = vpop.f32.mrb[99].mxu1  ;;  %v4475_v62 = vrot.slane %v4467_v5, %v6291_v33 }
0x1952   :  { %4301 = vadd.xlane.f32.xlu1 %v4294_v50 }
0x19d5   :  { %v4296_v41 = vpop.xlane.xlu0 %4295 }
0x19d6   :  { %v4303_v14 = vmul.f32 0.0078125, %v4296_v41 }
0x19d7   :  { %v4298_v16 = vpop.xlane.xlu1 %4297 }
0x19d8   :  { %v7482_v43 = vsub.f32 %v4291_v44, %v4303_v14  ;;  %v4304_v47 = vmul.f32 0.0078125, %v4298_v16  ;;  %v4479_v14 = vrot.slane %v4467_v5, %v6294_v35 }
0x19da   :  { %v7484_v26 = vsub.f32 %v4292_v23, %v4304_v47  ;;  %v4311_v7 = vmul.f32 %v7482_v43, %v7482_v43 }
0x19dc   :  { %4315 = vadd.xlane.f32.xlu0 %v4311_v7  ;;  %v4312_v55 = vmul.f32 %v7484_v26, %v7484_v26 }
0x19dd   :  { %v4300_v46 = vpop.xlane.xlu0 %4299 }
0x19de   :  { %v4305_v56 = vmul.f32 0.0078125, %v4300_v46  ;;  %4317 = vadd.xlane.f32.xlu1 %v4312_v55 }
0x19df   :  { %v4302_v60 = vpop.xlane.xlu1 %4301 }
0x19e0   :  { %v7490_v53 = vsub.f32 %v4293_v42, %v4305_v56  ;;  %v4306_v63 = vmul.f32 0.0078125, %v4302_v60 }
0x19e2   :  { %v7492_v24 = vsub.f32 %v4294_v50, %v4306_v63  ;;  %v4313_v38 = vmul.f32 %v7490_v53, %v7490_v53 }
0x19e4   :  { %4319 = vadd.xlane.f32.xlu0 %v4313_v38  ;;  %v4314_v57 = vmul.f32 %v7492_v24, %v7492_v24 }
0x19e6   :  { %4321 = vadd.xlane.f32.xlu1 %v4314_v57 }
0x1a69   :  { %v4316_v20 = vpop.xlane.xlu0 %4315 }
0x1a6a   :  { %v4323_v11 = vmul.f32 0.0078125, %v4316_v20 }
0x1a6b   :  { %v4318_v45 = vpop.xlane.xlu1 %4317 }
0x1a6c   :  { %v4327_v31 = vadd.f32 1e-12, %v4323_v11  ;;  %v4324_v18 = vmul.f32 0.0078125, %v4318_v45 }
0x1a6e   :  { %5948 = vrsqrt.f32 %v4327_v31  ;;  %v4328_v29 = vadd.f32 1e-12, %v4324_v18 }
0x1a70   :  { %5950 = vrsqrt.f32 %v4328_v29 }
0x1a71   :  { %v4320_v61 = vpop.xlane.xlu0 %4319 }
0x1a72   :  { %v4325_v13 = vmul.f32 0.0078125, %v4320_v61 }
0x1a73   :  { %v4322_v2 = vpop.xlane.xlu1 %4321 }
0x1a74   :  { %v4329_v6 = vadd.f32 1e-12, %v4325_v13  ;;  %v4326_v8 = vmul.f32 0.0078125, %v4322_v2 }
0x1a76   :  { %5952 = vrsqrt.f32 %v4329_v6  ;;  %v4330_v22 = vadd.f32 1e-12, %v4326_v8 }
0x1a78   :  { %v5949_v25 = vpop.eup %5948  ;;  %5954 = vrsqrt.f32 %v4330_v22 }
0x1a79   :  { %v4335_v48 = vmul.f32 %v5949_v25, %v7482_v43 }
0x1a7a   :  { %v5951_v34 = vpop.eup %5950 }
0x1a7b   :  { %v4336_v27 = vmul.f32 %v5951_v34, %v7484_v26  ;;  %v4345_v21 = vmul.f32 %v4907_v4, %v4335_v48  ;;  %v4918_v26 = vld [vmem:[%s7575_s23] ss:$0 sm:$0xff] }
0x1a7d   :  { %v4346_v30 = vmul.f32 %v4907_v4, %v4336_v27  ;;  %v4355_v44 = vadd.f32 %v4908_v39, %v4345_v21 }
0x1a7f   :  { %v4356_v23 = vadd.f32 %v4908_v39, %v4346_v30  ;;  %v4480_v28 = vadd.f32 %v4475_v62, %v4355_v44 }
0x1a80   :  { %v5953_v59 = vpop.eup %5952 }
0x1a81   :  { %v4337_v52 = vmul.f32 %v5953_v59, %v7490_v53  ;;  %v4481_v32 = vadd.f32 %v4475_v62, %v4356_v23 }
0x1a82   :  { %v5955_v19 = vpop.eup %5954 }
0x1a83   :  { %v4338_v3 = vmul.f32 %v5955_v19, %v7492_v24  ;;  %v4347_v1 = vmul.f32 %v4907_v4, %v4337_v52  ;;  %v4500_v42 = vpack.c.bf16 %v4481_v32, %v4480_v28 }
0x1a85   :  { %v4348_v50 = vmul.f32 %v4907_v4, %v4338_v3  ;;  %v4357_v41 = vadd.f32 %v4908_v39, %v4347_v1  ;;  %5472 = vmatprep.mubr.bf16.mxu0 %v4500_v42 }
0x1a87   :  { %v4358_v16 = vadd.f32 %v4908_v39, %v4348_v50  ;;  %v4482_v43 = vadd.f32 %v4479_v14, %v4357_v41 }
0x1a89   :  { %v4483_v47 = vadd.f32 %v4479_v14, %v4358_v16 }
0x1a8b   :  { %v4501_v33 = vpack.c.bf16 %v4483_v47, %v4482_v43 }
0x1a8d   :  { %5473 = vmatmul.mubr.bf16.vlgmr.msra.gmra.mrb[100].mxu0 %v4501_v33 }
0x1b60   :  { %v5474_v7 = vpop.f32.mrb[100].mxu0 }
0x1b61   :  { %v4600_v55 = vadd.f32 %v5474_v7, %v4918_v26  ;;  %v4591_v46 = vpop.f32.mrb[101].mxu0 }
0x1b62   :  { %v4592_v56 = vadd.f32 %v4918_v26, %v4591_v46  ;;  %v5475_v60 = vpop.f32.mrb[102].mxu0 }
0x1b63   :  { %4608 = vst [vmem:[#allocation2 + $0x10] sm:$0xff] %v4600_v55  ;;  %v4603_v53 = vadd.f32 %v5475_v60, %v4918_v26  ;;  %v4594_v35 = vpop.f32.mrb[103].mxu0 }
0x1b64   :  { %4606 = vst [vmem:[#allocation2] sm:$0xff] %v4592_v56  ;;  %v4595_v63 = vadd.f32 %v4918_v26, %v4594_v35 }
0x1b65   :  { %4609 = vst [vmem:[#allocation2 + $0x18] sm:$0xff] %v4603_v53 }
0x1b66   :  { %4607 = vst [vmem:[#allocation2 + $0x8] sm:$0xff] %v4595_v63 }
0x1b67   :  { %5967 = shalt.err (!%p5964_p4)
}
0x1b68   :  { %s5968_s7 = scalar_lea.hbm %s7576_s24, 512 }
0x1b69   :  { %p5969_p5 = scmp.ne.s32.totalorder %s7576_s24, %s5968_s7  ;;  %p5972_p6 = scmp.lt.u32.totalorder %s5968_s7, %s7576_s24 }
0x1b6b   :  { %p5974_p7 = pnand %p5972_p6, %p5969_p5 }
0x1b6d   :  { %5977 = shalt.err (!%p5974_p7)
}
0x1b6e   :  { %s5988_s15 = smov 128   ;;  %s5989_s16 = smov 8  }
0x1b6f   :  { %4621 = dma.vmem_to_hbm [thread:$0]  %s4616_s27, 512, %s7576_s24, [#allocation3], %s5988_s15, %s5988_s15, %s5989_s16  }
0x1b70   :  { %5978 = dma.done.wait [#allocation3], 512  }
0x1b71   :  { %5979 = vsyncadd [#allocation3], 4294966784 }
0x1b72   :  { %4625 = vsyncpa [#allocation3], 1 }

</bundles_post_ra>
